<compile_context>
chip_gen: v7x
topology: tpu7x:2x2x1
jax: 0.10.0
libtpu: 0.0.40
codegen_flags: <defaults>
</compile_context>

<pallas_src>
from functools import partial

import jax
import jax.numpy as jnp
from jax.experimental import pallas as pl
from jax.experimental.pallas import tpu as pltpu

HIDDEN = 1024
LANE = 128


def _round_up(x, m):
    return ((x + m - 1) // m) * m


def _prelu(x, alpha):
    # PReLU with a single shared parameter (PyTorch default num_parameters=1).
    return jnp.where(x > 0, x, alpha * x)


def q_vals_kernel(x_ref, w1_ref, b1_ref, a1_ref, w2_ref, b2_ref, a2_ref,
                  w3_ref, b3_ref, o_ref):
    # bf16 operands on the MXU, f32 accumulation end-to-end.
    a1 = a1_ref[0]          # SMEM scalar
    a2 = a2_ref[0]          # SMEM scalar

    x = x_ref[...]          # already bf16

    h1 = jnp.dot(x, w1_ref[...], preferred_element_type=jnp.float32) + b1_ref[...]
    h1 = _prelu(h1, a1).astype(jnp.bfloat16)

    h2 = jnp.dot(h1, w2_ref[...], preferred_element_type=jnp.float32) + b2_ref[...]
    h2 = _prelu(h2, a2).astype(jnp.bfloat16)

    out = jnp.dot(h2, w3_ref[...], preferred_element_type=jnp.float32) + b3_ref[...]
    o_ref[...] = out.astype(o_ref.dtype)


def prepare_params(params):
    """One-time: pad K / N axes up to 128 lanes and cast weights to bf16.

    Zero rows/cols are mathematically inert in x @ W, so padding does not change
    the result; it just makes every matmul MXU-shaped and every store lane-dense.
    """
    w1, b1, a1, w2, b2, a2, w3, b3 = params
    in_ft = w1.shape[0]
    n_class = w3.shape[1]

    in_ft_p = _round_up(in_ft, LANE)
    n_class_p = _round_up(n_class, LANE)

    w1_p = jnp.zeros((in_ft_p, HIDDEN), jnp.bfloat16).at[:in_ft, :].set(
        w1.astype(jnp.bfloat16))
    w2_p = w2.astype(jnp.bfloat16)
    w3_p = jnp.zeros((HIDDEN, n_class_p), jnp.bfloat16).at[:, :n_class].set(
        w3.astype(jnp.bfloat16))
    b3_p = jnp.zeros((1, n_class_p), jnp.float32).at[:, :n_class].set(b3)

    meta = (in_ft, n_class, in_ft_p, n_class_p)
    return (w1_p, b1, a1, w2_p, b2, a2, w3_p, b3_p), meta


@partial(jax.jit, static_argnames=("meta", "tile_m"))
def q_vals_forward(x, prepared, meta, *, tile_m=256):
    """x: (B, input_ft) float32. Returns (B, n_class) float32."""
    w1_p, b1, a1, w2_p, b2, a2, w3_p, b3_p = prepared
    in_ft, n_class, in_ft_p, n_class_p = meta
    B = x.shape[0]

    # Batch tiling: big MXU-friendly tile, zero-pad B up to a tile multiple;
    # clamp tile_m down for tiny batches so we don't over-pad.
    tile_m = max(8, min(tile_m, _round_up(B, 8)))
    B_p = _round_up(B, tile_m)
    # Build the padded x buffer directly in bf16 (kernel consumes bf16 on the MXU).
    x_p = jnp.zeros((B_p, in_ft_p), jnp.bfloat16).at[:B, :in_ft].set(
        x.astype(jnp.bfloat16))

    grid = (B_p // tile_m,)

    # Constant index_map => weights/biases are DMA'd once and stay resident in VMEM.
    full = lambda shape: pl.BlockSpec(shape, lambda i: (0, 0))
    smem_scalar = pl.BlockSpec(memory_space=pltpu.MemorySpace.SMEM)

    out_p = pl.pallas_call(
        q_vals_kernel,
        out_shape=jax.ShapeDtypeStruct((B_p, n_class_p), jnp.float32),
        grid_spec=pltpu.PrefetchScalarGridSpec(
            num_scalar_prefetch=0,
            grid=grid,
            in_specs=[
                pl.BlockSpec((tile_m, in_ft_p), lambda i: (i, 0)),  # x tile (bf16)
                full((in_ft_p, HIDDEN)),                            # w1 (bf16)
                full((1, HIDDEN)),                                  # b1 (f32)
                smem_scalar,                                        # prelu alpha 1
                full((HIDDEN, HIDDEN)),                             # w2 (bf16)
                full((1, HIDDEN)),                                  # b2 (f32)
                smem_scalar,                                        # prelu alpha 2
                full((HIDDEN, n_class_p)),                          # w3 (bf16, N padded)
                full((1, n_class_p)),                               # b3 (f32, N padded)
            ],
            out_specs=pl.BlockSpec((tile_m, n_class_p), lambda i: (i, 0)),
        ),
        compiler_params=pltpu.CompilerParams(
            dimension_semantics=("parallel",),
            vmem_limit_bytes=32 * 1024 * 1024,
        ),
    )(x_p, w1_p, b1, a1, w2_p, b2, a2, w3_p, b3_p)

    return out_p[:B, :n_class]


def init_params(key, input_ft, n_class=2):
    """Deterministic synthetic init mirroring the PyTorch module's shapes.

    Linear weights use uniform(-1/sqrt(fan_in), 1/sqrt(fan_in)) (torch.nn.Linear's
    default distribution); PReLU alpha = 0.25 (torch default, num_parameters=1).
    Weights are kept in f32 here; prepare_params casts to bf16 for the MXU.
    """
    ks = jax.random.split(key, 6)

    def linear(kw, kb, fan_in, fan_out):
        bound = 1.0 / jnp.sqrt(float(fan_in))
        w = jax.random.uniform(kw, (fan_in, fan_out), jnp.float32, -bound, bound)
        b = jax.random.uniform(kb, (1, fan_out), jnp.float32, -bound, bound)
        return w, b

    w1, b1 = linear(ks[0], ks[1], input_ft, HIDDEN)
    w2, b2 = linear(ks[2], ks[3], HIDDEN, HIDDEN)
    w3, b3 = linear(ks[4], ks[5], HIDDEN, n_class)
    a1 = jnp.full((1,), 0.25, jnp.float32)
    a2 = jnp.full((1,), 0.25, jnp.float32)
    return (w1, b1, a1, w2, b2, a2, w3, b3)


def q_vals_reference(x, params):
    """Pure-JAX reference mirroring the kernel's bf16-weight / f32-accumulate math."""
    w1, b1, a1, w2, b2, a2, w3, b3 = params
    bf = lambda t: t.astype(jnp.bfloat16)
    h1 = jnp.dot(bf(x), bf(w1), preferred_element_type=jnp.float32) + b1
    h1 = jnp.where(h1 > 0, h1, a1[0] * h1)
    h2 = jnp.dot(bf(h1), bf(w2), preferred_element_type=jnp.float32) + b2
    h2 = jnp.where(h2 > 0, h2, a2[0] * h2)
    return jnp.dot(bf(h2), bf(w3), preferred_element_type=jnp.float32) + b3


if __name__ == "__main__":
    key = jax.random.PRNGKey(0)
    k_x, k_p = jax.random.split(key)

    batch, input_ft, n_class = 8, 32, 2
    x = jax.random.normal(k_x, (batch, input_ft), jnp.float32)
    params = init_params(k_p, input_ft, n_class)

    prepared, meta = prepare_params(params)
    out = q_vals_forward(x, prepared, meta)
    out = jax.block_until_ready(out)

    ref = q_vals_reference(x, params)
    assert out.shape == (batch, n_class)
    assert jnp.allclose(out, ref, atol=2e-3, rtol=2e-3), "mismatch vs reference"

    print("KERNEL_OK")
</pallas_src>

<mosaic_0001>
module attributes {stable_mosaic.version = 11 : i64} {
  func.func @q_vals_kernel(%arg0: i32, %arg1: memref<8x128xbf16, #tpu.memory_space<vmem>>, %arg2: memref<128x1024xbf16, #tpu.memory_space<vmem>>, %arg3: memref<1x1024xf32, #tpu.memory_space<vmem>>, %arg4: memref<1xf32, #tpu.memory_space<smem>>, %arg5: memref<1024x1024xbf16, #tpu.memory_space<vmem>>, %arg6: memref<1x1024xf32, #tpu.memory_space<vmem>>, %arg7: memref<1xf32, #tpu.memory_space<smem>>, %arg8: memref<1024x128xbf16, #tpu.memory_space<vmem>>, %arg9: memref<1x128xf32, #tpu.memory_space<vmem>>, %arg10: memref<8x128xf32, #tpu.memory_space<vmem>>) attributes {dimension_semantics = [#tpu.dimension_semantics<parallel>], iteration_bounds = array<i64: 1>, scalar_prefetch = 0 : i64, scratch_operands = 0 : i64, tpu.core_type = #tpu.core_type<tc>, window_params = [{transform_indices = @transform_0, window_bounds = array<i64: 8, 128>}, {pipeline_mode = #tpu.pipeline_mode<synchronous>, transform_indices = @transform_1, window_bounds = array<i64: 128, 1024>}, {pipeline_mode = #tpu.pipeline_mode<synchronous>, transform_indices = @transform_2, window_bounds = array<i64: 1, 1024>}, {transform_indices = @transform_3, window_bounds = array<i64: 1>}, {pipeline_mode = #tpu.pipeline_mode<synchronous>, transform_indices = @transform_4, window_bounds = array<i64: 1024, 1024>}, {pipeline_mode = #tpu.pipeline_mode<synchronous>, transform_indices = @transform_5, window_bounds = array<i64: 1, 1024>}, {transform_indices = @transform_6, window_bounds = array<i64: 1>}, {pipeline_mode = #tpu.pipeline_mode<synchronous>, transform_indices = @transform_7, window_bounds = array<i64: 1024, 128>}, {pipeline_mode = #tpu.pipeline_mode<synchronous>, transform_indices = @transform_8, window_bounds = array<i64: 1, 128>}, {transform_indices = @transform_9, window_bounds = array<i64: 8, 128>}]} {
    %c0 = arith.constant 0 : index
    %0 = memref.load %arg4[%c0] : memref<1xf32, #tpu.memory_space<smem>>
    %c0_0 = arith.constant 0 : index
    %1 = memref.load %arg7[%c0_0] : memref<1xf32, #tpu.memory_space<smem>>
    %c0_1 = arith.constant 0 : index
    %c0_2 = arith.constant 0 : index
    %2 = vector.load %arg1[%c0_1, %c0_2] : memref<8x128xbf16, #tpu.memory_space<vmem>>, vector<8x128xbf16>
    %c0_3 = arith.constant 0 : index
    %c0_4 = arith.constant 0 : index
    %3 = vector.load %arg2[%c0_3, %c0_4] : memref<128x1024xbf16, #tpu.memory_space<vmem>>, vector<128x1024xbf16>
    %cst = arith.constant dense<0.000000e+00> : vector<8x1024xf32>
    %4 = tpu.matmul %2, %3, %cst {dimension_numbers = #tpu.dot_dimension_numbers<[1], [0], [0], [1], [0, 0, 1, 1], [], []>} : vector<8x128xbf16>, vector<128x1024xbf16>, vector<8x1024xf32> -> vector<8x1024xf32>
    %c0_5 = arith.constant 0 : index
    %c0_6 = arith.constant 0 : index
    %5 = vector.load %arg3[%c0_5, %c0_6] : memref<1x1024xf32, #tpu.memory_space<vmem>>, vector<1x1024xf32>
    %6 = vector.broadcast %5 : vector<1x1024xf32> to vector<8x1024xf32>
    %7 = arith.addf %4, %6 : vector<8x1024xf32>
    %cst_7 = arith.constant 0.000000e+00 : f32
    %8 = vector.broadcast %cst_7 : f32 to vector<8x1024xf32>
    %9 = arith.cmpf ogt, %7, %8 : vector<8x1024xf32>
    %10 = vector.broadcast %0 : f32 to vector<8x1024xf32>
    %11 = arith.mulf %10, %7 : vector<8x1024xf32>
    %12 = arith.select %9, %7, %11 : vector<8x1024xi1>, vector<8x1024xf32>
    %13 = arith.truncf %12 : vector<8x1024xf32> to vector<8x1024xbf16>
    %c0_8 = arith.constant 0 : index
    %c0_9 = arith.constant 0 : index
    %14 = vector.load %arg5[%c0_8, %c0_9] : memref<1024x1024xbf16, #tpu.memory_space<vmem>>, vector<1024x1024xbf16>
    %cst_10 = arith.constant dense<0.000000e+00> : vector<8x1024xf32>
    %15 = tpu.matmul %13, %14, %cst_10 {dimension_numbers = #tpu.dot_dimension_numbers<[1], [0], [0], [1], [0, 0, 1, 1], [], []>} : vector<8x1024xbf16>, vector<1024x1024xbf16>, vector<8x1024xf32> -> vector<8x1024xf32>
    %c0_11 = arith.constant 0 : index
    %c0_12 = arith.constant 0 : index
    %16 = vector.load %arg6[%c0_11, %c0_12] : memref<1x1024xf32, #tpu.memory_space<vmem>>, vector<1x1024xf32>
    %17 = vector.broadcast %16 : vector<1x1024xf32> to vector<8x1024xf32>
    %18 = arith.addf %15, %17 : vector<8x1024xf32>
    %cst_13 = arith.constant 0.000000e+00 : f32
    %19 = vector.broadcast %cst_13 : f32 to vector<8x1024xf32>
    %20 = arith.cmpf ogt, %18, %19 : vector<8x1024xf32>
    %21 = vector.broadcast %1 : f32 to vector<8x1024xf32>
    %22 = arith.mulf %21, %18 : vector<8x1024xf32>
    %23 = arith.select %20, %18, %22 : vector<8x1024xi1>, vector<8x1024xf32>
    %24 = arith.truncf %23 : vector<8x1024xf32> to vector<8x1024xbf16>
    %c0_14 = arith.constant 0 : index
    %c0_15 = arith.constant 0 : index
    %25 = vector.load %arg8[%c0_14, %c0_15] : memref<1024x128xbf16, #tpu.memory_space<vmem>>, vector<1024x128xbf16>
    %cst_16 = arith.constant dense<0.000000e+00> : vector<8x128xf32>
    %26 = tpu.matmul %24, %25, %cst_16 {dimension_numbers = #tpu.dot_dimension_numbers<[1], [0], [0], [1], [0, 0, 1, 1], [], []>} : vector<8x1024xbf16>, vector<1024x128xbf16>, vector<8x128xf32> -> vector<8x128xf32>
    %c0_17 = arith.constant 0 : index
    %c0_18 = arith.constant 0 : index
    %27 = vector.load %arg9[%c0_17, %c0_18] : memref<1x128xf32, #tpu.memory_space<vmem>>, vector<1x128xf32>
    %28 = vector.broadcast %27 : vector<1x128xf32> to vector<8x128xf32>
    %29 = arith.addf %26, %28 : vector<8x128xf32>
    %c0_19 = arith.constant 0 : index
    %c0_20 = arith.constant 0 : index
    %30 = vector.load %arg10[%c0_19, %c0_20] : memref<8x128xf32, #tpu.memory_space<vmem>>, vector<8x128xf32>
    tpu.vector_store %arg10[%c0_19, %c0_20], %29 {strides = array<i32>} : memref<8x128xf32, #tpu.memory_space<vmem>>, vector<8x128xf32>,
    return
  }
  func.func @transform_0(%arg0: i32) -> (i32, i32) {
    %c0_i32 = arith.constant 0 : i32
    %c0_i32_0 = arith.constant 0 : i32
    return %arg0, %c0_i32 : i32, i32
  }
  func.func @transform_1(%arg0: i32) -> (i32, i32) {
    %c0_i32 = arith.constant 0 : i32
    %c0_i32_0 = arith.constant 0 : i32
    %c0_i32_1 = arith.constant 0 : i32
    return %c0_i32, %c0_i32_0 : i32, i32
  }
  func.func @transform_2(%arg0: i32) -> (i32, i32) {
    %c0_i32 = arith.constant 0 : i32
    %c0_i32_0 = arith.constant 0 : i32
    %c0_i32_1 = arith.constant 0 : i32
    return %c0_i32, %c0_i32_0 : i32, i32
  }
  func.func @transform_3(%arg0: i32) -> i32 {
    %c0_i32 = arith.constant 0 : i32
    %c0_i32_0 = arith.constant 0 : i32
    return %c0_i32 : i32
  }
  func.func @transform_4(%arg0: i32) -> (i32, i32) {
    %c0_i32 = arith.constant 0 : i32
    %c0_i32_0 = arith.constant 0 : i32
    %c0_i32_1 = arith.constant 0 : i32
    return %c0_i32, %c0_i32_0 : i32, i32
  }
  func.func @transform_5(%arg0: i32) -> (i32, i32) {
    %c0_i32 = arith.constant 0 : i32
    %c0_i32_0 = arith.constant 0 : i32
    %c0_i32_1 = arith.constant 0 : i32
    return %c0_i32, %c0_i32_0 : i32, i32
  }
  func.func @transform_6(%arg0: i32) -> i32 {
    %c0_i32 = arith.constant 0 : i32
    %c0_i32_0 = arith.constant 0 : i32
    return %c0_i32 : i32
  }
  func.func @transform_7(%arg0: i32) -> (i32, i32) {
    %c0_i32 = arith.constant 0 : i32
    %c0_i32_0 = arith.constant 0 : i32
    %c0_i32_1 = arith.constant 0 : i32
    return %c0_i32, %c0_i32_0 : i32, i32
  }
  func.func @transform_8(%arg0: i32) -> (i32, i32) {
    %c0_i32 = arith.constant 0 : i32
    %c0_i32_0 = arith.constant 0 : i32
    %c0_i32_1 = arith.constant 0 : i32
    return %c0_i32, %c0_i32_0 : i32, i32
  }
  func.func @transform_9(%arg0: i32) -> (i32, i32) {
    %c0_i32 = arith.constant 0 : i32
    %c0_i32_0 = arith.constant 0 : i32
    return %arg0, %c0_i32 : i32, i32
  }
}

</mosaic_0001>

<bundles_post_ra>
// kernel: q_vals_forward.1
= control target key start
LH: loop header
LB: loop body
LE: loop exit
PB: predicated region body
PF: predicated region fallthrough
CT: control target
= control target key end

     0   :  { %16 = vsyncpa [#allocation5], 0  ;;  %s6561_s0 = inlined_call_operand.vmem [shape: bf16[8,128], index: 0, kind: input, shape index: {}]   ;;  %s6562_s1 = inlined_call_operand.hbm [shape: bf16[128,1024], index: 1, kind: input, shape index: {}]   ;;  %s6563_s2 = inlined_call_operand.hbm [shape: f32[1,1024], index: 2, kind: input, shape index: {}]   ;;  %s6564_s3 = inlined_call_operand.<no memory space> [shape: f32[1], index: 3, kind: input, shape index: {}]   ;;  %s6565_s4 = inlined_call_operand.hbm [shape: bf16[1024,1024], index: 4, kind: input, shape index: {}]   ;;  %s6566_s5 = inlined_call_operand.hbm [shape: f32[1,1024], index: 5, kind: input, shape index: {}]   ;;  %s6567_s6 = inlined_call_operand.<no memory space> [shape: f32[1], index: 6, kind: input, shape index: {}]   ;;  %s6568_s7 = inlined_call_operand.hbm [shape: bf16[1024,128], index: 7, kind: input, shape index: {}]   ;;  %s6569_s8 = inlined_call_operand.hbm [shape: f32[1,128], index: 8, kind: input, shape index: {}]   ;;  %s6570_s9 = inlined_call_operand.vmem [shape: f32[8,128], index: 9, kind: output, shape index: {}]  }
   0x1   :  { %17 = vsyncpa [#allocation7], 0 }
   0x2   :  { %18 = vsyncpa [#allocation10], 0 }
   0x3   :  { %19 = vsyncpa [#allocation13], 0  ;;  %s6228_s30 = smov [#allocation6]   ;;  %s6229_s11 = smov [#allocation9]  }
   0x4   :  { %s40_s10 = sshll.u32 %s6228_s30, 4  ;;  %s64_s12 = sshll.u32 %s6229_s11, 4  ;;  %s41_s10 = int_to_ptr.vmem [resolvable:$true] %s40_s10  ;;  %s65_s12 = int_to_ptr.vmem [resolvable:$true] %s64_s12 }
   0x5   :  { %s6088_s15 = scalar_lea.hbm %s6563_s2, 128 }
   0x6   :  { %p6089_p0 = scmp.ne.s32.totalorder %s6563_s2, %s6088_s15  ;;  %p6092_p1 = scmp.lt.u32.totalorder %s6088_s15, %s6563_s2 }
   0x8   :  { %p6094_p2 = pnand %p6092_p1, %p6089_p0 }
   0xa   :  { %6097 = shalt.err (!%p6094_p2)
}
   0xb   :  { %s6098_s20 = scalar_lea.vmem %s41_s10, 128  ;;  %p6103_p4 = scmp.lt.s32.totalorder %s41_s10, %s41_s10 }
   0xc   :  { %p6099_p3 = scmp.ne.s32.totalorder %s41_s10, %s6098_s20  ;;  %p6104_p5 = scmp.lt.s32.totalorder %s6098_s20, %s6098_s20 }
   0xe   :  { %p6105_p6 = por %p6104_p5, %p6103_p4 }
  0x10   :  { %p6106_p7 = pnand %p6105_p6, %p6099_p3 }
  0x12   :  { %6109 = shalt.err (!%p6106_p7)
}
  0x13   :  { %43 = dma.hbm_to_vmem [thread:$0]  %s6563_s2, 128, %s41_s10, [#allocation7]  }
  0x14   :  { %s6110_s25 = scalar_lea.hbm %s6566_s5, 128 }
  0x15   :  { %p6111_p8 = scmp.ne.s32.totalorder %s6566_s5, %s6110_s25  ;;  %p6114_p9 = scmp.lt.u32.totalorder %s6110_s25, %s6566_s5 }
  0x17   :  { %p6116_p10 = pnand %p6114_p9, %p6111_p8 }
  0x19   :  { %6119 = shalt.err (!%p6116_p10)
}
  0x1a   :  { %s6120_s30 = scalar_lea.vmem %s65_s12, 128  ;;  %p6125_p12 = scmp.lt.s32.totalorder %s65_s12, %s65_s12 }
  0x1b   :  { %p6121_p11 = scmp.ne.s32.totalorder %s65_s12, %s6120_s30  ;;  %p6126_p13 = scmp.lt.s32.totalorder %s6120_s30, %s6120_s30 }
  0x1d   :  { %p6127_p0 = por %p6126_p13, %p6125_p12 }
  0x1f   :  { %p6128_p1 = pnand %p6127_p0, %p6121_p11 }
  0x21   :  { %6131 = shalt.err (!%p6128_p1)
}
  0x22   :  { %67 = dma.hbm_to_vmem [thread:$0]  %s6566_s5, 128, %s65_s12, [#allocation10]  }
  0x23   :  { %s6230_s11 = smov [#allocation4]   ;;  %s6132_s16 = scalar_lea.hbm %s6562_s1, 8192 }
  0x24   :  { %s27_s13 = sshll.u32 %s6230_s11, 4  ;;  %p6133_p2 = scmp.ne.s32.totalorder %s6562_s1, %s6132_s16  ;;  %s28_s13 = int_to_ptr.vmem [resolvable:$true] %s27_s13 }
  0x25   :  { %p6136_p3 = scmp.lt.u32.totalorder %s6132_s16, %s6562_s1 }
  0x27   :  { %p6138_p4 = pnand %p6136_p3, %p6133_p2 }
  0x29   :  { %6141 = shalt.err (!%p6138_p4)
}
  0x2a   :  { %s6142_s21 = scalar_lea.vmem %s28_s13, 8192  ;;  %p6147_p6 = scmp.lt.s32.totalorder %s28_s13, %s28_s13 }
  0x2b   :  { %p6143_p5 = scmp.ne.s32.totalorder %s28_s13, %s6142_s21  ;;  %p6148_p7 = scmp.lt.s32.totalorder %s6142_s21, %s6142_s21 }
  0x2d   :  { %p6149_p8 = por %p6148_p7, %p6147_p6 }
  0x2f   :  { %p6150_p9 = pnand %p6149_p8, %p6143_p5 }
  0x31   :  { %6153 = shalt.err (!%p6150_p9)
}
  0x32   :  { %s6231_s5 = smov 512   ;;  %s6232_s12 = smov 32  }
  0x33   :  { %33 = dma.hbm_to_vmem [thread:$0]  %s6562_s1, 8192, %s28_s13, [#allocation5], %s6231_s5, %s6231_s5, %s6232_s12  }
  0x34   :  { %s6233_s24 = smov [#allocation8]   ;;  %s6234_s26 = smov [#allocation11]  }
  0x35   :  { %s51_s25 = sshll.u32 %s6233_s24, 4  ;;  %s75_s27 = sshll.u32 %s6234_s26, 4  ;;  %s52_s25 = int_to_ptr.vmem [resolvable:$true] %s51_s25  ;;  %s76_s27 = int_to_ptr.vmem [resolvable:$true] %s75_s27 }
  0x36   :  { %s6154_s30 = scalar_lea.hbm %s6565_s4, 65536 }
  0x37   :  { %p6155_p10 = scmp.ne.s32.totalorder %s6565_s4, %s6154_s30  ;;  %p6158_p11 = scmp.lt.u32.totalorder %s6154_s30, %s6565_s4 }
  0x39   :  { %p6160_p12 = pnand %p6158_p11, %p6155_p10 }
  0x3b   :  { %6163 = shalt.err (!%p6160_p12)
}
  0x3c   :  { %s6164_s1 = scalar_lea.vmem %s52_s25, 65536  ;;  %p6169_p0 = scmp.lt.s32.totalorder %s52_s25, %s52_s25 }
  0x3d   :  { %p6165_p13 = scmp.ne.s32.totalorder %s52_s25, %s6164_s1  ;;  %p6170_p1 = scmp.lt.s32.totalorder %s6164_s1, %s6164_s1 }
  0x3f   :  { %p6171_p2 = por %p6170_p1, %p6169_p0 }
  0x41   :  { %p6172_p3 = pnand %p6171_p2, %p6165_p13 }
  0x43   :  { %6175 = shalt.err (!%p6172_p3)
}
  0x44   :  { %57 = dma.hbm_to_vmem [thread:$0]  %s6565_s4, 65536, %s52_s25, [#allocation7], %s6231_s5, %s6231_s5, %s6232_s12  }
  0x45   :  { %s6176_s18 = scalar_lea.hbm %s6568_s7, 8192 }
  0x46   :  { %p6177_p4 = scmp.ne.s32.totalorder %s6568_s7, %s6176_s18  ;;  %p6180_p5 = scmp.lt.u32.totalorder %s6176_s18, %s6568_s7 }
  0x48   :  { %p6182_p6 = pnand %p6180_p5, %p6177_p4 }
  0x4a   :  { %6185 = shalt.err (!%p6182_p6)
}
  0x4b   :  { %s6186_s23 = scalar_lea.vmem %s76_s27, 8192  ;;  %p6191_p8 = scmp.lt.s32.totalorder %s76_s27, %s76_s27 }
  0x4c   :  { %p6187_p7 = scmp.ne.s32.totalorder %s76_s27, %s6186_s23  ;;  %p6192_p9 = scmp.lt.s32.totalorder %s6186_s23, %s6186_s23 }
  0x4e   :  { %p6193_p10 = por %p6192_p9, %p6191_p8 }
  0x50   :  { %p6194_p11 = pnand %p6193_p10, %p6187_p7 }
  0x52   :  { %6197 = shalt.err (!%p6194_p11)
}
  0x53   :  { %s6235_s4 = smov 64   ;;  %s6236_s5 = smov 4  }
  0x54   :  { %81 = dma.hbm_to_vmem [thread:$0]  %s6568_s7, 8192, %s76_s27, [#allocation10], %s6235_s4, %s6235_s4, %s6236_s5  }
  0x55   :  { %s6237_s25 = smov [#allocation12]   ;;  %s6198_s30 = scalar_lea.hbm %s6569_s8, 16 }
  0x56   :  { %s88_s26 = sshll.u32 %s6237_s25, 4  ;;  %p6199_p12 = scmp.ne.s32.totalorder %s6569_s8, %s6198_s30  ;;  %s89_s26 = int_to_ptr.vmem [resolvable:$true] %s88_s26 }
  0x57   :  { %p6202_p13 = scmp.lt.u32.totalorder %s6198_s30, %s6569_s8 }
  0x59   :  { %p6204_p0 = pnand %p6202_p13, %p6199_p12 }
  0x5b   :  { %6207 = shalt.err (!%p6204_p0)
}
  0x5c   :  { %s6208_s1 = scalar_lea.vmem %s89_s26, 16  ;;  %s6212_s7 = scalar_lea.vmem %s89_s26, 32 }
  0x5d   :  { %p6209_p1 = scmp.ne.s32.totalorder %s89_s26, %s6208_s1  ;;  %p6213_p2 = scmp.lt.s32.totalorder %s89_s26, %s89_s26 }
  0x5e   :  { %p6214_p3 = scmp.lt.s32.totalorder %s6212_s7, %s6208_s1 }
  0x60   :  { %p6215_p4 = por %p6214_p3, %p6213_p2 }
  0x62   :  { %p6216_p5 = pnand %p6215_p4, %p6209_p1 }
  0x64   :  { %6219 = shalt.err (!%p6216_p5)
}
  0x65   :  { %91 = dma.hbm_to_vmem [thread:$0]  %s6569_s8, 16, %s89_s26, [#allocation13]  }
  0x66   :  { %6220 = dma.done.wait [#allocation5], 8192  }
  0x67   :  { %6221 = vsyncadd [#allocation5], 4294959104 }
  0x68   :  { %6222 = dma.done.wait [#allocation7], 65664  }
  0x69   :  { %6223 = vsyncadd [#allocation7], 4294901632 }
  0x6a   :  { %6224 = dma.done.wait [#allocation10], 8320  }
  0x6b   :  { %6225 = vsyncadd [#allocation10], 4294958976 }
  0x6c   :  { %6226 = dma.done.wait [#allocation13], 16  }
  0x6d   :  { %6227 = vsyncadd [#allocation13], 4294967280  ;;  %v6238_v0 = vmov 0   ;;  %v114_v1 = vld [vmem:[#allocation4] sm:$0xff]  ;;  %v115_v14 = vld [vmem:[#allocation4 + $0x8] sm:$0xff] }
  0x6e   :  { %572 = vmatprep.mubr.bf16.mxu0 %v6238_v0  ;;  %613 = vmatprep.mubr.bf16.mxu1 %v6238_v0  ;;  %v118_v2 = vld [vmem:[#allocation4 + $0x20] sm:$0xff]  ;;  %v119_v15 = vld [vmem:[#allocation4 + $0x28] sm:$0xff]  ;;  %v116_v58 = vld [vmem:[#allocation4 + $0x10] sm:$0xff] }
  0x6f   :  { %v122_v3 = vld [vmem:[#allocation4 + $0x40] sm:$0xff]  ;;  %v5229_v4 = vcombine.high %v114_v1, %v118_v2  ;;  %v5228_v5 = vcombine.low %v114_v1, %v118_v2  ;;  %v123_v16 = vld [vmem:[#allocation4 + $0x48] sm:$0xff]  ;;  %v5231_v18 = vcombine.high %v115_v14, %v119_v15  ;;  %v5230_v19 = vcombine.low %v115_v14, %v119_v15  ;;  %v120_v59 = vld [vmem:[#allocation4 + $0x30] sm:$0xff] }
  0x70   :  { %v126_v6 = vld [vmem:[#allocation4 + $0x60] sm:$0xff]  ;;  %v127_v17 = vld [vmem:[#allocation4 + $0x68] sm:$0xff]  ;;  %v5233_v1 = vcombine.high %v116_v58, %v120_v59 }
  0x71   :  { %v5237_v7 = vcombine.high %v122_v3, %v126_v6  ;;  %v130_v8 = vld [vmem:[#allocation4 + $0x80] sm:$0xff]  ;;  %540 = vmatprep.subr.bf16.mxu0 %v5229_v4  ;;  %v5236_v10 = vcombine.low %v122_v3, %v126_v6  ;;  %v5239_v20 = vcombine.high %v123_v16, %v127_v17  ;;  %v131_v22 = vld [vmem:[#allocation4 + $0x88] sm:$0xff]  ;;  %581 = vmatprep.subr.bf16.mxu1 %v5231_v18  ;;  %v124_v3 = vld [vmem:[#allocation4 + $0x50] sm:$0xff] }
  0x72   :  { %v134_v9 = vld [vmem:[#allocation4 + $0xa0] sm:$0xff]  ;;  %541 = vmatpush1.bf16.msra.mxu0 %v5228_v5  ;;  %v135_v23 = vld [vmem:[#allocation4 + $0xa8] sm:$0xff]  ;;  %582 = vmatpush1.bf16.msra.mxu1 %v5230_v19  ;;  %v5238_v27 = vcombine.low %v123_v16, %v127_v17  ;;  %v128_v4 = vld [vmem:[#allocation4 + $0x70] sm:$0xff] }
  0x73   :  { %542 = vmatprep.subr.bf16.mxu0 %v5237_v7  ;;  %v5245_v11 = vcombine.high %v130_v8, %v134_v9  ;;  %v138_v12 = vld [vmem:[#allocation4 + $0xc0] sm:$0xff]  ;;  %v5244_v21 = vcombine.low %v130_v8, %v134_v9  ;;  %583 = vmatprep.subr.bf16.mxu1 %v5239_v20  ;;  %v5247_v28 = vcombine.high %v131_v22, %v135_v23  ;;  %v139_v30 = vld [vmem:[#allocation4 + $0xc8] sm:$0xff]  ;;  %v117_v8 = vld [vmem:[#allocation4 + $0x18] sm:$0xff] }
  0x74   :  { %v142_v13 = vld [vmem:[#allocation4 + $0xe0] sm:$0xff]  ;;  %v143_v31 = vld [vmem:[#allocation4 + $0xe8] sm:$0xff]  ;;  %v5246_v35 = vcombine.low %v131_v22, %v135_v23  ;;  %v5232_v7 = vcombine.low %v116_v58, %v120_v59  ;;  %v121_v9 = vld [vmem:[#allocation4 + $0x38] sm:$0xff]  ;;  %v5240_v15 = vcombine.low %v124_v3, %v128_v4 }
  0x75   :  { %v5253_v24 = vcombine.high %v138_v12, %v142_v13  ;;  %v146_v25 = vld [vmem:[#allocation4 + $0x100] sm:$0xff]  ;;  %v5252_v29 = vcombine.low %v138_v12, %v142_v13  ;;  %v5255_v36 = vcombine.high %v139_v30, %v143_v31  ;;  %v147_v38 = vld [vmem:[#allocation4 + $0x108] sm:$0xff]  ;;  %v5254_v43 = vcombine.low %v139_v30, %v143_v31  ;;  %v132_v12 = vld [vmem:[#allocation4 + $0x90] sm:$0xff] }
  0x76   :  { %543 = vmatpush1.bf16.msra.mxu0 %v5236_v10  ;;  %v150_v26 = vld [vmem:[#allocation4 + $0x120] sm:$0xff]  ;;  %584 = vmatpush1.bf16.msra.mxu1 %v5238_v27  ;;  %v151_v39 = vld [vmem:[#allocation4 + $0x128] sm:$0xff]  ;;  %v5241_v10 = vcombine.high %v124_v3, %v128_v4  ;;  %v136_v13 = vld [vmem:[#allocation4 + $0xb0] sm:$0xff]  ;;  %v5235_v14 = vcombine.high %v117_v8, %v121_v9 }
  0x77   :  { %544 = vmatprep.subr.bf16.mxu0 %v5245_v11  ;;  %v5261_v32 = vcombine.high %v146_v25, %v150_v26  ;;  %v154_v33 = vld [vmem:[#allocation4 + $0x140] sm:$0xff]  ;;  %585 = vmatprep.subr.bf16.mxu1 %v5247_v28  ;;  %v5260_v37 = vcombine.low %v146_v25, %v150_v26  ;;  %v5263_v44 = vcombine.high %v147_v38, %v151_v39  ;;  %v155_v46 = vld [vmem:[#allocation4 + $0x148] sm:$0xff]  ;;  %v125_v16 = vld [vmem:[#allocation4 + $0x58] sm:$0xff] }
  0x78   :  { %v158_v34 = vld [vmem:[#allocation4 + $0x160] sm:$0xff]  ;;  %v159_v47 = vld [vmem:[#allocation4 + $0x168] sm:$0xff]  ;;  %v5262_v51 = vcombine.low %v147_v38, %v151_v39  ;;  %v129_v17 = vld [vmem:[#allocation4 + $0x78] sm:$0xff]  ;;  %v5249_v18 = vcombine.high %v132_v12, %v136_v13  ;;  %v5248_v23 = vcombine.low %v132_v12, %v136_v13 }
  0x79   :  { %v5269_v40 = vcombine.high %v154_v33, %v158_v34  ;;  %v162_v41 = vld [vmem:[#allocation4 + $0x180] sm:$0xff]  ;;  %v5268_v45 = vcombine.low %v154_v33, %v158_v34  ;;  %v5271_v52 = vcombine.high %v155_v46, %v159_v47  ;;  %v163_v54 = vld [vmem:[#allocation4 + $0x188] sm:$0xff]  ;;  %v5270_v57 = vcombine.low %v155_v46, %v159_v47  ;;  %v140_v19 = vld [vmem:[#allocation4 + $0xd0] sm:$0xff] }
  0x7a   :  { %545 = vmatpush1.bf16.msra.mxu0 %v5244_v21  ;;  %v166_v42 = vld [vmem:[#allocation4 + $0x1a0] sm:$0xff]  ;;  %586 = vmatpush1.bf16.msra.mxu1 %v5246_v35  ;;  %v167_v55 = vld [vmem:[#allocation4 + $0x1a8] sm:$0xff]  ;;  %v144_v20 = vld [vmem:[#allocation4 + $0xf0] sm:$0xff]  ;;  %v5234_v21 = vcombine.low %v117_v8, %v121_v9  ;;  %v5243_v22 = vcombine.high %v125_v16, %v129_v17 }
  0x7b   :  { %546 = vmatprep.subr.bf16.mxu0 %v5253_v24  ;;  %587 = vmatprep.subr.bf16.mxu1 %v5255_v36  ;;  %v5277_v48 = vcombine.high %v162_v41, %v166_v42  ;;  %v170_v49 = vld [vmem:[#allocation4 + $0x1c0] sm:$0xff]  ;;  %v5276_v53 = vcombine.low %v162_v41, %v166_v42  ;;  %v5279_v60 = vcombine.high %v163_v54, %v167_v55  ;;  %v171_v62 = vld [vmem:[#allocation4 + $0x1c8] sm:$0xff]  ;;  %v148_v24 = vld [vmem:[#allocation4 + $0x110] sm:$0xff] }
  0x7c   :  { %v174_v50 = vld [vmem:[#allocation4 + $0x1e0] sm:$0xff]  ;;  %v175_v63 = vld [vmem:[#allocation4 + $0x1e8] sm:$0xff]  ;;  %v5278_v2 = vcombine.low %v163_v54, %v167_v55  ;;  %v152_v25 = vld [vmem:[#allocation4 + $0x130] sm:$0xff]  ;;  %v5257_v28 = vcombine.high %v140_v19, %v144_v20  ;;  %v5256_v33 = vcombine.low %v140_v19, %v144_v20 }
  0x7d   :  { %v5285_v56 = vcombine.high %v170_v49, %v174_v50  ;;  %v5284_v61 = vcombine.low %v170_v49, %v174_v50  ;;  %v5287_v5 = vcombine.high %v171_v62, %v175_v63  ;;  %v6366_v6 = vld [vmem:[%s6561_s0] sm:$0xf]  ;;  %v5286_v11 = vcombine.low %v171_v62, %v175_v63  ;;  %v133_v26 = vld [vmem:[#allocation4 + $0x98] sm:$0xff]  ;;  %v156_v34 = vld [vmem:[#allocation4 + $0x150] sm:$0xff] }
  0x7e   :  { %547 = vmatpush1.bf16.msra.mxu0 %v5252_v29  ;;  %588 = vmatpush1.bf16.msra.mxu1 %v5254_v43  ;;  %v137_v27 = vld [vmem:[#allocation4 + $0xb8] sm:$0xff]  ;;  %v5242_v29 = vcombine.low %v125_v16, %v129_v17  ;;  %v160_v35 = vld [vmem:[#allocation4 + $0x170] sm:$0xff]  ;;  %v5265_v36 = vcombine.high %v148_v24, %v152_v25  ;;  %v5264_v41 = vcombine.low %v148_v24, %v152_v25  ;;  %v741_v58 = vld [vmem:[#allocation8 + $0x20] sm:$0xff] }
  0x7f   :  { %548 = vmatprep.subr.bf16.mxu0 %v5261_v32  ;;  %589 = vmatprep.subr.bf16.mxu1 %v5263_v44  ;;  %v141_v30 = vld [vmem:[#allocation4 + $0xd8] sm:$0xff]  ;;  %v5251_v32 = vcombine.high %v133_v26, %v137_v27  ;;  %v164_v42 = vld [vmem:[#allocation4 + $0x190] sm:$0xff]  ;;  %v749_v3 = vld [vmem:[#allocation8 + $0x60] sm:$0xff] }
  0x80   :  { %v145_v31 = vld [vmem:[#allocation4 + $0xf8] sm:$0xff]  ;;  %v168_v43 = vld [vmem:[#allocation4 + $0x1b0] sm:$0xff]  ;;  %v757_v12 = vld [vmem:[#allocation8 + $0xa0] sm:$0xff] }
  0x81   :  { %v149_v38 = vld [vmem:[#allocation4 + $0x118] sm:$0xff]  ;;  %v5258_v44 = vcombine.low %v141_v30, %v145_v31  ;;  %v172_v49 = vld [vmem:[#allocation4 + $0x1d0] sm:$0xff]  ;;  %v761_v19 = vld [vmem:[#allocation8 + $0xc0] sm:$0xff] }
  0x82   :  { %549 = vmatpush1.bf16.msra.mxu0 %v5260_v37  ;;  %590 = vmatpush1.bf16.msra.mxu1 %v5262_v51  ;;  %v5250_v37 = vcombine.low %v133_v26, %v137_v27  ;;  %v153_v39 = vld [vmem:[#allocation4 + $0x138] sm:$0xff]  ;;  %v176_v50 = vld [vmem:[#allocation4 + $0x1f0] sm:$0xff]  ;;  %v5281_v51 = vcombine.high %v164_v42, %v168_v43  ;;  %v765_v20 = vld [vmem:[#allocation8 + $0xe0] sm:$0xff] }
  0x83   :  { %550 = vmatprep.subr.bf16.mxu0 %v5269_v40  ;;  %591 = vmatprep.subr.bf16.mxu1 %v5271_v52  ;;  %v5259_v40 = vcombine.high %v141_v30, %v145_v31  ;;  %v161_v46 = vld [vmem:[#allocation4 + $0x178] sm:$0xff]  ;;  %v5267_v47 = vcombine.high %v149_v38, %v153_v39  ;;  %v5266_v52 = vcombine.low %v149_v38, %v153_v39  ;;  %v742_v8 = vld [vmem:[#allocation8 + $0x28] sm:$0xff]  ;;  %v769_v27 = vld [vmem:[#allocation8 + $0x100] sm:$0xff] }
  0x84   :  { %v169_v54 = vld [vmem:[#allocation4 + $0x1b8] sm:$0xff]  ;;  %v5289_v59 = vcombine.high %v172_v49, %v176_v50  ;;  %v750_v16 = vld [vmem:[#allocation8 + $0x68] sm:$0xff] }
  0x85   :  { %v177_v62 = vld [vmem:[#allocation4 + $0x1f8] sm:$0xff]  ;;  %v758_v24 = vld [vmem:[#allocation8 + $0xa8] sm:$0xff] }
  0x86   :  { %551 = vmatpush1.bf16.msra.mxu0 %v5268_v45  ;;  %592 = vmatpush1.bf16.msra.mxu1 %v5270_v57  ;;  %v157_v45 = vld [vmem:[#allocation4 + $0x158] sm:$0xff]  ;;  %v737_v57 = vld [vmem:[#allocation8] sm:$0xff]  ;;  %v762_v31 = vld [vmem:[#allocation8 + $0xc8] sm:$0xff] }
  0x87   :  { %552 = vmatprep.subr.bf16.mxu0 %v5277_v48  ;;  %593 = vmatprep.subr.bf16.mxu1 %v5279_v60  ;;  %v5272_v48 = vcombine.low %v156_v34, %v160_v35  ;;  %v5275_v55 = vcombine.high %v157_v45, %v161_v46  ;;  %v5274_v60 = vcombine.low %v157_v45, %v161_v46  ;;  %v770_v39 = vld [vmem:[#allocation8 + $0x108] sm:$0xff] }
  0x88   :  { %v5293_v4 = vcombine.high %v737_v57, %v741_v58 }
  0x8a   :  { %553 = vmatpush1.bf16.msra.mxu0 %v5276_v53  ;;  %594 = vmatpush1.bf16.msra.mxu1 %v5278_v2  ;;  %v165_v53 = vld [vmem:[#allocation4 + $0x198] sm:$0xff]  ;;  %v745_v2 = vld [vmem:[#allocation8 + $0x40] sm:$0xff] }
  0x8b   :  { %554 = vmatprep.subr.bf16.mxu0 %v5285_v56  ;;  %595 = vmatprep.subr.bf16.mxu1 %v5287_v5  ;;  %v5280_v56 = vcombine.low %v164_v42, %v168_v43  ;;  %v5283_v63 = vcombine.high %v165_v53, %v169_v54  ;;  %v5282_v5 = vcombine.low %v165_v53, %v169_v54  ;;  %v785_v42 = vld [vmem:[#allocation8 + $0x180] sm:$0xff] }
  0x8c   :  { %v5301_v13 = vcombine.high %v745_v2, %v749_v3  ;;  %v789_v43 = vld [vmem:[#allocation8 + $0x1a0] sm:$0xff] }
  0x8d   :  { %v5340_v54 = vcombine.low %v785_v42, %v789_v43 }
  0x8e   :  { %555 = vmatpush1.bf16.msra.mxu0 %v5284_v61  ;;  %596 = vmatpush1.bf16.msra.mxu1 %v5286_v11  ;;  %v173_v61 = vld [vmem:[#allocation4 + $0x1d8] sm:$0xff]  ;;  %v753_v11 = vld [vmem:[#allocation8 + $0x80] sm:$0xff] }
  0x8f   :  { %622 = vmatprep.subr.bf16.mxu0 %v5233_v1  ;;  %663 = vmatprep.subr.bf16.mxu1 %v5235_v14  ;;  %v5288_v1 = vcombine.low %v172_v49, %v176_v50  ;;  %v5291_v9 = vcombine.high %v173_v61, %v177_v62  ;;  %v5290_v14 = vcombine.low %v173_v61, %v177_v62 }
  0x90   :  { %v5308_v26 = vcombine.low %v753_v11, %v757_v12  ;;  %v5341_v49 = vcombine.high %v785_v42, %v789_v43 }
  0x91   :  { %573 = vmatmul.mubr.bf16.vlgmr.msra.gmra.mrb[0].mxu0 %v6366_v6  ;;  %614 = vmatmul.mubr.bf16.vlgmr.msra.gmra.mrb[0].mxu1 %v6366_v6 }
  0x92   :  { %623 = vmatpush1.bf16.msra.mxu0 %v5232_v7  ;;  %654 = vmatprep.mubr.bf16.mxu0 %v6238_v0  ;;  %v738_v7 = vld [vmem:[#allocation8 + $0x8] sm:$0xff] }
  0x93   :  { %624 = vmatprep.subr.bf16.mxu0 %v5241_v10  ;;  %664 = vmatpush1.bf16.msra.mxu1 %v5234_v21  ;;  %v5292_v10 = vcombine.low %v737_v57, %v741_v58  ;;  %v5295_v17 = vcombine.high %v738_v7, %v742_v8  ;;  %v5309_v21 = vcombine.high %v753_v11, %v757_v12 }
  0x94   :  { %695 = vmatprep.mubr.bf16.mxu1 %v6238_v0  ;;  %665 = vmatprep.subr.bf16.mxu1 %v5243_v22  ;;  %v5273_v0 = vcombine.high %v156_v34, %v160_v35  ;;  %v5294_v22 = vcombine.low %v738_v7, %v742_v8  ;;  %v5316_v34 = vcombine.low %v761_v19, %v765_v20  ;;  %v777_v35 = vld [vmem:[#allocation8 + $0x140] sm:$0xff] }
  0x96   :  { %625 = vmatpush1.bf16.msra.mxu0 %v5240_v15  ;;  %v746_v15 = vld [vmem:[#allocation8 + $0x48] sm:$0xff] }
  0x97   :  { %626 = vmatprep.subr.bf16.mxu0 %v5249_v18  ;;  %666 = vmatpush1.bf16.msra.mxu1 %v5242_v29  ;;  %v5300_v18 = vcombine.low %v745_v2, %v749_v3  ;;  %v5303_v25 = vcombine.high %v746_v15, %v750_v16  ;;  %v5317_v29 = vcombine.high %v761_v19, %v765_v20 }
  0x98   :  { %667 = vmatprep.subr.bf16.mxu1 %v5251_v32  ;;  %v5302_v30 = vcombine.low %v746_v15, %v750_v16  ;;  %v766_v32 = vld [vmem:[#allocation8 + $0xe8] sm:$0xff] }
  0x9a   :  { %627 = vmatpush1.bf16.msra.mxu0 %v5248_v23  ;;  %v754_v23 = vld [vmem:[#allocation8 + $0x88] sm:$0xff] }
  0x9b   :  { %628 = vmatprep.subr.bf16.mxu0 %v5257_v28  ;;  %668 = vmatpush1.bf16.msra.mxu1 %v5250_v37  ;;  %v773_v28 = vld [vmem:[#allocation8 + $0x120] sm:$0xff]  ;;  %v5310_v38 = vcombine.low %v754_v23, %v758_v24 }
  0x9c   :  { %669 = vmatprep.subr.bf16.mxu1 %v5259_v40  ;;  %v5325_v37 = vcombine.high %v769_v27, %v773_v28  ;;  %v774_v40 = vld [vmem:[#allocation8 + $0x128] sm:$0xff] }
  0x9d   :  { %v5327_v45 = vcombine.high %v770_v39, %v774_v40  ;;  %v5326_v50 = vcombine.low %v770_v39, %v774_v40 }
  0x9e   :  { %629 = vmatpush1.bf16.msra.mxu0 %v5256_v33  ;;  %v5311_v33 = vcombine.high %v754_v23, %v758_v24 }
  0x9f   :  { %630 = vmatprep.subr.bf16.mxu0 %v5265_v36  ;;  %670 = vmatpush1.bf16.msra.mxu1 %v5258_v44  ;;  %v781_v36 = vld [vmem:[#allocation8 + $0x160] sm:$0xff]  ;;  %v5318_v44 = vcombine.low %v762_v31, %v766_v32 }
  0xa0   :  { %671 = vmatprep.subr.bf16.mxu1 %v5267_v47  ;;  %v5332_v46 = vcombine.low %v777_v35, %v781_v36  ;;  %v778_v47 = vld [vmem:[#allocation8 + $0x148] sm:$0xff] }
  0xa2   :  { %631 = vmatpush1.bf16.msra.mxu0 %v5264_v41  ;;  %v5324_v41 = vcombine.low %v769_v27, %v773_v28 }
  0xa3   :  { %632 = vmatprep.subr.bf16.mxu0 %v5273_v0  ;;  %672 = vmatpush1.bf16.msra.mxu1 %v5266_v52  ;;  %v5333_v0 = vcombine.high %v777_v35, %v781_v36  ;;  %v797_v52 = vld [vmem:[#allocation8 + $0x1e0] sm:$0xff] }
  0xa4   :  { %673 = vmatprep.subr.bf16.mxu1 %v5275_v55  ;;  %v786_v55 = vld [vmem:[#allocation8 + $0x188] sm:$0xff] }
  0xa6   :  { %633 = vmatpush1.bf16.msra.mxu0 %v5272_v48  ;;  %v782_v48 = vld [vmem:[#allocation8 + $0x168] sm:$0xff] }
  0xa7   :  { %634 = vmatprep.subr.bf16.mxu0 %v5281_v51  ;;  %674 = vmatpush1.bf16.msra.mxu1 %v5274_v60  ;;  %v793_v51 = vld [vmem:[#allocation8 + $0x1c0] sm:$0xff]  ;;  %v5335_v53 = vcombine.high %v778_v47, %v782_v48  ;;  %v5334_v58 = vcombine.low %v778_v47, %v782_v48 }
  0xa8   :  { %675 = vmatprep.subr.bf16.mxu1 %v5283_v63  ;;  %v5349_v57 = vcombine.high %v793_v51, %v797_v52  ;;  %v805_v60 = vld [vmem:[#allocation8 + $0x220] sm:$0xff]  ;;  %v5348_v62 = vcombine.low %v793_v51, %v797_v52  ;;  %v794_v63 = vld [vmem:[#allocation8 + $0x1c8] sm:$0xff] }
  0xa9   :  { %v849_v47 = vld [vmem:[#allocation8 + $0x380] sm:$0xff]  ;;  %v850_v52 = vld [vmem:[#allocation8 + $0x388] sm:$0xff] }
  0xaa   :  { %635 = vmatpush1.bf16.msra.mxu0 %v5280_v56  ;;  %v790_v56 = vld [vmem:[#allocation8 + $0x1a8] sm:$0xff]  ;;  %v853_v48 = vld [vmem:[#allocation8 + $0x3a0] sm:$0xff] }
  0xab   :  { %636 = vmatprep.subr.bf16.mxu0 %v5289_v59  ;;  %676 = vmatpush1.bf16.msra.mxu1 %v5282_v5  ;;  %v801_v59 = vld [vmem:[#allocation8 + $0x200] sm:$0xff]  ;;  %v5343_v61 = vcombine.high %v786_v55, %v790_v56  ;;  %v5342_v3 = vcombine.low %v786_v55, %v790_v56 }
  0xac   :  { %677 = vmatprep.subr.bf16.mxu1 %v5291_v9  ;;  %v5357_v2 = vcombine.high %v801_v59, %v805_v60  ;;  %v813_v5 = vld [vmem:[#allocation8 + $0x260] sm:$0xff]  ;;  %v5356_v8 = vcombine.low %v801_v59, %v805_v60  ;;  %v802_v9 = vld [vmem:[#allocation8 + $0x208] sm:$0xff] }
  0xad   :  { %v857_v55 = vld [vmem:[#allocation8 + $0x3c0] sm:$0xff]  ;;  %v858_v60 = vld [vmem:[#allocation8 + $0x3c8] sm:$0xff] }
  0xae   :  { %637 = vmatpush1.bf16.msra.mxu0 %v5288_v1  ;;  %v798_v1 = vld [vmem:[#allocation8 + $0x1e8] sm:$0xff]  ;;  %v861_v56 = vld [vmem:[#allocation8 + $0x3e0] sm:$0xff] }
  0xaf   :  { %3851 = vmatprep.subr.bf16.mxu0 %v5293_v4  ;;  %678 = vmatpush1.bf16.msra.mxu1 %v5290_v14  ;;  %v809_v4 = vld [vmem:[#allocation8 + $0x240] sm:$0xff]  ;;  %v5351_v7 = vcombine.high %v794_v63, %v798_v1  ;;  %v5350_v12 = vcombine.low %v794_v63, %v798_v1 }
  0xb0   :  { %4015 = vmatprep.subr.bf16.mxu1 %v5295_v17  ;;  %v5365_v11 = vcombine.high %v809_v4, %v813_v5  ;;  %v821_v14 = vld [vmem:[#allocation8 + $0x2a0] sm:$0xff]  ;;  %v5364_v16 = vcombine.low %v809_v4, %v813_v5  ;;  %v810_v17 = vld [vmem:[#allocation8 + $0x248] sm:$0xff] }
  0xb1   :  { %655 = vmatmul.mubr.bf16.vlgmr.msra.gmra.mrb[4].mxu0 %v6366_v6  ;;  %v6374_v63 = vld [vmem:[#allocation8 + $0x400] sm:$0xff]  ;;  %v6382_v4 = vld [vmem:[#allocation8 + $0x428] sm:$0xff] }
  0xb2   :  { %3852 = vmatpush1.bf16.msra.mxu0 %v5292_v10  ;;  %696 = vmatmul.mubr.bf16.vlgmr.msra.gmra.mrb[4].mxu1 %v6366_v6  ;;  %v5319_v6 = vcombine.high %v762_v31, %v766_v32  ;;  %v806_v10 = vld [vmem:[#allocation8 + $0x228] sm:$0xff]  ;;  %v6376_v1 = vld [vmem:[#allocation8 + $0x420] sm:$0xff] }
  0xb3   :  { %3853 = vmatprep.subr.bf16.mxu0 %v5301_v13  ;;  %4016 = vmatpush1.bf16.msra.mxu1 %v5294_v22  ;;  %v817_v13 = vld [vmem:[#allocation8 + $0x280] sm:$0xff]  ;;  %v5359_v15 = vcombine.high %v802_v9, %v806_v10  ;;  %v5358_v20 = vcombine.low %v802_v9, %v806_v10 }
  0xb4   :  { %4017 = vmatprep.subr.bf16.mxu1 %v5303_v25  ;;  %v5373_v19 = vcombine.high %v817_v13, %v821_v14  ;;  %v829_v22 = vld [vmem:[#allocation8 + $0x2e0] sm:$0xff]  ;;  %v5372_v24 = vcombine.low %v817_v13, %v821_v14  ;;  %v818_v25 = vld [vmem:[#allocation8 + $0x288] sm:$0xff] }
  0xb6   :  { %3854 = vmatpush1.bf16.msra.mxu0 %v5300_v18  ;;  %v814_v18 = vld [vmem:[#allocation8 + $0x268] sm:$0xff] }
  0xb7   :  { %3855 = vmatprep.subr.bf16.mxu0 %v5309_v21  ;;  %4018 = vmatpush1.bf16.msra.mxu1 %v5302_v30  ;;  %v825_v21 = vld [vmem:[#allocation8 + $0x2c0] sm:$0xff]  ;;  %v5367_v23 = vcombine.high %v810_v17, %v814_v18  ;;  %v5366_v28 = vcombine.low %v810_v17, %v814_v18 }
  0xb8   :  { %4019 = vmatprep.subr.bf16.mxu1 %v5311_v33  ;;  %v5381_v27 = vcombine.high %v825_v21, %v829_v22  ;;  %v837_v30 = vld [vmem:[#allocation8 + $0x320] sm:$0xff]  ;;  %v5380_v32 = vcombine.low %v825_v21, %v829_v22  ;;  %v826_v33 = vld [vmem:[#allocation8 + $0x2c8] sm:$0xff]  ;;  %v6406_v21 = vstv %s6564_s3 }
  0xba   :  { %3856 = vmatpush1.bf16.msra.mxu0 %v5308_v26  ;;  %v822_v26 = vld [vmem:[#allocation8 + $0x2a8] sm:$0xff] }
  0xbb   :  { %3857 = vmatprep.subr.bf16.mxu0 %v5317_v29  ;;  %4020 = vmatpush1.bf16.msra.mxu1 %v5310_v38  ;;  %v833_v29 = vld [vmem:[#allocation8 + $0x300] sm:$0xff]  ;;  %v5375_v31 = vcombine.high %v818_v25, %v822_v26  ;;  %v5374_v36 = vcombine.low %v818_v25, %v822_v26 }
  0xbc   :  { %4021 = vmatprep.subr.bf16.mxu1 %v5319_v6  ;;  %v5389_v35 = vcombine.high %v833_v29, %v837_v30  ;;  %v845_v38 = vld [vmem:[#allocation8 + $0x360] sm:$0xff]  ;;  %v5388_v40 = vcombine.low %v833_v29, %v837_v30  ;;  %v834_v6 = vld [vmem:[#allocation8 + $0x308] sm:$0xff] }
  0xbe   :  { %3858 = vmatpush1.bf16.msra.mxu0 %v5316_v34  ;;  %v830_v34 = vld [vmem:[#allocation8 + $0x2e8] sm:$0xff] }
  0xbf   :  { %3859 = vmatprep.subr.bf16.mxu0 %v5325_v37  ;;  %4022 = vmatpush1.bf16.msra.mxu1 %v5318_v44  ;;  %v841_v37 = vld [vmem:[#allocation8 + $0x340] sm:$0xff]  ;;  %v5383_v39 = vcombine.high %v826_v33, %v830_v34  ;;  %v5382_v43 = vcombine.low %v826_v33, %v830_v34  ;;  %v842_v44 = vld [vmem:[#allocation8 + $0x348] sm:$0xff] }
  0xc0   :  { %4023 = vmatprep.subr.bf16.mxu1 %v5327_v45  ;;  %v5397_v42 = vcombine.high %v841_v37, %v845_v38  ;;  %v5396_v45 = vcombine.low %v841_v37, %v845_v38  ;;  %v877_v34 = vld [vmem:[#allocation8 + $0x460] sm:$0xff] }
  0xc2   :  { %3860 = vmatpush1.bf16.msra.mxu0 %v5324_v41  ;;  %v838_v41 = vld [vmem:[#allocation8 + $0x328] sm:$0xff] }
  0xc3   :  { %3861 = vmatprep.subr.bf16.mxu0 %v5333_v0  ;;  %4024 = vmatpush1.bf16.msra.mxu1 %v5326_v50  ;;  %v5391_v0 = vcombine.high %v834_v6, %v838_v41  ;;  %v5390_v50 = vcombine.low %v834_v6, %v838_v41 }
  0xc4   :  { %4025 = vmatprep.subr.bf16.mxu1 %v5335_v53  ;;  %v5404_v53 = vcombine.low %v849_v47, %v853_v48 }
  0xc6   :  { %3862 = vmatpush1.bf16.msra.mxu0 %v5332_v46  ;;  %v846_v46 = vld [vmem:[#allocation8 + $0x368] sm:$0xff] }
  0xc7   :  { %3863 = vmatprep.subr.bf16.mxu0 %v5341_v49  ;;  %4026 = vmatpush1.bf16.msra.mxu1 %v5334_v58  ;;  %v5405_v49 = vcombine.high %v849_v47, %v853_v48  ;;  %v5399_v51 = vcombine.high %v842_v44, %v846_v46  ;;  %v5398_v58 = vcombine.low %v842_v44, %v846_v46  ;;  %v885_v46 = vld [vmem:[#allocation8 + $0x4a0] sm:$0xff]  ;;  %v882_v47 = vld [vmem:[#allocation8 + $0x488] sm:$0xff] }
  0xc8   :  { %4027 = vmatprep.subr.bf16.mxu1 %v5343_v61  ;;  %v862_v61 = vld [vmem:[#allocation8 + $0x3e8] sm:$0xff] }
  0xc9   :  { %v5415_v9 = vcombine.high %v858_v60, %v862_v61  ;;  %v5414_v10 = vcombine.low %v858_v60, %v862_v61  ;;  %v886_v48 = vld [vmem:[#allocation8 + $0x4a8] sm:$0xff] }
  0xca   :  { %3864 = vmatpush1.bf16.msra.mxu0 %v5340_v54  ;;  %v854_v54 = vld [vmem:[#allocation8 + $0x3a8] sm:$0xff] }
  0xcb   :  { %3865 = vmatprep.subr.bf16.mxu0 %v5349_v57  ;;  %4028 = vmatpush1.bf16.msra.mxu1 %v5342_v3  ;;  %v5413_v57 = vcombine.high %v857_v55, %v861_v56  ;;  %v5407_v59 = vcombine.high %v850_v52, %v854_v54  ;;  %v5421_v3 = vcombine.high %v6374_v63, %v6376_v1  ;;  %v890_v60 = vld [vmem:[#allocation8 + $0x4c8] sm:$0xff] }
  0xcc   :  { %4029 = vmatprep.subr.bf16.mxu1 %v5351_v7  ;;  %v5406_v5 = vcombine.low %v850_v52, %v854_v54  ;;  %v5420_v7 = vcombine.low %v6374_v63, %v6376_v1  ;;  %v894_v61 = vld [vmem:[#allocation8 + $0x4e8] sm:$0xff]  ;;  %v5438_v1 = vcombine.low %v882_v47, %v886_v48 }
  0xce   :  { %3866 = vmatpush1.bf16.msra.mxu0 %v5348_v62  ;;  %v5412_v62 = vcombine.low %v857_v55, %v861_v56  ;;  %v5439_v56 = vcombine.high %v882_v47, %v886_v48 }
  0xcf   :  { %3867 = vmatprep.subr.bf16.mxu0 %v5357_v2  ;;  %4030 = vmatpush1.bf16.msra.mxu1 %v5350_v12  ;;  %v6378_v2 = vld [vmem:[#allocation8 + $0x408] sm:$0xff]  ;;  %v180_v12 = vlaneseq }
  0xd0   :  { %4031 = vmatprep.subr.bf16.mxu1 %v5359_v15  ;;  %v6393_v15 = vld [vmem:[#allocation6] sm:$0xff] }
  0xd1   :  { %v6390_v13 = vshrl.u32 %v180_v12, 7 }
  0xd2   :  { %3868 = vmatpush1.bf16.msra.mxu0 %v5356_v8  ;;  %v5422_v8 = vcombine.low %v6378_v2, %v6382_v4 }
  0xd3   :  { %3869 = vmatprep.subr.bf16.mxu0 %v5365_v11  ;;  %4032 = vmatpush1.bf16.msra.mxu1 %v5358_v20  ;;  %v5423_v11 = vcombine.high %v6378_v2, %v6382_v4  ;;  %v182_v14 = vsub.s32 0, %v6390_v13  ;;  %v194_v22 = vsub.s32 3, %v6390_v13  ;;  %v897_v4 = vld [vmem:[#allocation8 + $0x500] sm:$0xff] }
  0xd4   :  { %4033 = vmatprep.subr.bf16.mxu1 %v5367_v23 }
  0xd5   :  { %v183_v17 = vrot.slane %v6393_v15, %v182_v14 }
  0xd6   :  { %3870 = vmatpush1.bf16.msra.mxu0 %v5364_v16  ;;  %v186_v16 = vsub.s32 1, %v6390_v13 }
  0xd7   :  { %3871 = vmatprep.subr.bf16.mxu0 %v5373_v19  ;;  %4034 = vmatpush1.bf16.msra.mxu1 %v5366_v28  ;;  %v190_v19 = vsub.s32 2, %v6390_v13 }
  0xd8   :  { %4035 = vmatprep.subr.bf16.mxu1 %v5375_v31  ;;  %v187_v18 = vrot.slane %v6393_v15, %v186_v16  ;;  %v873_v31 = vld [vmem:[#allocation8 + $0x440] sm:$0xff] }
  0xd9   :  { %v191_v29 = vrot.slane %v6393_v15, %v190_v19  ;;  %v5428_v52 = vcombine.low %v873_v31, %v877_v34 }
  0xda   :  { %3872 = vmatpush1.bf16.msra.mxu0 %v5372_v24 }
  0xdb   :  { %3873 = vmatprep.subr.bf16.mxu0 %v5381_v27  ;;  %4036 = vmatpush1.bf16.msra.mxu1 %v5374_v36  ;;  %v878_v36 = vld [vmem:[#allocation8 + $0x468] sm:$0xff] }
  0xdc   :  { %4037 = vmatprep.subr.bf16.mxu1 %v5383_v39 }
  0xde   :  { %3874 = vmatpush1.bf16.msra.mxu0 %v5380_v32  ;;  %v195_v32 = vrot.slane %v6393_v15, %v194_v22 }
  0xdf   :  { %3875 = vmatprep.subr.bf16.mxu0 %v5389_v35  ;;  %4038 = vmatpush1.bf16.msra.mxu1 %v5382_v43  ;;  %v874_v35 = vld [vmem:[#allocation8 + $0x448] sm:$0xff] }
  0xe0   :  { %4039 = vmatprep.subr.bf16.mxu1 %v5391_v0  ;;  %v5431_v43 = vcombine.high %v874_v35, %v878_v36  ;;  %v881_v0 = vld [vmem:[#allocation8 + $0x480] sm:$0xff] }
  0xe1   :  { %v5437_v55 = vcombine.high %v881_v0, %v885_v46  ;;  %v5436_v63 = vcombine.low %v881_v0, %v885_v46  ;;  %v206_v46 = vsub.s32 6, %v6390_v13 }
  0xe2   :  { %3876 = vmatpush1.bf16.msra.mxu0 %v5388_v40 }
  0xe3   :  { %3877 = vmatprep.subr.bf16.mxu0 %v5397_v42  ;;  %4040 = vmatpush1.bf16.msra.mxu1 %v5390_v50  ;;  %v5429_v42 = vcombine.high %v873_v31, %v877_v34  ;;  %v918_v31 = vld [vmem:[#allocation8 + $0x5a8] sm:$0xff] }
  0xe4   :  { %4041 = vmatprep.subr.bf16.mxu1 %v5399_v51 }
  0xe6   :  { %3878 = vmatpush1.bf16.msra.mxu0 %v5396_v45 }
  0xe7   :  { %3879 = vmatprep.subr.bf16.mxu0 %v5405_v49  ;;  %4042 = vmatpush1.bf16.msra.mxu1 %v5398_v58 }
  0xe8   :  { %4043 = vmatprep.subr.bf16.mxu1 %v5407_v59  ;;  %v893_v59 = vld [vmem:[#allocation8 + $0x4e0] sm:$0xff] }
  0xea   :  { %3880 = vmatpush1.bf16.msra.mxu0 %v5404_v53  ;;  %v5430_v53 = vcombine.low %v874_v35, %v878_v36 }
  0xeb   :  { %3881 = vmatprep.subr.bf16.mxu0 %v5413_v57  ;;  %4044 = vmatpush1.bf16.msra.mxu1 %v5406_v5  ;;  %v889_v57 = vld [vmem:[#allocation8 + $0x4c0] sm:$0xff] }
  0xec   :  { %4045 = vmatprep.subr.bf16.mxu1 %v5415_v9  ;;  %v5445_v2 = vcombine.high %v889_v57, %v893_v59  ;;  %v901_v5 = vld [vmem:[#allocation8 + $0x520] sm:$0xff]  ;;  %v5444_v9 = vcombine.low %v889_v57, %v893_v59 }
  0xee   :  { %3882 = vmatpush1.bf16.msra.mxu0 %v5412_v62 }
  0xef   :  { %3892 = vmatprep.subr.bf16.mxu0 %v5421_v3  ;;  %4046 = vmatpush1.bf16.msra.mxu1 %v5414_v10  ;;  %v5447_v3 = vcombine.high %v890_v60, %v894_v61  ;;  %v5446_v10 = vcombine.low %v890_v60, %v894_v61 }
  0xf0   :  { %4056 = vmatprep.subr.bf16.mxu1 %v5423_v11  ;;  %v5453_v11 = vcombine.high %v897_v4, %v901_v5 }
 0x164   :  { %v574_v20 = vpop.f32.mrb[0].mxu0  ;;  %v615_v38 = vpop.f32.mrb[0].mxu1 }
 0x165   :  { %v575_v23 = vadd.f32 %v574_v20, %v183_v17  ;;  %v576_v24 = vpop.f32.mrb[1].mxu0  ;;  %v616_v40 = vadd.f32 %v615_v38, %v191_v29  ;;  %v617_v6 = vpop.f32.mrb[1].mxu1  ;;  %v905_v17 = vld [vmem:[#allocation8 + $0x540] sm:$0xff]  ;;  %v906_v20 = vld [vmem:[#allocation8 + $0x548] sm:$0xff] }
 0x166   :  { %v577_v25 = vadd.f32 %v576_v24, %v187_v18  ;;  %v578_v26 = vpop.f32.mrb[2].mxu0  ;;  %v618_v44 = vadd.f32 %v617_v6, %v195_v32  ;;  %v619_v45 = vpop.f32.mrb[2].mxu1  ;;  %v909_v18 = vld [vmem:[#allocation8 + $0x560] sm:$0xff]  ;;  %v5452_v24 = vcombine.low %v897_v4, %v901_v5  ;;  %v198_v32 = vsub.s32 4, %v6390_v13  ;;  %v922_v6 = vld [vmem:[#allocation8 + $0x5c8] sm:$0xff] }
 0x167   :  { %vm704_vm0 = vcmp.gt.f32.partialorder %v575_v23, 0.0  ;;  %v713_v27 = vmul.f32 %v6406_v21, %v575_v23  ;;  %v579_v28 = vpop.f32.mrb[3].mxu0  ;;  %vm706_vm2 = vcmp.gt.f32.partialorder %v616_v40, 0.0  ;;  %v715_v49 = vmul.f32 %v6406_v21, %v616_v40  ;;  %v620_v50 = vpop.f32.mrb[3].mxu1  ;;  %v917_v29 = vld [vmem:[#allocation8 + $0x5a0] sm:$0xff] }
 0x168   :  { %vm705_vm1 = vcmp.gt.f32.partialorder %v577_v25, 0.0  ;;  %v714_v30 = vmul.f32 %v6406_v21, %v577_v25  ;;  %vm707_vm3 = vcmp.gt.f32.partialorder %v618_v44, 0.0  ;;  %v716_v51 = vmul.f32 %v6406_v21, %v618_v44  ;;  %v913_v28 = vld [vmem:[#allocation8 + $0x580] sm:$0xff] }
 0x169   :  { %v721_v33 = vsel %vm704_vm0, %v575_v23, %v713_v27  ;;  %v6427_v54 = vsel %vm706_vm2, %v616_v40, %v715_v49  ;;  %v910_v23 = vld [vmem:[#allocation8 + $0x568] sm:$0xff]  ;;  %v5461_v26 = vcombine.high %v905_v17, %v909_v18  ;;  %v5460_v34 = vcombine.low %v905_v17, %v909_v18  ;;  %v921_v38 = vld [vmem:[#allocation8 + $0x5c0] sm:$0xff] }
 0x16a   :  { %v722_v37 = vsel %vm705_vm1, %v577_v25, %v714_v30  ;;  %v6419_v41 = vpack.c.bf16 %v721_v33, %v721_v33  ;;  %v724_v58 = vsel %vm707_vm3, %v618_v44, %v716_v51  ;;  %v5463_v27 = vcombine.high %v906_v20, %v910_v23  ;;  %v914_v30 = vld [vmem:[#allocation8 + $0x588] sm:$0xff]  ;;  %v925_v40 = vld [vmem:[#allocation8 + $0x5e0] sm:$0xff] }
 0x16b   :  { %v6417_v39 = vpack.c.bf16 %v722_v37, %v722_v37  ;;  %v6429_v62 = vpack.c.bf16 %v724_v58, %v724_v58  ;;  %v202_v33 = vsub.s32 5, %v6390_v13  ;;  %v5462_v35 = vcombine.low %v906_v20, %v910_v23  ;;  %v929_v49 = vld [vmem:[#allocation8 + $0x600] sm:$0xff] }
 0x16c   :  { %v5469_v36 = vcombine.high %v913_v28, %v917_v29  ;;  %v5471_v37 = vcombine.high %v914_v30, %v918_v31  ;;  %v5468_v44 = vcombine.low %v913_v28, %v917_v29  ;;  %v5470_v45 = vcombine.low %v914_v30, %v918_v31  ;;  %v933_v50 = vld [vmem:[#allocation8 + $0x620] sm:$0xff]  ;;  %v946_v31 = vld [vmem:[#allocation8 + $0x688] sm:$0xff] }
 0x16d   :  { %3883 = vmatprep.mubr.bf16.mxu0 %v6417_v39  ;;  %4047 = vmatprep.mubr.bf16.mxu1 %v6417_v39  ;;  %v203_v0 = vrot.slane %v6393_v15, %v202_v33  ;;  %v5477_v47 = vcombine.high %v921_v38, %v925_v40  ;;  %v5476_v58 = vcombine.low %v921_v38, %v925_v40  ;;  %v937_v5 = vld [vmem:[#allocation8 + $0x640] sm:$0xff] }
 0x16e   :  { %3884 = vmatmul.mubr.bf16.vlgmr.msra.gmra.mrb[8].mxu0 %v6419_v41  ;;  %4048 = vmatmul.mubr.bf16.vlgmr.msra.gmra.mrb[8].mxu1 %v6419_v41  ;;  %v5484_v20 = vcombine.low %v929_v49, %v933_v50  ;;  %v945_v28 = vld [vmem:[#allocation8 + $0x680] sm:$0xff] }
 0x16f   :  { %3893 = vmatpush1.bf16.msra.mxu0 %v5420_v7  ;;  %4057 = vmatpush1.bf16.msra.mxu1 %v5422_v8  ;;  %v898_v7 = vld [vmem:[#allocation8 + $0x508] sm:$0xff]  ;;  %v949_v30 = vld [vmem:[#allocation8 + $0x6a0] sm:$0xff] }
 0x170   :  { %3894 = vmatprep.subr.bf16.mxu0 %v5429_v42  ;;  %4058 = vmatprep.subr.bf16.mxu1 %v5431_v43  ;;  %v902_v8 = vld [vmem:[#allocation8 + $0x528] sm:$0xff]  ;;  %v199_v43 = vrot.slane %v6393_v15, %v198_v32 }
 0x171   :  { %3924 = vmatprep.mubr.bf16.mxu0 %v6429_v62  ;;  %4088 = vmatprep.mubr.bf16.mxu1 %v6429_v62  ;;  %v5455_v12 = vcombine.high %v898_v7, %v902_v8  ;;  %v5454_v25 = vcombine.low %v898_v7, %v902_v8  ;;  %v926_v42 = vld [vmem:[#allocation8 + $0x5e8] sm:$0xff] }
 0x172   :  { %v5479_v48 = vcombine.high %v922_v6, %v926_v42  ;;  %v5478_v59 = vcombine.low %v922_v6, %v926_v42  ;;  %v5501_v42 = vcombine.high %v945_v28, %v949_v30 }
 0x173   :  { %3895 = vmatpush1.bf16.msra.mxu0 %v5428_v52  ;;  %4059 = vmatpush1.bf16.msra.mxu1 %v5430_v53  ;;  %v210_v52 = vsub.s32 7, %v6390_v13  ;;  %v930_v53 = vld [vmem:[#allocation8 + $0x608] sm:$0xff] }
 0x174   :  { %3896 = vmatprep.subr.bf16.mxu0 %v5437_v55  ;;  %4060 = vmatprep.subr.bf16.mxu1 %v5439_v56  ;;  %v934_v55 = vld [vmem:[#allocation8 + $0x628] sm:$0xff] }
 0x175   :  { %v5487_v4 = vcombine.high %v930_v53, %v934_v55  ;;  %v211_v8 = vrot.slane %v6393_v15, %v210_v52  ;;  %v5486_v23 = vcombine.low %v930_v53, %v934_v55  ;;  %v961_v53 = vld [vmem:[#allocation8 + $0x700] sm:$0xff] }
 0x176   :  { %v965_v55 = vld [vmem:[#allocation8 + $0x720] sm:$0xff] }
 0x177   :  { %3897 = vmatpush1.bf16.msra.mxu0 %v5436_v63  ;;  %4061 = vmatpush1.bf16.msra.mxu1 %v5438_v1  ;;  %v5485_v63 = vcombine.high %v929_v49, %v933_v50  ;;  %v5500_v49 = vcombine.low %v945_v28, %v949_v30  ;;  %v986_v28 = vld [vmem:[#allocation8 + $0x7c8] sm:$0xff] }
 0x178   :  { %3898 = vmatprep.subr.bf16.mxu0 %v5445_v2  ;;  %4062 = vmatprep.subr.bf16.mxu1 %v5447_v3  ;;  %v207_v3 = vrot.slane %v6393_v15, %v206_v46 }
 0x17b   :  { %3899 = vmatpush1.bf16.msra.mxu0 %v5444_v9  ;;  %4063 = vmatpush1.bf16.msra.mxu1 %v5446_v10  ;;  %v941_v9 = vld [vmem:[#allocation8 + $0x660] sm:$0xff]  ;;  %v938_v10 = vld [vmem:[#allocation8 + $0x648] sm:$0xff] }
 0x17c   :  { %3900 = vmatprep.subr.bf16.mxu0 %v5453_v11  ;;  %4064 = vmatprep.subr.bf16.mxu1 %v5455_v12  ;;  %v942_v11 = vld [vmem:[#allocation8 + $0x668] sm:$0xff]  ;;  %v5492_v38 = vcombine.low %v937_v5, %v941_v9 }
 0x17d   :  { %v5494_v40 = vcombine.low %v938_v10, %v942_v11 }
 0x17f   :  { %3901 = vmatpush1.bf16.msra.mxu0 %v5452_v24  ;;  %4065 = vmatpush1.bf16.msra.mxu1 %v5454_v25 }
 0x180   :  { %3902 = vmatprep.subr.bf16.mxu0 %v5461_v26  ;;  %4066 = vmatprep.subr.bf16.mxu1 %v5463_v27  ;;  %v5493_v26 = vcombine.high %v937_v5, %v941_v9  ;;  %v5495_v27 = vcombine.high %v938_v10, %v942_v11  ;;  %v977_v9 = vld [vmem:[#allocation8 + $0x780] sm:$0xff]  ;;  %v978_v11 = vld [vmem:[#allocation8 + $0x788] sm:$0xff] }
 0x181   :  { %v981_v10 = vld [vmem:[#allocation8 + $0x7a0] sm:$0xff] }
 0x183   :  { %3903 = vmatpush1.bf16.msra.mxu0 %v5460_v34  ;;  %4067 = vmatpush1.bf16.msra.mxu1 %v5462_v35  ;;  %v950_v34 = vld [vmem:[#allocation8 + $0x6a8] sm:$0xff] }
 0x184   :  { %3904 = vmatprep.subr.bf16.mxu0 %v5469_v36  ;;  %4068 = vmatprep.subr.bf16.mxu1 %v5471_v37  ;;  %v656_v51 = vpop.f32.mrb[4].mxu0 }
 0x185   :  { %v657_v56 = vadd.f32 %v656_v51, %v199_v43  ;;  %v658_v57 = vpop.f32.mrb[5].mxu0  ;;  %v697_v18 = vpop.f32.mrb[4].mxu1  ;;  %v5503_v43 = vcombine.high %v946_v31, %v950_v34 }
 0x186   :  { %v659_v60 = vadd.f32 %v658_v57, %v203_v0  ;;  %v660_v61 = vpop.f32.mrb[6].mxu0  ;;  %v698_v24 = vadd.f32 %v697_v18, %v207_v3  ;;  %v699_v25 = vpop.f32.mrb[5].mxu1  ;;  %v953_v0 = vld [vmem:[#allocation8 + $0x6c0] sm:$0xff]  ;;  %v966_v57 = vld [vmem:[#allocation8 + $0x728] sm:$0xff] }
 0x187   :  { %3905 = vmatpush1.bf16.msra.mxu0 %v5468_v44  ;;  %4069 = vmatpush1.bf16.msra.mxu1 %v5470_v45  ;;  %vm708_vm4 = vcmp.gt.f32.partialorder %v657_v56, 0.0  ;;  %v717_v1 = vmul.f32 %v6406_v21, %v657_v56  ;;  %v661_v2 = vpop.f32.mrb[7].mxu0  ;;  %v700_v15 = vadd.f32 %v699_v25, %v211_v8  ;;  %v701_v29 = vpop.f32.mrb[6].mxu1  ;;  %v957_v45 = vld [vmem:[#allocation8 + $0x6e0] sm:$0xff]  ;;  %v974_v3 = vld [vmem:[#allocation8 + $0x768] sm:$0xff] }
 0x188   :  { %3906 = vmatprep.subr.bf16.mxu0 %v5477_v47  ;;  %4070 = vmatprep.subr.bf16.mxu1 %v5479_v48  ;;  %vm709_vm5 = vcmp.gt.f32.partialorder %v659_v60, 0.0  ;;  %v718_v7 = vmul.f32 %v6406_v21, %v659_v60  ;;  %vm710_vm6 = vcmp.gt.f32.partialorder %v698_v24, 0.0  ;;  %v719_v35 = vmul.f32 %v6406_v21, %v698_v24  ;;  %v702_v36 = vpop.f32.mrb[7].mxu1  ;;  %v954_v47 = vld [vmem:[#allocation8 + $0x6c8] sm:$0xff] }
 0x189   :  { %v6451_v12 = vsel %vm708_vm4, %v657_v56, %v717_v1  ;;  %vm711_vm7 = vcmp.gt.f32.partialorder %v700_v15, 0.0  ;;  %v720_v37 = vmul.f32 %v6406_v21, %v700_v15  ;;  %v958_v48 = vld [vmem:[#allocation8 + $0x6e8] sm:$0xff]  ;;  %v5502_v21 = vcombine.low %v946_v31, %v950_v34  ;;  %v973_v1 = vld [vmem:[#allocation8 + $0x760] sm:$0xff] }
 0x18a   :  { %v6453_v17 = vsel %vm709_vm5, %v659_v60, %v718_v7  ;;  %v6457_v6 = vsel %vm710_vm6, %v698_v24, %v719_v35  ;;  %v5509_v50 = vcombine.high %v953_v0, %v957_v45  ;;  %v5511_v51 = vcombine.high %v954_v47, %v958_v48  ;;  %v962_v56 = vld [vmem:[#allocation8 + $0x708] sm:$0xff]  ;;  %v993_v35 = vld [vmem:[#allocation8 + $0x800] sm:$0xff] }
 0x18b   :  { %3907 = vmatpush1.bf16.msra.mxu0 %v5476_v58  ;;  %4071 = vmatpush1.bf16.msra.mxu1 %v5478_v59  ;;  %v6459_v44 = vsel %vm711_vm7, %v700_v15, %v720_v37  ;;  %v5508_v58 = vcombine.low %v953_v0, %v957_v45  ;;  %v5510_v59 = vcombine.low %v954_v47, %v958_v48  ;;  %v970_v2 = vld [vmem:[#allocation8 + $0x748] sm:$0xff]  ;;  %v997_v36 = vld [vmem:[#allocation8 + $0x820] sm:$0xff] }
 0x18c   :  { %3908 = vmatprep.subr.bf16.mxu0 %v5485_v63  ;;  %4072 = vmatprep.subr.bf16.mxu1 %v5487_v4  ;;  %v5517_v60 = vcombine.high %v961_v53, %v965_v55  ;;  %v5519_v61 = vcombine.high %v962_v56, %v966_v57  ;;  %v969_v63 = vld [vmem:[#allocation8 + $0x740] sm:$0xff]  ;;  %v5516_v4 = vcombine.low %v961_v53, %v965_v55  ;;  %v982_v18 = vld [vmem:[#allocation8 + $0x7a8] sm:$0xff] }
 0x18d   :  { %v5518_v5 = vcombine.low %v962_v56, %v966_v57  ;;  %v5525_v7 = vcombine.high %v969_v63, %v973_v1  ;;  %v5527_v8 = vcombine.high %v970_v2, %v974_v3  ;;  %v5533_v24 = vcombine.high %v977_v9, %v981_v10  ;;  %v990_v15 = vld [vmem:[#allocation8 + $0x7e8] sm:$0xff]  ;;  %v1001_v45 = vld [vmem:[#allocation8 + $0x840] sm:$0xff] }
 0x18e   :  { %v5535_v25 = vcombine.high %v978_v11, %v982_v18  ;;  %v5532_v29 = vcombine.low %v977_v9, %v981_v10  ;;  %v5534_v30 = vcombine.low %v978_v11, %v982_v18  ;;  %v5543_v34 = vcombine.high %v986_v28, %v990_v15  ;;  %v994_v37 = vld [vmem:[#allocation8 + $0x808] sm:$0xff]  ;;  %v1005_v47 = vld [vmem:[#allocation8 + $0x860] sm:$0xff] }
 0x18f   :  { %3909 = vmatpush1.bf16.msra.mxu0 %v5484_v20  ;;  %4073 = vmatpush1.bf16.msra.mxu1 %v5486_v23  ;;  %v5524_v20 = vcombine.low %v969_v63, %v973_v1  ;;  %v5526_v23 = vcombine.low %v970_v2, %v974_v3  ;;  %v1002_v48 = vld [vmem:[#allocation8 + $0x848] sm:$0xff]  ;;  %v5557_v53 = vcombine.high %v1001_v45, %v1005_v47  ;;  %v1009_v56 = vld [vmem:[#allocation8 + $0x880] sm:$0xff] }
 0x190   :  { %3910 = vmatprep.subr.bf16.mxu0 %v5493_v26  ;;  %4074 = vmatprep.subr.bf16.mxu1 %v5495_v27  ;;  %v985_v26 = vld [vmem:[#allocation8 + $0x7c0] sm:$0xff]  ;;  %v1026_v18 = vld [vmem:[#allocation8 + $0x908] sm:$0xff] }
 0x191   :  { %v989_v27 = vld [vmem:[#allocation8 + $0x7e0] sm:$0xff] }
 0x192   :  { %v5541_v31 = vcombine.high %v985_v26, %v989_v27  ;;  %v1013_v57 = vld [vmem:[#allocation8 + $0x8a0] sm:$0xff] }
 0x193   :  { %3911 = vmatpush1.bf16.msra.mxu0 %v5492_v38  ;;  %4075 = vmatpush1.bf16.msra.mxu1 %v5494_v40  ;;  %v998_v38 = vld [vmem:[#allocation8 + $0x828] sm:$0xff]  ;;  %v5540_v40 = vcombine.low %v985_v26, %v989_v27  ;;  %v5565_v63 = vcombine.high %v1009_v56, %v1013_v57  ;;  %v1017_v2 = vld [vmem:[#allocation8 + $0x8c0] sm:$0xff] }
 0x194   :  { %3912 = vmatprep.subr.bf16.mxu0 %v5501_v42  ;;  %4076 = vmatprep.subr.bf16.mxu1 %v5503_v43  ;;  %v5542_v42 = vcombine.low %v986_v28, %v990_v15  ;;  %v5549_v43 = vcombine.high %v993_v35, %v997_v36  ;;  %v5551_v0 = vcombine.high %v994_v37, %v998_v38  ;;  %v1021_v3 = vld [vmem:[#allocation8 + $0x8e0] sm:$0xff]  ;;  %v1034_v15 = vld [vmem:[#allocation8 + $0x948] sm:$0xff] }
 0x195   :  { %v1025_v10 = vld [vmem:[#allocation8 + $0x900] sm:$0xff] }
 0x196   :  { %v1029_v11 = vld [vmem:[#allocation8 + $0x920] sm:$0xff] }
 0x197   :  { %3913 = vmatpush1.bf16.msra.mxu0 %v5500_v49  ;;  %4077 = vmatpush1.bf16.msra.mxu1 %v5502_v21  ;;  %v1006_v49 = vld [vmem:[#allocation8 + $0x868] sm:$0xff]  ;;  %v5548_v21 = vcombine.low %v993_v35, %v997_v36  ;;  %v1033_v27 = vld [vmem:[#allocation8 + $0x940] sm:$0xff] }
 0x198   :  { %3914 = vmatprep.subr.bf16.mxu0 %v5509_v50  ;;  %4078 = vmatprep.subr.bf16.mxu1 %v5511_v51  ;;  %v5550_v50 = vcombine.low %v994_v37, %v998_v38  ;;  %v6463_v51 = vpack.c.bf16 %v6427_v54, %v6427_v54  ;;  %v5559_v55 = vcombine.high %v1002_v48, %v1006_v49  ;;  %v1037_v28 = vld [vmem:[#allocation8 + $0x960] sm:$0xff]  ;;  %v1042_v38 = vld [vmem:[#allocation8 + $0x988] sm:$0xff] }
 0x199   :  { %v5556_v54 = vcombine.low %v1001_v45, %v1005_v47  ;;  %v1041_v36 = vld [vmem:[#allocation8 + $0x980] sm:$0xff] }
 0x19a   :  { %v1045_v37 = vld [vmem:[#allocation8 + $0x9a0] sm:$0xff] }
 0x19b   :  { %3915 = vmatpush1.bf16.msra.mxu0 %v5508_v58  ;;  %4079 = vmatpush1.bf16.msra.mxu1 %v5510_v59  ;;  %v1010_v58 = vld [vmem:[#allocation8 + $0x888] sm:$0xff]  ;;  %v1049_v47 = vld [vmem:[#allocation8 + $0x9c0] sm:$0xff] }
 0x19c   :  { %3916 = vmatprep.subr.bf16.mxu0 %v5517_v60  ;;  %4080 = vmatprep.subr.bf16.mxu1 %v5519_v61  ;;  %v1014_v59 = vld [vmem:[#allocation8 + $0x8a8] sm:$0xff]  ;;  %v6467_v60 = vpack.c.bf16 %v6453_v17, %v6453_v17  ;;  %v5558_v61 = vcombine.low %v1002_v48, %v1006_v49  ;;  %v5564_v17 = vcombine.low %v1009_v56, %v1013_v57  ;;  %v1053_v48 = vld [vmem:[#allocation8 + $0x9e0] sm:$0xff] }
 0x19d   :  { %v5567_v1 = vcombine.high %v1010_v58, %v1014_v59  ;;  %v1050_v49 = vld [vmem:[#allocation8 + $0x9c8] sm:$0xff]  ;;  %v1057_v57 = vld [vmem:[#allocation8 + $0xa00] sm:$0xff] }
 0x19f   :  { %3917 = vmatpush1.bf16.msra.mxu0 %v5516_v4  ;;  %4081 = vmatpush1.bf16.msra.mxu1 %v5518_v5  ;;  %v1018_v4 = vld [vmem:[#allocation8 + $0x8c8] sm:$0xff] }
 0x1a0   :  { %3918 = vmatprep.subr.bf16.mxu0 %v5525_v7  ;;  %4082 = vmatprep.subr.bf16.mxu1 %v5527_v8  ;;  %v1022_v5 = vld [vmem:[#allocation8 + $0x8e8] sm:$0xff]  ;;  %v5566_v7 = vcombine.low %v1010_v58, %v1014_v59  ;;  %v5573_v8 = vcombine.high %v1017_v2, %v1021_v3  ;;  %v1061_v58 = vld [vmem:[#allocation8 + $0xa20] sm:$0xff] }
 0x1a1   :  { %v5575_v9 = vcombine.high %v1018_v4, %v1022_v5  ;;  %v1058_v59 = vld [vmem:[#allocation8 + $0xa08] sm:$0xff] }
 0x1a3   :  { %3919 = vmatpush1.bf16.msra.mxu0 %v5524_v20  ;;  %4083 = vmatpush1.bf16.msra.mxu1 %v5526_v23  ;;  %v1030_v20 = vld [vmem:[#allocation8 + $0x928] sm:$0xff]  ;;  %v5572_v23 = vcombine.low %v1017_v2, %v1021_v3  ;;  %v1065_v3 = vld [vmem:[#allocation8 + $0xa40] sm:$0xff] }
 0x1a4   :  { %3920 = vmatprep.subr.bf16.mxu0 %v5533_v24  ;;  %4084 = vmatprep.subr.bf16.mxu1 %v5535_v25  ;;  %v5574_v24 = vcombine.low %v1018_v4, %v1022_v5  ;;  %v5581_v25 = vcombine.high %v1025_v10, %v1029_v11  ;;  %v5583_v26 = vcombine.high %v1026_v18, %v1030_v20  ;;  %v1069_v4 = vld [vmem:[#allocation8 + $0xa60] sm:$0xff]  ;;  %v1066_v5 = vld [vmem:[#allocation8 + $0xa48] sm:$0xff] }
 0x1a7   :  { %3921 = vmatpush1.bf16.msra.mxu0 %v5532_v29  ;;  %4085 = vmatpush1.bf16.msra.mxu1 %v5534_v30  ;;  %v1038_v29 = vld [vmem:[#allocation8 + $0x968] sm:$0xff]  ;;  %v5580_v30 = vcombine.low %v1025_v10, %v1029_v11  ;;  %v1073_v11 = vld [vmem:[#allocation8 + $0xa80] sm:$0xff] }
 0x1a8   :  { %3922 = vmatprep.subr.bf16.mxu0 %v5541_v31  ;;  %4086 = vmatprep.subr.bf16.mxu1 %v5543_v34  ;;  %v5582_v31 = vcombine.low %v1026_v18, %v1030_v20  ;;  %v5589_v34 = vcombine.high %v1033_v27, %v1037_v28  ;;  %v5591_v35 = vcombine.high %v1034_v15, %v1038_v29  ;;  %v1077_v18 = vld [vmem:[#allocation8 + $0xaa0] sm:$0xff]  ;;  %v1074_v20 = vld [vmem:[#allocation8 + $0xa88] sm:$0xff] }
 0x1ab   :  { %3923 = vmatpush1.bf16.msra.mxu0 %v5540_v40  ;;  %4087 = vmatpush1.bf16.msra.mxu1 %v5542_v42  ;;  %v1046_v40 = vld [vmem:[#allocation8 + $0x9a8] sm:$0xff]  ;;  %v5588_v42 = vcombine.low %v1033_v27, %v1037_v28  ;;  %v1081_v28 = vld [vmem:[#allocation8 + $0xac0] sm:$0xff] }
 0x1ac   :  { %3933 = vmatprep.subr.bf16.mxu0 %v5549_v43  ;;  %4097 = vmatprep.subr.bf16.mxu1 %v5551_v0  ;;  %v5590_v43 = vcombine.low %v1034_v15, %v1038_v29  ;;  %v5597_v0 = vcombine.high %v1041_v36, %v1045_v37  ;;  %v5599_v45 = vcombine.high %v1042_v38, %v1046_v40  ;;  %v1085_v15 = vld [vmem:[#allocation8 + $0xae0] sm:$0xff]  ;;  %v1082_v29 = vld [vmem:[#allocation8 + $0xac8] sm:$0xff] }
 0x1ae   :  { %3925 = vmatmul.mubr.bf16.vlgmr.msra.gmra.mrb[8].mxu0 %v6463_v51  ;;  %4089 = vmatmul.mubr.bf16.vlgmr.msra.gmra.mrb[8].mxu1 %v6463_v51 }
 0x1af   :  { %3934 = vmatpush1.bf16.msra.mxu0 %v5548_v21  ;;  %4098 = vmatpush1.bf16.msra.mxu1 %v5550_v50  ;;  %v1054_v21 = vld [vmem:[#allocation8 + $0x9e8] sm:$0xff]  ;;  %v5596_v50 = vcombine.low %v1041_v36, %v1045_v37  ;;  %v1089_v37 = vld [vmem:[#allocation8 + $0xb00] sm:$0xff] }
 0x1b0   :  { %3935 = vmatprep.subr.bf16.mxu0 %v5557_v53  ;;  %4099 = vmatprep.subr.bf16.mxu1 %v5559_v55  ;;  %v5598_v53 = vcombine.low %v1042_v38, %v1046_v40  ;;  %v5605_v55 = vcombine.high %v1049_v47, %v1053_v48  ;;  %v5607_v56 = vcombine.high %v1050_v49, %v1054_v21  ;;  %v1093_v38 = vld [vmem:[#allocation8 + $0xb20] sm:$0xff]  ;;  %v1090_v40 = vld [vmem:[#allocation8 + $0xb08] sm:$0xff] }
 0x1b1   :  { %3965 = vmatprep.mubr.bf16.mxu0 %v6467_v60  ;;  %4129 = vmatprep.mubr.bf16.mxu1 %v6467_v60 }
 0x1b3   :  { %3936 = vmatpush1.bf16.msra.mxu0 %v5556_v54  ;;  %4100 = vmatpush1.bf16.msra.mxu1 %v5558_v61  ;;  %v1062_v54 = vld [vmem:[#allocation8 + $0xa28] sm:$0xff]  ;;  %v5604_v61 = vcombine.low %v1049_v47, %v1053_v48  ;;  %v1097_v48 = vld [vmem:[#allocation8 + $0xb40] sm:$0xff] }
 0x1b4   :  { %3937 = vmatprep.subr.bf16.mxu0 %v5565_v63  ;;  %4101 = vmatprep.subr.bf16.mxu1 %v5567_v1  ;;  %v5606_v63 = vcombine.low %v1050_v49, %v1054_v21  ;;  %v5613_v1 = vcombine.high %v1057_v57, %v1061_v58  ;;  %v5615_v2 = vcombine.high %v1058_v59, %v1062_v54  ;;  %v1101_v49 = vld [vmem:[#allocation8 + $0xb60] sm:$0xff]  ;;  %v1098_v21 = vld [vmem:[#allocation8 + $0xb48] sm:$0xff] }
 0x1b7   :  { %3938 = vmatpush1.bf16.msra.mxu0 %v5564_v17  ;;  %4102 = vmatpush1.bf16.msra.mxu1 %v5566_v7  ;;  %v1070_v17 = vld [vmem:[#allocation8 + $0xa68] sm:$0xff]  ;;  %v5612_v7 = vcombine.low %v1057_v57, %v1061_v58  ;;  %v1105_v58 = vld [vmem:[#allocation8 + $0xb80] sm:$0xff] }
 0x1b8   :  { %3939 = vmatprep.subr.bf16.mxu0 %v5573_v8  ;;  %4103 = vmatprep.subr.bf16.mxu1 %v5575_v9  ;;  %v5614_v8 = vcombine.low %v1058_v59, %v1062_v54  ;;  %v5621_v9 = vcombine.high %v1065_v3, %v1069_v4  ;;  %v5623_v10 = vcombine.high %v1066_v5, %v1070_v17  ;;  %v1109_v59 = vld [vmem:[#allocation8 + $0xba0] sm:$0xff]  ;;  %v1106_v54 = vld [vmem:[#allocation8 + $0xb88] sm:$0xff] }
 0x1bb   :  { %3940 = vmatpush1.bf16.msra.mxu0 %v5572_v23  ;;  %4104 = vmatpush1.bf16.msra.mxu1 %v5574_v24  ;;  %v1078_v23 = vld [vmem:[#allocation8 + $0xaa8] sm:$0xff]  ;;  %v5620_v24 = vcombine.low %v1065_v3, %v1069_v4  ;;  %v1113_v4 = vld [vmem:[#allocation8 + $0xbc0] sm:$0xff] }
 0x1bc   :  { %3941 = vmatprep.subr.bf16.mxu0 %v5581_v25  ;;  %4105 = vmatprep.subr.bf16.mxu1 %v5583_v26  ;;  %v5622_v25 = vcombine.low %v1066_v5, %v1070_v17  ;;  %v5629_v26 = vcombine.high %v1073_v11, %v1077_v18  ;;  %v5631_v27 = vcombine.high %v1074_v20, %v1078_v23  ;;  %v1117_v5 = vld [vmem:[#allocation8 + $0xbe0] sm:$0xff]  ;;  %v1114_v17 = vld [vmem:[#allocation8 + $0xbc8] sm:$0xff] }
 0x1bf   :  { %3942 = vmatpush1.bf16.msra.mxu0 %v5580_v30  ;;  %4106 = vmatpush1.bf16.msra.mxu1 %v5582_v31  ;;  %v1086_v30 = vld [vmem:[#allocation8 + $0xae8] sm:$0xff]  ;;  %v5628_v31 = vcombine.low %v1073_v11, %v1077_v18  ;;  %v1121_v18 = vld [vmem:[#allocation8 + $0xc00] sm:$0xff] }
 0x1c0   :  { %3943 = vmatprep.subr.bf16.mxu0 %v5589_v34  ;;  %4107 = vmatprep.subr.bf16.mxu1 %v5591_v35  ;;  %v5630_v34 = vcombine.low %v1074_v20, %v1078_v23  ;;  %v5637_v35 = vcombine.high %v1081_v28, %v1085_v15  ;;  %v5639_v36 = vcombine.high %v1082_v29, %v1086_v30  ;;  %v1125_v20 = vld [vmem:[#allocation8 + $0xc20] sm:$0xff]  ;;  %v1122_v23 = vld [vmem:[#allocation8 + $0xc08] sm:$0xff] }
 0x1c3   :  { %3944 = vmatpush1.bf16.msra.mxu0 %v5588_v42  ;;  %4108 = vmatpush1.bf16.msra.mxu1 %v5590_v43  ;;  %v1094_v42 = vld [vmem:[#allocation8 + $0xb28] sm:$0xff]  ;;  %v5636_v43 = vcombine.low %v1081_v28, %v1085_v15  ;;  %v1129_v15 = vld [vmem:[#allocation8 + $0xc40] sm:$0xff] }
 0x1c4   :  { %3945 = vmatprep.subr.bf16.mxu0 %v5597_v0  ;;  %4109 = vmatprep.subr.bf16.mxu1 %v5599_v45  ;;  %v5638_v0 = vcombine.low %v1082_v29, %v1086_v30  ;;  %v5645_v45 = vcombine.high %v1089_v37, %v1093_v38  ;;  %v5647_v47 = vcombine.high %v1090_v40, %v1094_v42  ;;  %v1133_v29 = vld [vmem:[#allocation8 + $0xc60] sm:$0xff]  ;;  %v1130_v30 = vld [vmem:[#allocation8 + $0xc48] sm:$0xff] }
 0x1c7   :  { %3946 = vmatpush1.bf16.msra.mxu0 %v5596_v50  ;;  %4110 = vmatpush1.bf16.msra.mxu1 %v5598_v53  ;;  %v1102_v50 = vld [vmem:[#allocation8 + $0xb68] sm:$0xff]  ;;  %v5644_v53 = vcombine.low %v1089_v37, %v1093_v38  ;;  %v5685_v37 = vcombine.high %v1129_v15, %v1133_v29 }
 0x1c8   :  { %3947 = vmatprep.subr.bf16.mxu0 %v5605_v55  ;;  %4111 = vmatprep.subr.bf16.mxu1 %v5607_v56  ;;  %v5646_v55 = vcombine.low %v1090_v40, %v1094_v42  ;;  %v5653_v56 = vcombine.high %v1097_v48, %v1101_v49  ;;  %v5655_v57 = vcombine.high %v1098_v21, %v1102_v50  ;;  %v1137_v40 = vld [vmem:[#allocation8 + $0xc80] sm:$0xff] }
 0x1c9   :  { %v1141_v42 = vld [vmem:[#allocation8 + $0xca0] sm:$0xff] }
 0x1cb   :  { %3948 = vmatpush1.bf16.msra.mxu0 %v5604_v61  ;;  %4112 = vmatpush1.bf16.msra.mxu1 %v5606_v63  ;;  %v1110_v61 = vld [vmem:[#allocation8 + $0xba8] sm:$0xff]  ;;  %v5652_v63 = vcombine.low %v1097_v48, %v1101_v49  ;;  %v5693_v48 = vcombine.high %v1137_v40, %v1141_v42 }
 0x1cc   :  { %3949 = vmatprep.subr.bf16.mxu0 %v5613_v1  ;;  %4113 = vmatprep.subr.bf16.mxu1 %v5615_v2  ;;  %v5654_v1 = vcombine.low %v1098_v21, %v1102_v50  ;;  %v5661_v2 = vcombine.high %v1105_v58, %v1109_v59  ;;  %v5663_v3 = vcombine.high %v1106_v54, %v1110_v61  ;;  %v1145_v21 = vld [vmem:[#allocation8 + $0xcc0] sm:$0xff] }
 0x1cd   :  { %v1149_v50 = vld [vmem:[#allocation8 + $0xce0] sm:$0xff] }
 0x1cf   :  { %3950 = vmatpush1.bf16.msra.mxu0 %v5612_v7  ;;  %4114 = vmatpush1.bf16.msra.mxu1 %v5614_v8  ;;  %v1118_v7 = vld [vmem:[#allocation8 + $0xbe8] sm:$0xff]  ;;  %v5660_v8 = vcombine.low %v1105_v58, %v1109_v59  ;;  %v1153_v59 = vld [vmem:[#allocation8 + $0xd00] sm:$0xff] }
 0x1d0   :  { %3951 = vmatprep.subr.bf16.mxu0 %v5621_v9  ;;  %4115 = vmatprep.subr.bf16.mxu1 %v5623_v10  ;;  %v5662_v9 = vcombine.low %v1106_v54, %v1110_v61  ;;  %v5669_v10 = vcombine.high %v1113_v4, %v1117_v5  ;;  %v5671_v11 = vcombine.high %v1114_v17, %v1118_v7  ;;  %v1157_v54 = vld [vmem:[#allocation8 + $0xd20] sm:$0xff]  ;;  %v1154_v61 = vld [vmem:[#allocation8 + $0xd08] sm:$0xff] }
 0x1d3   :  { %3952 = vmatpush1.bf16.msra.mxu0 %v5620_v24  ;;  %4116 = vmatpush1.bf16.msra.mxu1 %v5622_v25  ;;  %v1126_v24 = vld [vmem:[#allocation8 + $0xc28] sm:$0xff]  ;;  %v5668_v25 = vcombine.low %v1113_v4, %v1117_v5  ;;  %v1161_v5 = vld [vmem:[#allocation8 + $0xd40] sm:$0xff] }
 0x1d4   :  { %3953 = vmatprep.subr.bf16.mxu0 %v5629_v26  ;;  %4117 = vmatprep.subr.bf16.mxu1 %v5631_v27  ;;  %v5670_v26 = vcombine.low %v1114_v17, %v1118_v7  ;;  %v5677_v27 = vcombine.high %v1121_v18, %v1125_v20  ;;  %v5679_v28 = vcombine.high %v1122_v23, %v1126_v24  ;;  %v1165_v17 = vld [vmem:[#allocation8 + $0xd60] sm:$0xff]  ;;  %v1162_v7 = vld [vmem:[#allocation8 + $0xd48] sm:$0xff] }
 0x1d7   :  { %3954 = vmatpush1.bf16.msra.mxu0 %v5628_v31  ;;  %4118 = vmatpush1.bf16.msra.mxu1 %v5630_v34  ;;  %v1134_v31 = vld [vmem:[#allocation8 + $0xc68] sm:$0xff]  ;;  %v5676_v34 = vcombine.low %v1121_v18, %v1125_v20  ;;  %v1169_v20 = vld [vmem:[#allocation8 + $0xd80] sm:$0xff] }
 0x1d8   :  { %3955 = vmatprep.subr.bf16.mxu0 %v5637_v35  ;;  %4119 = vmatprep.subr.bf16.mxu1 %v5639_v36  ;;  %v5678_v35 = vcombine.low %v1122_v23, %v1126_v24  ;;  %v6475_v36 = vpack.c.bf16 %v6451_v12, %v6451_v12  ;;  %v5687_v38 = vcombine.high %v1130_v30, %v1134_v31  ;;  %v1173_v23 = vld [vmem:[#allocation8 + $0xda0] sm:$0xff]  ;;  %v1170_v24 = vld [vmem:[#allocation8 + $0xd88] sm:$0xff] }
 0x1d9   :  { %v5684_v12 = vcombine.low %v1129_v15, %v1133_v29  ;;  %v1177_v29 = vld [vmem:[#allocation8 + $0xdc0] sm:$0xff] }
 0x1db   :  { %3956 = vmatpush1.bf16.msra.mxu0 %v5636_v43  ;;  %4120 = vmatpush1.bf16.msra.mxu1 %v5638_v0  ;;  %v1138_v43 = vld [vmem:[#allocation8 + $0xc88] sm:$0xff] }
 0x1dc   :  { %3957 = vmatprep.subr.bf16.mxu0 %v5645_v45  ;;  %4121 = vmatprep.subr.bf16.mxu1 %v5647_v47  ;;  %v1142_v0 = vld [vmem:[#allocation8 + $0xca8] sm:$0xff]  ;;  %v6479_v45 = vpack.c.bf16 %v6459_v44, %v6459_v44  ;;  %v5686_v47 = vcombine.low %v1130_v30, %v1134_v31  ;;  %v5692_v44 = vcombine.low %v1137_v40, %v1141_v42  ;;  %v1181_v30 = vld [vmem:[#allocation8 + $0xde0] sm:$0xff] }
 0x1dd   :  { %v5695_v49 = vcombine.high %v1138_v43, %v1142_v0  ;;  %v1178_v31 = vld [vmem:[#allocation8 + $0xdc8] sm:$0xff]  ;;  %v1185_v42 = vld [vmem:[#allocation8 + $0xe00] sm:$0xff] }
 0x1df   :  { %3958 = vmatpush1.bf16.msra.mxu0 %v5644_v53  ;;  %4122 = vmatpush1.bf16.msra.mxu1 %v5646_v55  ;;  %v1146_v53 = vld [vmem:[#allocation8 + $0xcc8] sm:$0xff] }
 0x1e0   :  { %3959 = vmatprep.subr.bf16.mxu0 %v5653_v56  ;;  %4123 = vmatprep.subr.bf16.mxu1 %v5655_v57  ;;  %v1150_v55 = vld [vmem:[#allocation8 + $0xce8] sm:$0xff]  ;;  %v5694_v56 = vcombine.low %v1138_v43, %v1142_v0  ;;  %v5701_v57 = vcombine.high %v1145_v21, %v1149_v50  ;;  %v1189_v43 = vld [vmem:[#allocation8 + $0xe20] sm:$0xff] }
 0x1e1   :  { %v5703_v58 = vcombine.high %v1146_v53, %v1150_v55  ;;  %v1186_v0 = vld [vmem:[#allocation8 + $0xe08] sm:$0xff] }
 0x1e3   :  { %3960 = vmatpush1.bf16.msra.mxu0 %v5652_v63  ;;  %4124 = vmatpush1.bf16.msra.mxu1 %v5654_v1  ;;  %v1158_v63 = vld [vmem:[#allocation8 + $0xd28] sm:$0xff]  ;;  %v5700_v1 = vcombine.low %v1145_v21, %v1149_v50  ;;  %v1193_v50 = vld [vmem:[#allocation8 + $0xe40] sm:$0xff] }
 0x1e4   :  { %3961 = vmatprep.subr.bf16.mxu0 %v5661_v2  ;;  %4125 = vmatprep.subr.bf16.mxu1 %v5663_v3  ;;  %v5702_v2 = vcombine.low %v1146_v53, %v1150_v55  ;;  %v5709_v3 = vcombine.high %v1153_v59, %v1157_v54  ;;  %v5711_v4 = vcombine.high %v1154_v61, %v1158_v63  ;;  %v1197_v53 = vld [vmem:[#allocation8 + $0xe60] sm:$0xff]  ;;  %v1194_v55 = vld [vmem:[#allocation8 + $0xe48] sm:$0xff] }
 0x1e7   :  { %3962 = vmatpush1.bf16.msra.mxu0 %v5660_v8  ;;  %4126 = vmatpush1.bf16.msra.mxu1 %v5662_v9  ;;  %v1166_v8 = vld [vmem:[#allocation8 + $0xd68] sm:$0xff]  ;;  %v5708_v9 = vcombine.low %v1153_v59, %v1157_v54  ;;  %v1201_v54 = vld [vmem:[#allocation8 + $0xe80] sm:$0xff] }
 0x1e8   :  { %3963 = vmatprep.subr.bf16.mxu0 %v5669_v10  ;;  %4127 = vmatprep.subr.bf16.mxu1 %v5671_v11  ;;  %v5710_v10 = vcombine.low %v1154_v61, %v1158_v63  ;;  %v5717_v11 = vcombine.high %v1161_v5, %v1165_v17  ;;  %v5719_v18 = vcombine.high %v1162_v7, %v1166_v8  ;;  %v1205_v61 = vld [vmem:[#allocation8 + $0xea0] sm:$0xff]  ;;  %v1202_v63 = vld [vmem:[#allocation8 + $0xe88] sm:$0xff] }
 0x1eb   :  { %3964 = vmatpush1.bf16.msra.mxu0 %v5668_v25  ;;  %4128 = vmatpush1.bf16.msra.mxu1 %v5670_v26  ;;  %v1174_v25 = vld [vmem:[#allocation8 + $0xda8] sm:$0xff]  ;;  %v5716_v26 = vcombine.low %v1161_v5, %v1165_v17  ;;  %v1209_v17 = vld [vmem:[#allocation8 + $0xec0] sm:$0xff] }
 0x1ec   :  { %3974 = vmatprep.subr.bf16.mxu0 %v5677_v27  ;;  %4138 = vmatprep.subr.bf16.mxu1 %v5679_v28  ;;  %v5718_v27 = vcombine.low %v1162_v7, %v1166_v8  ;;  %v5725_v28 = vcombine.high %v1169_v20, %v1173_v23  ;;  %v5727_v15 = vcombine.high %v1170_v24, %v1174_v25  ;;  %v1213_v7 = vld [vmem:[#allocation8 + $0xee0] sm:$0xff]  ;;  %v1210_v8 = vld [vmem:[#allocation8 + $0xec8] sm:$0xff] }
 0x1ee   :  { %3966 = vmatmul.mubr.bf16.vlgmr.msra.gmra.mrb[8].mxu0 %v6475_v36  ;;  %4130 = vmatmul.mubr.bf16.vlgmr.msra.gmra.mrb[8].mxu1 %v6475_v36 }
 0x1ef   :  { %3975 = vmatpush1.bf16.msra.mxu0 %v5676_v34  ;;  %4139 = vmatpush1.bf16.msra.mxu1 %v5678_v35  ;;  %v1182_v34 = vld [vmem:[#allocation8 + $0xde8] sm:$0xff]  ;;  %v5724_v35 = vcombine.low %v1169_v20, %v1173_v23  ;;  %v1217_v23 = vld [vmem:[#allocation8 + $0xf00] sm:$0xff] }
 0x1f0   :  { %3976 = vmatprep.subr.bf16.mxu0 %v5685_v37  ;;  %4140 = vmatprep.subr.bf16.mxu1 %v5687_v38  ;;  %v5726_v37 = vcombine.low %v1170_v24, %v1174_v25  ;;  %v5733_v38 = vcombine.high %v1177_v29, %v1181_v30  ;;  %v5735_v40 = vcombine.high %v1178_v31, %v1182_v34  ;;  %v1221_v24 = vld [vmem:[#allocation8 + $0xf20] sm:$0xff]  ;;  %v1218_v25 = vld [vmem:[#allocation8 + $0xf08] sm:$0xff] }
 0x1f1   :  { %4006 = vmatprep.mubr.bf16.mxu0 %v6479_v45  ;;  %4170 = vmatprep.mubr.bf16.mxu1 %v6479_v45 }
 0x1f3   :  { %3977 = vmatpush1.bf16.msra.mxu0 %v5684_v12  ;;  %4141 = vmatpush1.bf16.msra.mxu1 %v5686_v47  ;;  %v1190_v12 = vld [vmem:[#allocation8 + $0xe28] sm:$0xff]  ;;  %v5732_v47 = vcombine.low %v1177_v29, %v1181_v30  ;;  %v1225_v30 = vld [vmem:[#allocation8 + $0xf40] sm:$0xff] }
 0x1f4   :  { %3978 = vmatprep.subr.bf16.mxu0 %v5693_v48  ;;  %4142 = vmatprep.subr.bf16.mxu1 %v5695_v49  ;;  %v5734_v48 = vcombine.low %v1178_v31, %v1182_v34  ;;  %v5741_v49 = vcombine.high %v1185_v42, %v1189_v43  ;;  %v5743_v21 = vcombine.high %v1186_v0, %v1190_v12  ;;  %v1229_v31 = vld [vmem:[#allocation8 + $0xf60] sm:$0xff]  ;;  %v1226_v34 = vld [vmem:[#allocation8 + $0xf48] sm:$0xff] }
 0x1f7   :  { %3979 = vmatpush1.bf16.msra.mxu0 %v5692_v44  ;;  %4143 = vmatpush1.bf16.msra.mxu1 %v5694_v56  ;;  %v1198_v44 = vld [vmem:[#allocation8 + $0xe68] sm:$0xff]  ;;  %v5740_v56 = vcombine.low %v1185_v42, %v1189_v43  ;;  %v1233_v43 = vld [vmem:[#allocation8 + $0xf80] sm:$0xff] }
 0x1f8   :  { %3980 = vmatprep.subr.bf16.mxu0 %v5701_v57  ;;  %4144 = vmatprep.subr.bf16.mxu1 %v5703_v58  ;;  %v5742_v57 = vcombine.low %v1186_v0, %v1190_v12  ;;  %v5749_v58 = vcombine.high %v1193_v50, %v1197_v53  ;;  %v5751_v59 = vcombine.high %v1194_v55, %v1198_v44  ;;  %v1237_v0 = vld [vmem:[#allocation8 + $0xfa0] sm:$0xff]  ;;  %v1234_v12 = vld [vmem:[#allocation8 + $0xf88] sm:$0xff] }
 0x1fb   :  { %3981 = vmatpush1.bf16.msra.mxu0 %v5700_v1  ;;  %4145 = vmatpush1.bf16.msra.mxu1 %v5702_v2  ;;  %v1206_v1 = vld [vmem:[#allocation8 + $0xea8] sm:$0xff]  ;;  %v5748_v2 = vcombine.low %v1193_v50, %v1197_v53  ;;  %v1241_v53 = vld [vmem:[#allocation8 + $0xfc0] sm:$0xff] }
 0x1fc   :  { %3982 = vmatprep.subr.bf16.mxu0 %v5709_v3  ;;  %4146 = vmatprep.subr.bf16.mxu1 %v5711_v4  ;;  %v5750_v3 = vcombine.low %v1194_v55, %v1198_v44  ;;  %v5757_v4 = vcombine.high %v1201_v54, %v1205_v61  ;;  %v5759_v5 = vcombine.high %v1202_v63, %v1206_v1  ;;  %v1245_v55 = vld [vmem:[#allocation8 + $0xfe0] sm:$0xff]  ;;  %v1242_v44 = vld [vmem:[#allocation8 + $0xfc8] sm:$0xff] }
 0x1ff   :  { %3983 = vmatpush1.bf16.msra.mxu0 %v5708_v9  ;;  %4147 = vmatpush1.bf16.msra.mxu1 %v5710_v10  ;;  %v1214_v9 = vld [vmem:[#allocation8 + $0xee8] sm:$0xff]  ;;  %v5756_v10 = vcombine.low %v1201_v54, %v1205_v61  ;;  %v739_v61 = vld [vmem:[#allocation8 + $0x10] sm:$0xff] }
 0x200   :  { %3984 = vmatprep.subr.bf16.mxu0 %v5717_v11  ;;  %4148 = vmatprep.subr.bf16.mxu1 %v5719_v18  ;;  %v5758_v11 = vcombine.low %v1202_v63, %v1206_v1  ;;  %v5765_v18 = vcombine.high %v1209_v17, %v1213_v7  ;;  %v5767_v20 = vcombine.high %v1210_v8, %v1214_v9  ;;  %v743_v63 = vld [vmem:[#allocation8 + $0x30] sm:$0xff]  ;;  %v740_v1 = vld [vmem:[#allocation8 + $0x18] sm:$0xff] }
 0x203   :  { %3985 = vmatpush1.bf16.msra.mxu0 %v5716_v26  ;;  %4149 = vmatpush1.bf16.msra.mxu1 %v5718_v27  ;;  %v1222_v26 = vld [vmem:[#allocation8 + $0xf28] sm:$0xff]  ;;  %v5764_v27 = vcombine.low %v1209_v17, %v1213_v7  ;;  %v747_v7 = vld [vmem:[#allocation8 + $0x50] sm:$0xff] }
 0x204   :  { %3986 = vmatprep.subr.bf16.mxu0 %v5725_v28  ;;  %4150 = vmatprep.subr.bf16.mxu1 %v5727_v15  ;;  %v5766_v28 = vcombine.low %v1210_v8, %v1214_v9  ;;  %v5773_v15 = vcombine.high %v1217_v23, %v1221_v24  ;;  %v5775_v29 = vcombine.high %v1218_v25, %v1222_v26  ;;  %v751_v8 = vld [vmem:[#allocation8 + $0x70] sm:$0xff]  ;;  %v748_v9 = vld [vmem:[#allocation8 + $0x58] sm:$0xff] }
 0x207   :  { %3987 = vmatpush1.bf16.msra.mxu0 %v5724_v35  ;;  %4151 = vmatpush1.bf16.msra.mxu1 %v5726_v37  ;;  %v1230_v35 = vld [vmem:[#allocation8 + $0xf68] sm:$0xff]  ;;  %v5772_v37 = vcombine.low %v1217_v23, %v1221_v24  ;;  %v5305_v23 = vcombine.high %v747_v7, %v751_v8 }
 0x208   :  { %3988 = vmatprep.subr.bf16.mxu0 %v5733_v38  ;;  %4152 = vmatprep.subr.bf16.mxu1 %v5735_v40  ;;  %v5774_v38 = vcombine.low %v1218_v25, %v1222_v26  ;;  %v5781_v40 = vcombine.high %v1225_v30, %v1229_v31  ;;  %v5783_v42 = vcombine.high %v1226_v34, %v1230_v35  ;;  %v755_v25 = vld [vmem:[#allocation8 + $0x90] sm:$0xff] }
 0x209   :  { %v759_v26 = vld [vmem:[#allocation8 + $0xb0] sm:$0xff] }
 0x20b   :  { %3989 = vmatpush1.bf16.msra.mxu0 %v5732_v47  ;;  %4153 = vmatpush1.bf16.msra.mxu1 %v5734_v48  ;;  %v1238_v47 = vld [vmem:[#allocation8 + $0xfa8] sm:$0xff]  ;;  %v5780_v48 = vcombine.low %v1225_v30, %v1229_v31  ;;  %v763_v31 = vld [vmem:[#allocation8 + $0xd0] sm:$0xff] }
 0x20c   :  { %3990 = vmatprep.subr.bf16.mxu0 %v5741_v49  ;;  %4154 = vmatprep.subr.bf16.mxu1 %v5743_v21  ;;  %v5782_v49 = vcombine.low %v1226_v34, %v1230_v35  ;;  %v5789_v21 = vcombine.high %v1233_v43, %v1237_v0  ;;  %v5791_v50 = vcombine.high %v1234_v12, %v1238_v47  ;;  %v767_v34 = vld [vmem:[#allocation8 + $0xf0] sm:$0xff]  ;;  %v764_v35 = vld [vmem:[#allocation8 + $0xd8] sm:$0xff] }
 0x20f   :  { %3991 = vmatpush1.bf16.msra.mxu0 %v5740_v56  ;;  %4155 = vmatpush1.bf16.msra.mxu1 %v5742_v57  ;;  %v1246_v56 = vld [vmem:[#allocation8 + $0xfe8] sm:$0xff]  ;;  %v5788_v57 = vcombine.low %v1233_v43, %v1237_v0  ;;  %v771_v0 = vld [vmem:[#allocation8 + $0x110] sm:$0xff] }
 0x210   :  { %3992 = vmatprep.subr.bf16.mxu0 %v5749_v58  ;;  %4156 = vmatprep.subr.bf16.mxu1 %v5751_v59  ;;  %v5790_v58 = vcombine.low %v1234_v12, %v1238_v47  ;;  %v5797_v59 = vcombine.high %v1241_v53, %v1245_v55  ;;  %v5799_v54 = vcombine.high %v1242_v44, %v1246_v56  ;;  %v775_v12 = vld [vmem:[#allocation8 + $0x130] sm:$0xff]  ;;  %v776_v47 = vld [vmem:[#allocation8 + $0x138] sm:$0xff] }
 0x213   :  { %3993 = vmatpush1.bf16.msra.mxu0 %v5748_v2  ;;  %4157 = vmatpush1.bf16.msra.mxu1 %v5750_v3  ;;  %v744_v2 = vld [vmem:[#allocation8 + $0x38] sm:$0xff]  ;;  %v5796_v3 = vcombine.low %v1241_v53, %v1245_v55  ;;  %v779_v53 = vld [vmem:[#allocation8 + $0x150] sm:$0xff] }
 0x214   :  { %3994 = vmatprep.subr.bf16.mxu0 %v5757_v4  ;;  %4158 = vmatprep.subr.bf16.mxu1 %v5759_v5  ;;  %v5798_v4 = vcombine.low %v1242_v44, %v1246_v56  ;;  %v5297_v5 = vcombine.high %v739_v61, %v743_v63  ;;  %v5299_v17 = vcombine.high %v740_v1, %v744_v2  ;;  %v783_v55 = vld [vmem:[#allocation8 + $0x170] sm:$0xff]  ;;  %v780_v44 = vld [vmem:[#allocation8 + $0x158] sm:$0xff] }
 0x215   :  { %v784_v56 = vld [vmem:[#allocation8 + $0x178] sm:$0xff] }
 0x217   :  { %3995 = vmatpush1.bf16.msra.mxu0 %v5756_v10  ;;  %4159 = vmatpush1.bf16.msra.mxu1 %v5758_v11  ;;  %v752_v10 = vld [vmem:[#allocation8 + $0x78] sm:$0xff]  ;;  %v5296_v11 = vcombine.low %v739_v61, %v743_v63  ;;  %v787_v61 = vld [vmem:[#allocation8 + $0x190] sm:$0xff] }
 0x218   :  { %3996 = vmatprep.subr.bf16.mxu0 %v5765_v18  ;;  %4160 = vmatprep.subr.bf16.mxu1 %v5767_v20  ;;  %v6487_v18 = vpack.c.bf16 %v6457_v6, %v6457_v6  ;;  %v5298_v20 = vcombine.low %v740_v1, %v744_v2  ;;  %v5307_v24 = vcombine.high %v748_v9, %v752_v10  ;;  %v791_v63 = vld [vmem:[#allocation8 + $0x1b0] sm:$0xff]  ;;  %v788_v1 = vld [vmem:[#allocation8 + $0x198] sm:$0xff] }
 0x219   :  { %v5306_v6 = vcombine.low %v748_v9, %v752_v10  ;;  %v792_v2 = vld [vmem:[#allocation8 + $0x1b8] sm:$0xff] }
 0x21a   :  { %v796_v9 = vld [vmem:[#allocation8 + $0x1d8] sm:$0xff] }
 0x21b   :  { %3997 = vmatpush1.bf16.msra.mxu0 %v5764_v27  ;;  %4161 = vmatpush1.bf16.msra.mxu1 %v5766_v28  ;;  %v756_v27 = vld [vmem:[#allocation8 + $0x98] sm:$0xff] }
 0x21c   :  { %3998 = vmatprep.subr.bf16.mxu0 %v5773_v15  ;;  %4162 = vmatprep.subr.bf16.mxu1 %v5775_v29  ;;  %v760_v28 = vld [vmem:[#allocation8 + $0xb8] sm:$0xff]  ;;  %v5304_v15 = vcombine.low %v747_v7, %v751_v8  ;;  %v5313_v29 = vcombine.high %v755_v25, %v759_v26  ;;  %v795_v7 = vld [vmem:[#allocation8 + $0x1d0] sm:$0xff] }
 0x21d   :  { %v5315_v30 = vcombine.high %v756_v27, %v760_v28  ;;  %v799_v8 = vld [vmem:[#allocation8 + $0x1f0] sm:$0xff]  ;;  %v800_v10 = vld [vmem:[#allocation8 + $0x1f8] sm:$0xff] }
 0x21f   :  { %3999 = vmatpush1.bf16.msra.mxu0 %v5772_v37  ;;  %4163 = vmatpush1.bf16.msra.mxu1 %v5774_v38  ;;  %v768_v37 = vld [vmem:[#allocation8 + $0xf8] sm:$0xff]  ;;  %v5312_v38 = vcombine.low %v755_v25, %v759_v26  ;;  %v803_v25 = vld [vmem:[#allocation8 + $0x210] sm:$0xff] }
 0x220   :  { %4000 = vmatprep.subr.bf16.mxu0 %v5781_v40  ;;  %4164 = vmatprep.subr.bf16.mxu1 %v5783_v42  ;;  %v5314_v40 = vcombine.low %v756_v27, %v760_v28  ;;  %v5321_v42 = vcombine.high %v763_v31, %v767_v34  ;;  %v5323_v43 = vcombine.high %v764_v35, %v768_v37  ;;  %v807_v26 = vld [vmem:[#allocation8 + $0x230] sm:$0xff]  ;;  %v804_v27 = vld [vmem:[#allocation8 + $0x218] sm:$0xff] }
 0x221   :  { %v808_v28 = vld [vmem:[#allocation8 + $0x238] sm:$0xff] }
 0x223   :  { %4001 = vmatpush1.bf16.msra.mxu0 %v5780_v48  ;;  %4165 = vmatpush1.bf16.msra.mxu1 %v5782_v49  ;;  %v5320_v48 = vcombine.low %v763_v31, %v767_v34  ;;  %v5322_v49 = vcombine.low %v764_v35, %v768_v37  ;;  %v811_v31 = vld [vmem:[#allocation8 + $0x250] sm:$0xff]  ;;  %v812_v35 = vld [vmem:[#allocation8 + $0x258] sm:$0xff] }
 0x224   :  { %4002 = vmatprep.subr.bf16.mxu0 %v5789_v21  ;;  %4166 = vmatprep.subr.bf16.mxu1 %v5791_v50  ;;  %v5329_v21 = vcombine.high %v771_v0, %v775_v12  ;;  %v815_v34 = vld [vmem:[#allocation8 + $0x270] sm:$0xff]  ;;  %v816_v37 = vld [vmem:[#allocation8 + $0x278] sm:$0xff] }
 0x227   :  { %4003 = vmatpush1.bf16.msra.mxu0 %v5788_v57  ;;  %4167 = vmatpush1.bf16.msra.mxu1 %v5790_v58  ;;  %v5328_v57 = vcombine.low %v771_v0, %v775_v12  ;;  %v819_v0 = vld [vmem:[#allocation8 + $0x290] sm:$0xff] }
 0x228   :  { %4004 = vmatprep.subr.bf16.mxu0 %v5797_v59  ;;  %4168 = vmatprep.subr.bf16.mxu1 %v5799_v54  ;;  %v5337_v59 = vcombine.high %v779_v53, %v783_v55  ;;  %v5339_v54 = vcombine.high %v780_v44, %v784_v56  ;;  %v823_v12 = vld [vmem:[#allocation8 + $0x2b0] sm:$0xff] }
 0x22b   :  { %4005 = vmatpush1.bf16.msra.mxu0 %v5796_v3  ;;  %4169 = vmatpush1.bf16.msra.mxu1 %v5798_v4  ;;  %v5336_v3 = vcombine.low %v779_v53, %v783_v55  ;;  %v5338_v4 = vcombine.low %v780_v44, %v784_v56  ;;  %v827_v53 = vld [vmem:[#allocation8 + $0x2d0] sm:$0xff]  ;;  %v828_v44 = vld [vmem:[#allocation8 + $0x2d8] sm:$0xff] }
 0x22c   :  { %4179 = vmatprep.subr.bf16.mxu0 %v5297_v5  ;;  %4343 = vmatprep.subr.bf16.mxu1 %v5299_v17  ;;  %v5345_v5 = vcombine.high %v787_v61, %v791_v63  ;;  %v5347_v17 = vcombine.high %v788_v1, %v792_v2  ;;  %v831_v55 = vld [vmem:[#allocation8 + $0x2f0] sm:$0xff]  ;;  %v832_v56 = vld [vmem:[#allocation8 + $0x2f8] sm:$0xff] }
 0x22e   :  { %4007 = vmatmul.mubr.bf16.vlgmr.msra.gmra.mrb[8].mxu0 %v6487_v18  ;;  %4171 = vmatmul.mubr.bf16.vlgmr.msra.gmra.mrb[8].mxu1 %v6487_v18 }
 0x22f   :  { %4180 = vmatpush1.bf16.msra.mxu0 %v5296_v11  ;;  %4211 = vmatprep.mubr.bf16.mxu0 %v6417_v39  ;;  %v5344_v11 = vcombine.low %v787_v61, %v791_v63  ;;  %v835_v61 = vld [vmem:[#allocation8 + $0x310] sm:$0xff] }
 0x230   :  { %4344 = vmatpush1.bf16.msra.mxu1 %v5298_v20  ;;  %4375 = vmatprep.mubr.bf16.mxu1 %v6417_v39  ;;  %v772_v39 = vld [vmem:[#allocation8 + $0x118] sm:$0xff]  ;;  %v5346_v20 = vcombine.low %v788_v1, %v792_v2  ;;  %v839_v63 = vld [vmem:[#allocation8 + $0x330] sm:$0xff] }
 0x231   :  { %4181 = vmatprep.subr.bf16.mxu0 %v5305_v23  ;;  %4345 = vmatprep.subr.bf16.mxu1 %v5307_v24  ;;  %v5331_v50 = vcombine.high %v772_v39, %v776_v47  ;;  %v5330_v58 = vcombine.low %v772_v39, %v776_v47  ;;  %v5353_v23 = vcombine.high %v795_v7, %v799_v8  ;;  %v820_v39 = vld [vmem:[#allocation8 + $0x298] sm:$0xff] }
 0x232   :  { %v5355_v24 = vcombine.high %v796_v9, %v800_v10  ;;  %v824_v47 = vld [vmem:[#allocation8 + $0x2b8] sm:$0xff] }
 0x233   :  { %4182 = vmatpush1.bf16.msra.mxu0 %v5304_v15  ;;  %v5352_v15 = vcombine.low %v795_v7, %v799_v8  ;;  %v836_v1 = vld [vmem:[#allocation8 + $0x318] sm:$0xff]  ;;  %v843_v7 = vld [vmem:[#allocation8 + $0x350] sm:$0xff] }
 0x234   :  { %4346 = vmatpush1.bf16.msra.mxu1 %v5306_v6  ;;  %4183 = vmatprep.subr.bf16.mxu0 %v5313_v29  ;;  %v5354_v6 = vcombine.low %v796_v9, %v800_v10  ;;  %v5361_v29 = vcombine.high %v803_v25, %v807_v26  ;;  %v840_v2 = vld [vmem:[#allocation8 + $0x338] sm:$0xff]  ;;  %v847_v8 = vld [vmem:[#allocation8 + $0x370] sm:$0xff] }
 0x235   :  { %4347 = vmatprep.subr.bf16.mxu1 %v5315_v30  ;;  %v5363_v30 = vcombine.high %v804_v27, %v808_v28  ;;  %v844_v9 = vld [vmem:[#allocation8 + $0x358] sm:$0xff] }
 0x236   :  { %v848_v10 = vld [vmem:[#allocation8 + $0x378] sm:$0xff] }
 0x237   :  { %4184 = vmatpush1.bf16.msra.mxu0 %v5312_v38  ;;  %v5360_v38 = vcombine.low %v803_v25, %v807_v26  ;;  %v851_v25 = vld [vmem:[#allocation8 + $0x390] sm:$0xff] }
 0x238   :  { %4348 = vmatpush1.bf16.msra.mxu1 %v5314_v40  ;;  %4185 = vmatprep.subr.bf16.mxu0 %v5321_v42  ;;  %v5362_v40 = vcombine.low %v804_v27, %v808_v28  ;;  %v5369_v42 = vcombine.high %v811_v31, %v815_v34  ;;  %v855_v26 = vld [vmem:[#allocation8 + $0x3b0] sm:$0xff]  ;;  %v852_v27 = vld [vmem:[#allocation8 + $0x398] sm:$0xff] }
 0x239   :  { %4349 = vmatprep.subr.bf16.mxu1 %v5323_v43  ;;  %v5371_v43 = vcombine.high %v812_v35, %v816_v37  ;;  %v856_v28 = vld [vmem:[#allocation8 + $0x3b8] sm:$0xff] }
 0x23b   :  { %4186 = vmatpush1.bf16.msra.mxu0 %v5320_v48  ;;  %v5368_v48 = vcombine.low %v811_v31, %v815_v34  ;;  %v859_v31 = vld [vmem:[#allocation8 + $0x3d0] sm:$0xff] }
 0x23c   :  { %4350 = vmatpush1.bf16.msra.mxu1 %v5322_v49  ;;  %4187 = vmatprep.subr.bf16.mxu0 %v5329_v21  ;;  %v5370_v49 = vcombine.low %v812_v35, %v816_v37  ;;  %v5377_v21 = vcombine.high %v819_v0, %v823_v12  ;;  %v863_v34 = vld [vmem:[#allocation8 + $0x3f0] sm:$0xff]  ;;  %v860_v35 = vld [vmem:[#allocation8 + $0x3d8] sm:$0xff] }
 0x23d   :  { %4351 = vmatprep.subr.bf16.mxu1 %v5331_v50  ;;  %v5379_v50 = vcombine.high %v820_v39, %v824_v47  ;;  %v864_v37 = vld [vmem:[#allocation8 + $0x3f8] sm:$0xff] }
 0x23f   :  { %4188 = vmatpush1.bf16.msra.mxu0 %v5328_v57  ;;  %v5376_v57 = vcombine.low %v819_v0, %v823_v12  ;;  %v867_v0 = vld [vmem:[#allocation8 + $0x410] sm:$0xff] }
 0x240   :  { %4352 = vmatpush1.bf16.msra.mxu1 %v5330_v58  ;;  %4189 = vmatprep.subr.bf16.mxu0 %v5337_v59  ;;  %v5378_v58 = vcombine.low %v820_v39, %v824_v47  ;;  %v5385_v59 = vcombine.high %v827_v53, %v831_v55  ;;  %v871_v12 = vld [vmem:[#allocation8 + $0x430] sm:$0xff]  ;;  %v868_v39 = vld [vmem:[#allocation8 + $0x418] sm:$0xff] }
 0x241   :  { %4353 = vmatprep.subr.bf16.mxu1 %v5339_v54  ;;  %v5387_v54 = vcombine.high %v828_v44, %v832_v56  ;;  %v872_v47 = vld [vmem:[#allocation8 + $0x438] sm:$0xff] }
 0x243   :  { %4190 = vmatpush1.bf16.msra.mxu0 %v5336_v3  ;;  %v5384_v3 = vcombine.low %v827_v53, %v831_v55  ;;  %v875_v53 = vld [vmem:[#allocation8 + $0x450] sm:$0xff] }
 0x244   :  { %4354 = vmatpush1.bf16.msra.mxu1 %v5338_v4  ;;  %4191 = vmatprep.subr.bf16.mxu0 %v5345_v5  ;;  %v5386_v4 = vcombine.low %v828_v44, %v832_v56  ;;  %v5393_v5 = vcombine.high %v835_v61, %v839_v63  ;;  %v879_v55 = vld [vmem:[#allocation8 + $0x470] sm:$0xff]  ;;  %v5424_v44 = vcombine.low %v867_v0, %v871_v12  ;;  %v876_v56 = vld [vmem:[#allocation8 + $0x458] sm:$0xff] }
 0x245   :  { %4355 = vmatprep.subr.bf16.mxu1 %v5347_v17  ;;  %v5395_v17 = vcombine.high %v836_v1, %v840_v2 }
 0x247   :  { %4192 = vmatpush1.bf16.msra.mxu0 %v5344_v11  ;;  %v5392_v11 = vcombine.low %v835_v61, %v839_v63  ;;  %v887_v61 = vld [vmem:[#allocation8 + $0x4b0] sm:$0xff] }
 0x248   :  { %4356 = vmatpush1.bf16.msra.mxu1 %v5346_v20  ;;  %4193 = vmatprep.subr.bf16.mxu0 %v5353_v23  ;;  %v5394_v20 = vcombine.low %v836_v1, %v840_v2  ;;  %v5401_v23 = vcombine.high %v843_v7, %v847_v8  ;;  %v884_v1 = vld [vmem:[#allocation8 + $0x498] sm:$0xff] }
 0x249   :  { %4357 = vmatprep.subr.bf16.mxu1 %v5355_v24  ;;  %v5403_v24 = vcombine.high %v844_v9, %v848_v10  ;;  %v888_v2 = vld [vmem:[#allocation8 + $0x4b8] sm:$0xff] }
 0x24b   :  { %4194 = vmatpush1.bf16.msra.mxu0 %v5352_v15  ;;  %v5400_v15 = vcombine.low %v843_v7, %v847_v8  ;;  %v891_v7 = vld [vmem:[#allocation8 + $0x4d0] sm:$0xff] }
 0x24c   :  { %4358 = vmatpush1.bf16.msra.mxu1 %v5354_v6  ;;  %4195 = vmatprep.subr.bf16.mxu0 %v5361_v29  ;;  %v5402_v6 = vcombine.low %v844_v9, %v848_v10  ;;  %v5409_v29 = vcombine.high %v851_v25, %v855_v26  ;;  %v895_v8 = vld [vmem:[#allocation8 + $0x4f0] sm:$0xff]  ;;  %v892_v9 = vld [vmem:[#allocation8 + $0x4d8] sm:$0xff] }
 0x24d   :  { %4359 = vmatprep.subr.bf16.mxu1 %v5363_v30  ;;  %v5411_v30 = vcombine.high %v852_v27, %v856_v28  ;;  %v896_v10 = vld [vmem:[#allocation8 + $0x4f8] sm:$0xff] }
 0x24f   :  { %4196 = vmatpush1.bf16.msra.mxu0 %v5360_v38  ;;  %v5408_v38 = vcombine.low %v851_v25, %v855_v26  ;;  %v903_v25 = vld [vmem:[#allocation8 + $0x530] sm:$0xff]  ;;  %v900_v26 = vld [vmem:[#allocation8 + $0x518] sm:$0xff] }
 0x250   :  { %4360 = vmatpush1.bf16.msra.mxu1 %v5362_v40  ;;  %4197 = vmatprep.subr.bf16.mxu0 %v5369_v42  ;;  %v5410_v40 = vcombine.low %v852_v27, %v856_v28  ;;  %v5417_v42 = vcombine.high %v859_v31, %v863_v34  ;;  %v904_v27 = vld [vmem:[#allocation8 + $0x538] sm:$0xff]  ;;  %v5450_v28 = vcombine.low %v892_v9, %v896_v10 }
 0x251   :  { %4361 = vmatprep.subr.bf16.mxu1 %v5371_v43  ;;  %v5419_v43 = vcombine.high %v860_v35, %v864_v37 }
 0x253   :  { %4198 = vmatpush1.bf16.msra.mxu0 %v5368_v48  ;;  %v5416_v48 = vcombine.low %v859_v31, %v863_v34  ;;  %v908_v31 = vld [vmem:[#allocation8 + $0x558] sm:$0xff] }
 0x254   :  { %4362 = vmatpush1.bf16.msra.mxu1 %v5370_v49  ;;  %4199 = vmatprep.subr.bf16.mxu0 %v5377_v21  ;;  %v5418_v49 = vcombine.low %v860_v35, %v864_v37  ;;  %v5425_v21 = vcombine.high %v867_v0, %v871_v12  ;;  %v912_v34 = vld [vmem:[#allocation8 + $0x578] sm:$0xff]  ;;  %v5458_v37 = vcombine.low %v900_v26, %v904_v27 }
 0x255   :  { %4363 = vmatprep.subr.bf16.mxu1 %v5379_v50  ;;  %v5427_v50 = vcombine.high %v868_v39, %v872_v47  ;;  %v916_v0 = vld [vmem:[#allocation8 + $0x598] sm:$0xff] }
 0x256   :  { %v920_v12 = vld [vmem:[#allocation8 + $0x5b8] sm:$0xff] }
 0x257   :  { %4200 = vmatpush1.bf16.msra.mxu0 %v5376_v57  ;;  %v880_v57 = vld [vmem:[#allocation8 + $0x478] sm:$0xff] }
 0x258   :  { %4364 = vmatpush1.bf16.msra.mxu1 %v5378_v58  ;;  %4201 = vmatprep.subr.bf16.mxu0 %v5385_v59  ;;  %v5426_v58 = vcombine.low %v868_v39, %v872_v47  ;;  %v5433_v59 = vcombine.high %v875_v53, %v879_v55  ;;  %v5435_v63 = vcombine.high %v876_v56, %v880_v57 }
 0x259   :  { %4365 = vmatprep.subr.bf16.mxu1 %v5387_v54  ;;  %v883_v54 = vld [vmem:[#allocation8 + $0x490] sm:$0xff]  ;;  %v5466_v47 = vcombine.low %v908_v31, %v912_v34 }
 0x25b   :  { %4202 = vmatpush1.bf16.msra.mxu0 %v5384_v3  ;;  %v5432_v3 = vcombine.low %v875_v53, %v879_v55  ;;  %v924_v53 = vld [vmem:[#allocation8 + $0x5d8] sm:$0xff] }
 0x25c   :  { %4366 = vmatpush1.bf16.msra.mxu1 %v5386_v4  ;;  %4203 = vmatprep.subr.bf16.mxu0 %v5393_v5  ;;  %v5434_v4 = vcombine.low %v876_v56, %v880_v57  ;;  %v5441_v5 = vcombine.high %v883_v54, %v887_v61  ;;  %v928_v55 = vld [vmem:[#allocation8 + $0x5f8] sm:$0xff]  ;;  %v5474_v56 = vcombine.low %v916_v0, %v920_v12 }
 0x25d   :  { %4367 = vmatprep.subr.bf16.mxu1 %v5395_v17  ;;  %v5443_v17 = vcombine.high %v884_v1, %v888_v2 }
 0x25f   :  { %4204 = vmatpush1.bf16.msra.mxu0 %v5392_v11  ;;  %v5440_v11 = vcombine.low %v883_v54, %v887_v61  ;;  %v935_v54 = vld [vmem:[#allocation8 + $0x630] sm:$0xff]  ;;  %v932_v61 = vld [vmem:[#allocation8 + $0x618] sm:$0xff] }
 0x260   :  { %4368 = vmatpush1.bf16.msra.mxu1 %v5394_v20  ;;  %4205 = vmatprep.subr.bf16.mxu0 %v5401_v23  ;;  %v5449_v20 = vcombine.high %v891_v7, %v895_v8  ;;  %v5451_v23 = vcombine.high %v892_v9, %v896_v10 }
 0x261   :  { %4369 = vmatprep.subr.bf16.mxu1 %v5403_v24  ;;  %v899_v24 = vld [vmem:[#allocation8 + $0x510] sm:$0xff] }
 0x262   :  { %v5456_v35 = vcombine.low %v899_v24, %v903_v25 }
 0x263   :  { %4206 = vmatpush1.bf16.msra.mxu0 %v5400_v15  ;;  %v5457_v15 = vcombine.high %v899_v24, %v903_v25  ;;  %v948_v24 = vld [vmem:[#allocation8 + $0x698] sm:$0xff] }
 0x264   :  { %4370 = vmatpush1.bf16.msra.mxu1 %v5402_v6  ;;  %4207 = vmatprep.subr.bf16.mxu0 %v5409_v29  ;;  %v5459_v6 = vcombine.high %v900_v26, %v904_v27  ;;  %v907_v29 = vld [vmem:[#allocation8 + $0x550] sm:$0xff]  ;;  %v952_v25 = vld [vmem:[#allocation8 + $0x6b8] sm:$0xff] }
 0x265   :  { %4371 = vmatprep.subr.bf16.mxu1 %v5411_v30  ;;  %v911_v30 = vld [vmem:[#allocation8 + $0x570] sm:$0xff] }
 0x266   :  { %v5464_v39 = vcombine.low %v907_v29, %v911_v30 }
 0x267   :  { %4208 = vmatpush1.bf16.msra.mxu0 %v5408_v38  ;;  %v5465_v38 = vcombine.high %v907_v29, %v911_v30  ;;  %v956_v29 = vld [vmem:[#allocation8 + $0x6d8] sm:$0xff] }
 0x268   :  { %4372 = vmatpush1.bf16.msra.mxu1 %v5410_v40  ;;  %4209 = vmatprep.subr.bf16.mxu0 %v5417_v42  ;;  %v5467_v40 = vcombine.high %v908_v31, %v912_v34  ;;  %v915_v42 = vld [vmem:[#allocation8 + $0x590] sm:$0xff]  ;;  %v960_v30 = vld [vmem:[#allocation8 + $0x6f8] sm:$0xff]  ;;  %v5506_v34 = vcombine.low %v948_v24, %v952_v25 }
 0x269   :  { %4373 = vmatprep.subr.bf16.mxu1 %v5419_v43  ;;  %v919_v43 = vld [vmem:[#allocation8 + $0x5b0] sm:$0xff] }
 0x26b   :  { %4210 = vmatpush1.bf16.msra.mxu0 %v5416_v48  ;;  %v5473_v48 = vcombine.high %v915_v42, %v919_v43 }
 0x26c   :  { %4374 = vmatpush1.bf16.msra.mxu1 %v5418_v49  ;;  %4220 = vmatprep.subr.bf16.mxu0 %v5425_v21  ;;  %v5475_v49 = vcombine.high %v916_v0, %v920_v12  ;;  %v923_v21 = vld [vmem:[#allocation8 + $0x5d0] sm:$0xff]  ;;  %v5514_v12 = vcombine.low %v956_v29, %v960_v30 }
 0x26d   :  { %4384 = vmatprep.subr.bf16.mxu1 %v5427_v50  ;;  %v927_v50 = vld [vmem:[#allocation8 + $0x5f0] sm:$0xff] }
 0x26e   :  { %4212 = vmatmul.mubr.bf16.vlgmr.msra.gmra.mrb[12].mxu0 %v6419_v41  ;;  %v5481_v57 = vcombine.high %v923_v21, %v927_v50 }
 0x26f   :  { %4376 = vmatmul.mubr.bf16.vlgmr.msra.gmra.mrb[12].mxu1 %v6419_v41  ;;  %4221 = vmatpush1.bf16.msra.mxu0 %v5424_v44  ;;  %v5442_v41 = vcombine.low %v884_v1, %v888_v2  ;;  %v5472_v44 = vcombine.low %v915_v42, %v919_v43  ;;  %v5480_v1 = vcombine.low %v923_v21, %v927_v50  ;;  %v964_v42 = vld [vmem:[#allocation8 + $0x718] sm:$0xff] }
 0x270   :  { %4252 = vmatprep.mubr.bf16.mxu0 %v6429_v62  ;;  %4385 = vmatpush1.bf16.msra.mxu1 %v5426_v58  ;;  %v5483_v58 = vcombine.high %v924_v53, %v928_v55  ;;  %v5482_v2 = vcombine.low %v924_v53, %v928_v55  ;;  %v968_v43 = vld [vmem:[#allocation8 + $0x738] sm:$0xff] }
 0x271   :  { %4416 = vmatprep.mubr.bf16.mxu1 %v6429_v62  ;;  %4222 = vmatprep.subr.bf16.mxu0 %v5433_v59  ;;  %v5448_v62 = vcombine.low %v891_v7, %v895_v8  ;;  %v931_v59 = vld [vmem:[#allocation8 + $0x610] sm:$0xff]  ;;  %v940_v7 = vld [vmem:[#allocation8 + $0x658] sm:$0xff]  ;;  %v5522_v55 = vcombine.low %v964_v42, %v968_v43 }
 0x272   :  { %4386 = vmatprep.subr.bf16.mxu1 %v5435_v63  ;;  %v936_v63 = vld [vmem:[#allocation8 + $0x638] sm:$0xff]  ;;  %v5488_v9 = vcombine.low %v931_v59, %v935_v54 }
 0x273   :  { %4223 = vmatpush1.bf16.msra.mxu0 %v5432_v3  ;;  %v5489_v3 = vcombine.high %v931_v59, %v935_v54  ;;  %v944_v8 = vld [vmem:[#allocation8 + $0x678] sm:$0xff]  ;;  %v5490_v10 = vcombine.low %v932_v61, %v936_v63 }
 0x274   :  { %4387 = vmatpush1.bf16.msra.mxu1 %v5434_v4  ;;  %4224 = vmatprep.subr.bf16.mxu0 %v5441_v5  ;;  %v5491_v4 = vcombine.high %v932_v61, %v936_v63  ;;  %v939_v5 = vld [vmem:[#allocation8 + $0x650] sm:$0xff]  ;;  %v5498_v27 = vcombine.low %v940_v7, %v944_v8  ;;  %v972_v21 = vld [vmem:[#allocation8 + $0x758] sm:$0xff] }
 0x275   :  { %4388 = vmatprep.subr.bf16.mxu1 %v5443_v17  ;;  %v943_v17 = vld [vmem:[#allocation8 + $0x670] sm:$0xff]  ;;  %v976_v50 = vld [vmem:[#allocation8 + $0x778] sm:$0xff] }
 0x276   :  { %v5496_v26 = vcombine.low %v939_v5, %v943_v17  ;;  %v980_v59 = vld [vmem:[#allocation8 + $0x798] sm:$0xff]  ;;  %v5530_v63 = vcombine.low %v972_v21, %v976_v50 }
 0x277   :  { %4225 = vmatpush1.bf16.msra.mxu0 %v5440_v11  ;;  %v5497_v11 = vcombine.high %v939_v5, %v943_v17  ;;  %v984_v54 = vld [vmem:[#allocation8 + $0x7b8] sm:$0xff] }
 0x278   :  { %4389 = vmatpush1.bf16.msra.mxu1 %v5442_v41  ;;  %4226 = vmatprep.subr.bf16.mxu0 %v5449_v20  ;;  %v5499_v41 = vcombine.high %v940_v7, %v944_v8  ;;  %v947_v20 = vld [vmem:[#allocation8 + $0x690] sm:$0xff]  ;;  %v988_v5 = vld [vmem:[#allocation8 + $0x7d8] sm:$0xff]  ;;  %v5538_v8 = vcombine.low %v980_v59, %v984_v54 }
 0x279   :  { %4390 = vmatprep.subr.bf16.mxu1 %v5451_v23  ;;  %v951_v23 = vld [vmem:[#allocation8 + $0x6b0] sm:$0xff]  ;;  %v992_v17 = vld [vmem:[#allocation8 + $0x7f8] sm:$0xff] }
 0x27a   :  { %v5504_v31 = vcombine.low %v947_v20, %v951_v23 }
 0x27b   :  { %4227 = vmatpush1.bf16.msra.mxu0 %v5448_v62  ;;  %v5505_v62 = vcombine.high %v947_v20, %v951_v23  ;;  %v996_v20 = vld [vmem:[#allocation8 + $0x818] sm:$0xff] }
 0x27c   :  { %4391 = vmatpush1.bf16.msra.mxu1 %v5450_v28  ;;  %4228 = vmatprep.subr.bf16.mxu0 %v5457_v15  ;;  %v5507_v28 = vcombine.high %v948_v24, %v952_v25  ;;  %v955_v15 = vld [vmem:[#allocation8 + $0x6d0] sm:$0xff]  ;;  %v1000_v23 = vld [vmem:[#allocation8 + $0x838] sm:$0xff]  ;;  %v5546_v25 = vcombine.low %v988_v5, %v992_v17 }
 0x27d   :  { %4392 = vmatprep.subr.bf16.mxu1 %v5459_v6  ;;  %v959_v6 = vld [vmem:[#allocation8 + $0x6f0] sm:$0xff] }
 0x27e   :  { %v5512_v0 = vcombine.low %v955_v15, %v959_v6 }
 0x27f   :  { %4229 = vmatpush1.bf16.msra.mxu0 %v5456_v35  ;;  %v5513_v35 = vcombine.high %v955_v15, %v959_v6  ;;  %v1004_v6 = vld [vmem:[#allocation8 + $0x858] sm:$0xff] }
 0x280   :  { %4393 = vmatpush1.bf16.msra.mxu1 %v5458_v37  ;;  %4230 = vmatprep.subr.bf16.mxu0 %v5465_v38  ;;  %v5515_v37 = vcombine.high %v956_v29, %v960_v30  ;;  %v963_v38 = vld [vmem:[#allocation8 + $0x710] sm:$0xff]  ;;  %v1008_v29 = vld [vmem:[#allocation8 + $0x878] sm:$0xff]  ;;  %v5554_v30 = vcombine.low %v996_v20, %v1000_v23 }
 0x281   :  { %4394 = vmatprep.subr.bf16.mxu1 %v5467_v40  ;;  %v967_v40 = vld [vmem:[#allocation8 + $0x730] sm:$0xff] }
 0x282   :  { %v5520_v53 = vcombine.low %v963_v38, %v967_v40 }
 0x283   :  { %4231 = vmatpush1.bf16.msra.mxu0 %v5464_v39  ;;  %v5521_v39 = vcombine.high %v963_v38, %v967_v40  ;;  %v1012_v38 = vld [vmem:[#allocation8 + $0x898] sm:$0xff] }
 0x284   :  { %4395 = vmatpush1.bf16.msra.mxu1 %v5466_v47  ;;  %4232 = vmatprep.subr.bf16.mxu0 %v5473_v48  ;;  %v5523_v47 = vcombine.high %v964_v42, %v968_v43  ;;  %v971_v48 = vld [vmem:[#allocation8 + $0x750] sm:$0xff]  ;;  %v1016_v40 = vld [vmem:[#allocation8 + $0x8b8] sm:$0xff]  ;;  %v5562_v43 = vcombine.low %v1004_v6, %v1008_v29 }
 0x285   :  { %4396 = vmatprep.subr.bf16.mxu1 %v5475_v49  ;;  %v975_v49 = vld [vmem:[#allocation8 + $0x770] sm:$0xff] }
 0x286   :  { %v5528_v61 = vcombine.low %v971_v48, %v975_v49 }
 0x287   :  { %4233 = vmatpush1.bf16.msra.mxu0 %v5472_v44  ;;  %v5529_v44 = vcombine.high %v971_v48, %v975_v49  ;;  %v1020_v48 = vld [vmem:[#allocation8 + $0x8d8] sm:$0xff] }
 0x288   :  { %4397 = vmatpush1.bf16.msra.mxu1 %v5474_v56  ;;  %4234 = vmatprep.subr.bf16.mxu0 %v5481_v57  ;;  %v5531_v56 = vcombine.high %v972_v21, %v976_v50  ;;  %v979_v57 = vld [vmem:[#allocation8 + $0x790] sm:$0xff]  ;;  %v1024_v49 = vld [vmem:[#allocation8 + $0x8f8] sm:$0xff] }
 0x289   :  { %4398 = vmatprep.subr.bf16.mxu1 %v5483_v58  ;;  %v983_v58 = vld [vmem:[#allocation8 + $0x7b0] sm:$0xff] }
 0x28a   :  { %v5536_v7 = vcombine.low %v979_v57, %v983_v58 }
 0x28b   :  { %4235 = vmatpush1.bf16.msra.mxu0 %v5480_v1  ;;  %v5537_v1 = vcombine.high %v979_v57, %v983_v58  ;;  %v1032_v57 = vld [vmem:[#allocation8 + $0x938] sm:$0xff]  ;;  %v5578_v58 = vcombine.low %v1020_v48, %v1024_v49 }
 0x28c   :  { %4399 = vmatpush1.bf16.msra.mxu1 %v5482_v2  ;;  %4236 = vmatprep.subr.bf16.mxu0 %v5489_v3  ;;  %v5539_v2 = vcombine.high %v980_v59, %v984_v54  ;;  %v987_v3 = vld [vmem:[#allocation8 + $0x7d0] sm:$0xff] }
 0x28d   :  { %4400 = vmatprep.subr.bf16.mxu1 %v5491_v4  ;;  %v991_v4 = vld [vmem:[#allocation8 + $0x7f0] sm:$0xff] }
 0x28e   :  { %v5544_v24 = vcombine.low %v987_v3, %v991_v4 }
 0x28f   :  { %4237 = vmatpush1.bf16.msra.mxu0 %v5488_v9  ;;  %v5545_v9 = vcombine.high %v987_v3, %v991_v4 }
 0x290   :  { %4401 = vmatpush1.bf16.msra.mxu1 %v5490_v10  ;;  %4238 = vmatprep.subr.bf16.mxu0 %v5497_v11  ;;  %v5547_v10 = vcombine.high %v988_v5, %v992_v17  ;;  %v995_v11 = vld [vmem:[#allocation8 + $0x810] sm:$0xff] }
 0x291   :  { %4402 = vmatprep.subr.bf16.mxu1 %v5499_v41  ;;  %v999_v41 = vld [vmem:[#allocation8 + $0x830] sm:$0xff] }
 0x292   :  { %v5552_v15 = vcombine.low %v995_v11, %v999_v41 }
 0x293   :  { %4239 = vmatpush1.bf16.msra.mxu0 %v5496_v26  ;;  %v5553_v26 = vcombine.high %v995_v11, %v999_v41 }
 0x294   :  { %4403 = vmatpush1.bf16.msra.mxu1 %v5498_v27  ;;  %4240 = vmatprep.subr.bf16.mxu0 %v5505_v62  ;;  %v5555_v27 = vcombine.high %v996_v20, %v1000_v23  ;;  %v1003_v62 = vld [vmem:[#allocation8 + $0x850] sm:$0xff] }
 0x295   :  { %4404 = vmatprep.subr.bf16.mxu1 %v5507_v28  ;;  %v1007_v28 = vld [vmem:[#allocation8 + $0x870] sm:$0xff] }
 0x296   :  { %v5560_v42 = vcombine.low %v1003_v62, %v1007_v28 }
 0x297   :  { %4241 = vmatpush1.bf16.msra.mxu0 %v5504_v31  ;;  %v5561_v31 = vcombine.high %v1003_v62, %v1007_v28 }
 0x298   :  { %4405 = vmatpush1.bf16.msra.mxu1 %v5506_v34  ;;  %4242 = vmatprep.subr.bf16.mxu0 %v5513_v35  ;;  %v1011_v34 = vld [vmem:[#allocation8 + $0x890] sm:$0xff] }
 0x299   :  { %4406 = vmatprep.subr.bf16.mxu1 %v5515_v37  ;;  %v1015_v35 = vld [vmem:[#allocation8 + $0x8b0] sm:$0xff]  ;;  %v5563_v37 = vcombine.high %v1004_v6, %v1008_v29 }
 0x29a   :  { %v5568_v21 = vcombine.low %v1011_v34, %v1015_v35  ;;  %v1059_v29 = vld [vmem:[#allocation8 + $0xa10] sm:$0xff] }
 0x29b   :  { %4243 = vmatpush1.bf16.msra.mxu0 %v5512_v0  ;;  %v5569_v0 = vcombine.high %v1011_v34, %v1015_v35  ;;  %v1064_v34 = vld [vmem:[#allocation8 + $0xa38] sm:$0xff] }
 0x29c   :  { %4407 = vmatpush1.bf16.msra.mxu1 %v5514_v12  ;;  %4244 = vmatprep.subr.bf16.mxu0 %v5521_v39  ;;  %v5571_v12 = vcombine.high %v1012_v38, %v1016_v40  ;;  %v1019_v39 = vld [vmem:[#allocation8 + $0x8d0] sm:$0xff] }
 0x29d   :  { %4408 = vmatprep.subr.bf16.mxu1 %v5523_v47  ;;  %v1023_v47 = vld [vmem:[#allocation8 + $0x8f0] sm:$0xff] }
 0x29e   :  { %v5577_v50 = vcombine.high %v1019_v39, %v1023_v47 }
 0x29f   :  { %4245 = vmatpush1.bf16.msra.mxu0 %v5520_v53  ;;  %v5579_v53 = vcombine.high %v1020_v48, %v1024_v49 }
 0x2a0   :  { %4409 = vmatpush1.bf16.msra.mxu1 %v5522_v55  ;;  %4246 = vmatprep.subr.bf16.mxu0 %v5529_v44  ;;  %v1027_v55 = vld [vmem:[#allocation8 + $0x910] sm:$0xff] }
 0x2a1   :  { %4410 = vmatprep.subr.bf16.mxu1 %v5531_v56  ;;  %v1031_v44 = vld [vmem:[#allocation8 + $0x930] sm:$0xff]  ;;  %v1028_v56 = vld [vmem:[#allocation8 + $0x918] sm:$0xff] }
 0x2a2   :  { %v5585_v59 = vcombine.high %v1027_v55, %v1031_v44  ;;  %v5587_v54 = vcombine.high %v1028_v56, %v1032_v57  ;;  %v5584_v3 = vcombine.low %v1027_v55, %v1031_v44  ;;  %v5586_v4 = vcombine.low %v1028_v56, %v1032_v57 }
 0x2a3   :  { %4247 = vmatpush1.bf16.msra.mxu0 %v5528_v61  ;;  %v1035_v61 = vld [vmem:[#allocation8 + $0x950] sm:$0xff] }
 0x2a4   :  { %4411 = vmatpush1.bf16.msra.mxu1 %v5530_v63  ;;  %4248 = vmatprep.subr.bf16.mxu0 %v5537_v1  ;;  %v1039_v63 = vld [vmem:[#allocation8 + $0x970] sm:$0xff]  ;;  %v1036_v1 = vld [vmem:[#allocation8 + $0x958] sm:$0xff] }
 0x2a5   :  { %4412 = vmatprep.subr.bf16.mxu1 %v5539_v2  ;;  %v1040_v2 = vld [vmem:[#allocation8 + $0x978] sm:$0xff]  ;;  %v5593_v5 = vcombine.high %v1035_v61, %v1039_v63  ;;  %v5592_v11 = vcombine.low %v1035_v61, %v1039_v63 }
 0x2a6   :  { %v5595_v17 = vcombine.high %v1036_v1, %v1040_v2  ;;  %v5594_v41 = vcombine.low %v1036_v1, %v1040_v2 }
 0x2a7   :  { %4249 = vmatpush1.bf16.msra.mxu0 %v5536_v7  ;;  %v1043_v7 = vld [vmem:[#allocation8 + $0x990] sm:$0xff] }
 0x2a8   :  { %4413 = vmatpush1.bf16.msra.mxu1 %v5538_v8  ;;  %4250 = vmatprep.subr.bf16.mxu0 %v5545_v9  ;;  %v1047_v8 = vld [vmem:[#allocation8 + $0x9b0] sm:$0xff]  ;;  %v1044_v9 = vld [vmem:[#allocation8 + $0x998] sm:$0xff] }
 0x2a9   :  { %4414 = vmatprep.subr.bf16.mxu1 %v5547_v10  ;;  %v1048_v10 = vld [vmem:[#allocation8 + $0x9b8] sm:$0xff]  ;;  %v5601_v20 = vcombine.high %v1043_v7, %v1047_v8  ;;  %v5600_v62 = vcombine.low %v1043_v7, %v1047_v8 }
 0x2aa   :  { %v5603_v23 = vcombine.high %v1044_v9, %v1048_v10  ;;  %v5602_v28 = vcombine.low %v1044_v9, %v1048_v10 }
 0x2ab   :  { %4251 = vmatpush1.bf16.msra.mxu0 %v5544_v24  ;;  %v1051_v24 = vld [vmem:[#allocation8 + $0x9d0] sm:$0xff] }
 0x2ac   :  { %4415 = vmatpush1.bf16.msra.mxu1 %v5546_v25  ;;  %4261 = vmatprep.subr.bf16.mxu0 %v5553_v26  ;;  %v1055_v25 = vld [vmem:[#allocation8 + $0x9f0] sm:$0xff]  ;;  %v1052_v26 = vld [vmem:[#allocation8 + $0x9d8] sm:$0xff] }
 0x2ad   :  { %4425 = vmatprep.subr.bf16.mxu1 %v5555_v27  ;;  %v1056_v27 = vld [vmem:[#allocation8 + $0x9f8] sm:$0xff]  ;;  %v5608_v35 = vcombine.low %v1051_v24, %v1055_v25 }
 0x2ae   :  { %4253 = vmatmul.mubr.bf16.vlgmr.msra.gmra.mrb[12].mxu0 %v6463_v51  ;;  %v5611_v6 = vcombine.high %v1052_v26, %v1056_v27 }
 0x2af   :  { %4417 = vmatmul.mubr.bf16.vlgmr.msra.gmra.mrb[12].mxu1 %v6463_v51  ;;  %4262 = vmatpush1.bf16.msra.mxu0 %v5552_v15  ;;  %v5570_v51 = vcombine.low %v1012_v38, %v1016_v40  ;;  %v5609_v15 = vcombine.high %v1051_v24, %v1055_v25 }
 0x2b0   :  { %4293 = vmatprep.mubr.bf16.mxu0 %v6467_v60  ;;  %4426 = vmatpush1.bf16.msra.mxu1 %v5554_v30  ;;  %v1063_v30 = vld [vmem:[#allocation8 + $0xa30] sm:$0xff] }
 0x2b1   :  { %4457 = vmatprep.mubr.bf16.mxu1 %v6467_v60  ;;  %4263 = vmatprep.subr.bf16.mxu0 %v5561_v31  ;;  %v5576_v60 = vcombine.low %v1019_v39, %v1023_v47  ;;  %v1060_v31 = vld [vmem:[#allocation8 + $0xa18] sm:$0xff]  ;;  %v5617_v38 = vcombine.high %v1059_v29, %v1063_v30  ;;  %v5616_v39 = vcombine.low %v1059_v29, %v1063_v30 }
 0x2b2   :  { %4427 = vmatprep.subr.bf16.mxu1 %v5563_v37  ;;  %v5610_v37 = vcombine.low %v1052_v26, %v1056_v27  ;;  %v5619_v40 = vcombine.high %v1060_v31, %v1064_v34  ;;  %v5618_v47 = vcombine.low %v1060_v31, %v1064_v34 }
 0x2b3   :  { %4264 = vmatpush1.bf16.msra.mxu0 %v5560_v42  ;;  %v1067_v42 = vld [vmem:[#allocation8 + $0xa50] sm:$0xff] }
 0x2b4   :  { %4428 = vmatpush1.bf16.msra.mxu1 %v5562_v43  ;;  %4265 = vmatprep.subr.bf16.mxu0 %v5569_v0  ;;  %v1071_v43 = vld [vmem:[#allocation8 + $0xa70] sm:$0xff]  ;;  %v1068_v0 = vld [vmem:[#allocation8 + $0xa58] sm:$0xff] }
 0x2b5   :  { %4429 = vmatprep.subr.bf16.mxu1 %v5571_v12  ;;  %v1072_v12 = vld [vmem:[#allocation8 + $0xa78] sm:$0xff]  ;;  %v5625_v48 = vcombine.high %v1067_v42, %v1071_v43  ;;  %v5624_v55 = vcombine.low %v1067_v42, %v1071_v43 }
 0x2b6   :  { %v5627_v49 = vcombine.high %v1068_v0, %v1072_v12  ;;  %v5626_v44 = vcombine.low %v1068_v0, %v1072_v12 }
 0x2b7   :  { %4266 = vmatpush1.bf16.msra.mxu0 %v5568_v21  ;;  %v1075_v21 = vld [vmem:[#allocation8 + $0xa90] sm:$0xff] }
 0x2b8   :  { %4430 = vmatpush1.bf16.msra.mxu1 %v5570_v51  ;;  %4267 = vmatprep.subr.bf16.mxu0 %v5577_v50  ;;  %v1079_v51 = vld [vmem:[#allocation8 + $0xab0] sm:$0xff]  ;;  %v1076_v50 = vld [vmem:[#allocation8 + $0xa98] sm:$0xff] }
 0x2b9   :  { %4431 = vmatprep.subr.bf16.mxu1 %v5579_v53  ;;  %v1080_v53 = vld [vmem:[#allocation8 + $0xab8] sm:$0xff]  ;;  %v5633_v56 = vcombine.high %v1075_v21, %v1079_v51  ;;  %v5632_v61 = vcombine.low %v1075_v21, %v1079_v51 }
 0x2ba   :  { %v5635_v57 = vcombine.high %v1076_v50, %v1080_v53  ;;  %v5634_v63 = vcombine.low %v1076_v50, %v1080_v53 }
 0x2bb   :  { %4268 = vmatpush1.bf16.msra.mxu0 %v5576_v60  ;;  %v1083_v60 = vld [vmem:[#allocation8 + $0xad0] sm:$0xff] }
 0x2bc   :  { %4432 = vmatpush1.bf16.msra.mxu1 %v5578_v58  ;;  %4269 = vmatprep.subr.bf16.mxu0 %v5585_v59  ;;  %v1087_v58 = vld [vmem:[#allocation8 + $0xaf0] sm:$0xff]  ;;  %v1084_v59 = vld [vmem:[#allocation8 + $0xad8] sm:$0xff] }
 0x2bd   :  { %4433 = vmatprep.subr.bf16.mxu1 %v5587_v54  ;;  %v1088_v54 = vld [vmem:[#allocation8 + $0xaf8] sm:$0xff]  ;;  %v5641_v1 = vcombine.high %v1083_v60, %v1087_v58  ;;  %v5640_v7 = vcombine.low %v1083_v60, %v1087_v58 }
 0x2be   :  { %v5643_v2 = vcombine.high %v1084_v59, %v1088_v54  ;;  %v5642_v8 = vcombine.low %v1084_v59, %v1088_v54  ;;  %v1136_v60 = vld [vmem:[#allocation8 + $0xc78] sm:$0xff]  ;;  %v1139_v54 = vld [vmem:[#allocation8 + $0xc90] sm:$0xff] }
 0x2bf   :  { %4270 = vmatpush1.bf16.msra.mxu0 %v5584_v3  ;;  %v1091_v3 = vld [vmem:[#allocation8 + $0xb10] sm:$0xff] }
 0x2c0   :  { %4434 = vmatpush1.bf16.msra.mxu1 %v5586_v4  ;;  %4271 = vmatprep.subr.bf16.mxu0 %v5593_v5  ;;  %v1095_v4 = vld [vmem:[#allocation8 + $0xb30] sm:$0xff]  ;;  %v1092_v5 = vld [vmem:[#allocation8 + $0xb18] sm:$0xff] }
 0x2c1   :  { %4435 = vmatprep.subr.bf16.mxu1 %v5595_v17  ;;  %v1096_v17 = vld [vmem:[#allocation8 + $0xb38] sm:$0xff]  ;;  %v5649_v9 = vcombine.high %v1091_v3, %v1095_v4  ;;  %v5648_v24 = vcombine.low %v1091_v3, %v1095_v4 }
 0x2c2   :  { %v5651_v10 = vcombine.high %v1092_v5, %v1096_v17  ;;  %v5650_v25 = vcombine.low %v1092_v5, %v1096_v17 }
 0x2c3   :  { %4272 = vmatpush1.bf16.msra.mxu0 %v5592_v11  ;;  %v1099_v11 = vld [vmem:[#allocation8 + $0xb50] sm:$0xff] }
 0x2c4   :  { %4436 = vmatpush1.bf16.msra.mxu1 %v5594_v41  ;;  %4273 = vmatprep.subr.bf16.mxu0 %v5601_v20  ;;  %v1103_v41 = vld [vmem:[#allocation8 + $0xb70] sm:$0xff]  ;;  %v1100_v20 = vld [vmem:[#allocation8 + $0xb58] sm:$0xff] }
 0x2c5   :  { %4437 = vmatprep.subr.bf16.mxu1 %v5603_v23  ;;  %v1104_v23 = vld [vmem:[#allocation8 + $0xb78] sm:$0xff]  ;;  %v5657_v26 = vcombine.high %v1099_v11, %v1103_v41  ;;  %v5656_v29 = vcombine.low %v1099_v11, %v1103_v41 }
 0x2c6   :  { %v5659_v27 = vcombine.high %v1100_v20, %v1104_v23  ;;  %v5658_v30 = vcombine.low %v1100_v20, %v1104_v23  ;;  %v1155_v23 = vld [vmem:[#allocation8 + $0xd10] sm:$0xff] }
 0x2c7   :  { %4274 = vmatpush1.bf16.msra.mxu0 %v5600_v62  ;;  %v1107_v62 = vld [vmem:[#allocation8 + $0xb90] sm:$0xff] }
 0x2c8   :  { %4438 = vmatpush1.bf16.msra.mxu1 %v5602_v28  ;;  %4275 = vmatprep.subr.bf16.mxu0 %v5609_v15  ;;  %v1111_v28 = vld [vmem:[#allocation8 + $0xbb0] sm:$0xff]  ;;  %v1108_v15 = vld [vmem:[#allocation8 + $0xb98] sm:$0xff] }
 0x2c9   :  { %4439 = vmatprep.subr.bf16.mxu1 %v5611_v6  ;;  %v1112_v6 = vld [vmem:[#allocation8 + $0xbb8] sm:$0xff]  ;;  %v5665_v31 = vcombine.high %v1107_v62, %v1111_v28  ;;  %v5664_v42 = vcombine.low %v1107_v62, %v1111_v28 }
 0x2ca   :  { %v5667_v34 = vcombine.high %v1108_v15, %v1112_v6  ;;  %v5666_v43 = vcombine.low %v1108_v15, %v1112_v6  ;;  %v1163_v15 = vld [vmem:[#allocation8 + $0xd50] sm:$0xff] }
 0x2cb   :  { %4276 = vmatpush1.bf16.msra.mxu0 %v5608_v35  ;;  %v1115_v35 = vld [vmem:[#allocation8 + $0xbd0] sm:$0xff] }
 0x2cc   :  { %4440 = vmatpush1.bf16.msra.mxu1 %v5610_v37  ;;  %4277 = vmatprep.subr.bf16.mxu0 %v5617_v38  ;;  %v1119_v37 = vld [vmem:[#allocation8 + $0xbf0] sm:$0xff]  ;;  %v1116_v38 = vld [vmem:[#allocation8 + $0xbd8] sm:$0xff] }
 0x2cd   :  { %4441 = vmatprep.subr.bf16.mxu1 %v5619_v40  ;;  %v1120_v40 = vld [vmem:[#allocation8 + $0xbf8] sm:$0xff]  ;;  %v5673_v0 = vcombine.high %v1115_v35, %v1119_v37  ;;  %v5672_v21 = vcombine.low %v1115_v35, %v1119_v37  ;;  %v1167_v6 = vld [vmem:[#allocation8 + $0xd70] sm:$0xff] }
 0x2ce   :  { %v5675_v12 = vcombine.high %v1116_v38, %v1120_v40  ;;  %v5674_v51 = vcombine.low %v1116_v38, %v1120_v40  ;;  %v5721_v35 = vcombine.high %v1163_v15, %v1167_v6  ;;  %v1171_v38 = vld [vmem:[#allocation8 + $0xd90] sm:$0xff] }
 0x2cf   :  { %4278 = vmatpush1.bf16.msra.mxu0 %v5616_v39  ;;  %v1123_v39 = vld [vmem:[#allocation8 + $0xc10] sm:$0xff] }
 0x2d0   :  { %4442 = vmatpush1.bf16.msra.mxu1 %v5618_v47  ;;  %4279 = vmatprep.subr.bf16.mxu0 %v5625_v48  ;;  %v1127_v47 = vld [vmem:[#allocation8 + $0xc30] sm:$0xff]  ;;  %v1124_v48 = vld [vmem:[#allocation8 + $0xc18] sm:$0xff] }
 0x2d1   :  { %4443 = vmatprep.subr.bf16.mxu1 %v5627_v49  ;;  %v1128_v49 = vld [vmem:[#allocation8 + $0xc38] sm:$0xff]  ;;  %v5681_v50 = vcombine.high %v1123_v39, %v1127_v47  ;;  %v1175_v40 = vld [vmem:[#allocation8 + $0xdb0] sm:$0xff] }
 0x2d2   :  { %v5683_v53 = vcombine.high %v1124_v48, %v1128_v49  ;;  %v5682_v58 = vcombine.low %v1124_v48, %v1128_v49 }
 0x2d3   :  { %4280 = vmatpush1.bf16.msra.mxu0 %v5624_v55  ;;  %v1131_v55 = vld [vmem:[#allocation8 + $0xc50] sm:$0xff] }
 0x2d4   :  { %4444 = vmatpush1.bf16.msra.mxu1 %v5626_v44  ;;  %4281 = vmatprep.subr.bf16.mxu0 %v5633_v56  ;;  %v1135_v44 = vld [vmem:[#allocation8 + $0xc70] sm:$0xff]  ;;  %v5680_v56 = vcombine.low %v1123_v39, %v1127_v47  ;;  %v5729_v39 = vcombine.high %v1171_v38, %v1175_v40 }
 0x2d5   :  { %4445 = vmatprep.subr.bf16.mxu1 %v5635_v57  ;;  %v1132_v57 = vld [vmem:[#allocation8 + $0xc58] sm:$0xff]  ;;  %v5689_v59 = vcombine.high %v1131_v55, %v1135_v44  ;;  %v5688_v3 = vcombine.low %v1131_v55, %v1135_v44 }
 0x2d6   :  { %v5690_v4 = vcombine.low %v1132_v57, %v1136_v60  ;;  %v1180_v55 = vld [vmem:[#allocation8 + $0xdd8] sm:$0xff] }
 0x2d7   :  { %4282 = vmatpush1.bf16.msra.mxu0 %v5632_v61  ;;  %v1143_v61 = vld [vmem:[#allocation8 + $0xcb0] sm:$0xff]  ;;  %v1184_v44 = vld [vmem:[#allocation8 + $0xdf8] sm:$0xff] }
 0x2d8   :  { %4446 = vmatpush1.bf16.msra.mxu1 %v5634_v63  ;;  %4283 = vmatprep.subr.bf16.mxu0 %v5641_v1  ;;  %v5691_v63 = vcombine.high %v1132_v57, %v1136_v60  ;;  %v1140_v1 = vld [vmem:[#allocation8 + $0xc98] sm:$0xff]  ;;  %v5697_v5 = vcombine.high %v1139_v54, %v1143_v61  ;;  %v5696_v11 = vcombine.low %v1139_v54, %v1143_v61 }
 0x2d9   :  { %4447 = vmatprep.subr.bf16.mxu1 %v5643_v2  ;;  %v1144_v2 = vld [vmem:[#allocation8 + $0xcb8] sm:$0xff]  ;;  %v5728_v60 = vcombine.low %v1171_v38, %v1175_v40 }
 0x2da   :  { %v5699_v17 = vcombine.high %v1140_v1, %v1144_v2 }
 0x2db   :  { %4284 = vmatpush1.bf16.msra.mxu0 %v5640_v7  ;;  %v1147_v7 = vld [vmem:[#allocation8 + $0xcd0] sm:$0xff] }
 0x2dc   :  { %4448 = vmatpush1.bf16.msra.mxu1 %v5642_v8  ;;  %4285 = vmatprep.subr.bf16.mxu0 %v5649_v9  ;;  %v1151_v8 = vld [vmem:[#allocation8 + $0xcf0] sm:$0xff]  ;;  %v1148_v9 = vld [vmem:[#allocation8 + $0xcd8] sm:$0xff] }
 0x2dd   :  { %4449 = vmatprep.subr.bf16.mxu1 %v5651_v10  ;;  %v1152_v10 = vld [vmem:[#allocation8 + $0xcf8] sm:$0xff]  ;;  %v5705_v41 = vcombine.high %v1147_v7, %v1151_v8 }
 0x2de   :  { %v5707_v20 = vcombine.high %v1148_v9, %v1152_v10 }
 0x2df   :  { %4286 = vmatpush1.bf16.msra.mxu0 %v5648_v24  ;;  %v1159_v24 = vld [vmem:[#allocation8 + $0xd30] sm:$0xff] }
 0x2e0   :  { %4450 = vmatpush1.bf16.msra.mxu1 %v5650_v25  ;;  %4287 = vmatprep.subr.bf16.mxu0 %v5657_v26  ;;  %v1156_v25 = vld [vmem:[#allocation8 + $0xd18] sm:$0xff]  ;;  %v5713_v62 = vcombine.high %v1155_v23, %v1159_v24 }
 0x2e1   :  { %4451 = vmatprep.subr.bf16.mxu1 %v5659_v27  ;;  %v1160_v26 = vld [vmem:[#allocation8 + $0xd38] sm:$0xff]  ;;  %v5706_v27 = vcombine.low %v1148_v9, %v1152_v10  ;;  %v1195_v9 = vld [vmem:[#allocation8 + $0xe50] sm:$0xff] }
 0x2e2   :  { %v5715_v28 = vcombine.high %v1156_v25, %v1160_v26  ;;  %v1199_v10 = vld [vmem:[#allocation8 + $0xe70] sm:$0xff] }
 0x2e3   :  { %4288 = vmatpush1.bf16.msra.mxu0 %v5656_v29  ;;  %v1164_v29 = vld [vmem:[#allocation8 + $0xd58] sm:$0xff] }
 0x2e4   :  { %4452 = vmatpush1.bf16.msra.mxu1 %v5658_v30  ;;  %4289 = vmatprep.subr.bf16.mxu0 %v5665_v31  ;;  %v1168_v30 = vld [vmem:[#allocation8 + $0xd78] sm:$0xff]  ;;  %v5712_v31 = vcombine.low %v1155_v23, %v1159_v24  ;;  %v5753_v23 = vcombine.high %v1195_v9, %v1199_v10 }
 0x2e5   :  { %4453 = vmatprep.subr.bf16.mxu1 %v5667_v34  ;;  %v5714_v34 = vcombine.low %v1156_v25, %v1160_v26  ;;  %v5723_v37 = vcombine.high %v1164_v29, %v1168_v30  ;;  %v1203_v25 = vld [vmem:[#allocation8 + $0xe90] sm:$0xff] }
 0x2e6   :  { %v1207_v26 = vld [vmem:[#allocation8 + $0xeb0] sm:$0xff] }
 0x2e7   :  { %4290 = vmatpush1.bf16.msra.mxu0 %v5664_v42  ;;  %v1172_v42 = vld [vmem:[#allocation8 + $0xd98] sm:$0xff] }
 0x2e8   :  { %4454 = vmatpush1.bf16.msra.mxu1 %v5666_v43  ;;  %4291 = vmatprep.subr.bf16.mxu0 %v5673_v0  ;;  %v1176_v43 = vld [vmem:[#allocation8 + $0xdb8] sm:$0xff]  ;;  %v5720_v0 = vcombine.low %v1163_v15, %v1167_v6  ;;  %v5761_v15 = vcombine.high %v1203_v25, %v1207_v26 }
 0x2e9   :  { %4455 = vmatprep.subr.bf16.mxu1 %v5675_v12  ;;  %v5722_v12 = vcombine.low %v1164_v29, %v1168_v30  ;;  %v5731_v49 = vcombine.high %v1172_v42, %v1176_v43  ;;  %v5730_v54 = vcombine.low %v1172_v42, %v1176_v43  ;;  %v1211_v29 = vld [vmem:[#allocation8 + $0xed0] sm:$0xff] }
 0x2ea   :  { %v1215_v30 = vld [vmem:[#allocation8 + $0xef0] sm:$0xff] }
 0x2eb   :  { %4292 = vmatpush1.bf16.msra.mxu0 %v5672_v21  ;;  %v1179_v21 = vld [vmem:[#allocation8 + $0xdd0] sm:$0xff]  ;;  %v5769_v38 = vcombine.high %v1211_v29, %v1215_v30 }
 0x2ec   :  { %4456 = vmatpush1.bf16.msra.mxu1 %v5674_v51  ;;  %4302 = vmatprep.subr.bf16.mxu0 %v5681_v50  ;;  %v1183_v51 = vld [vmem:[#allocation8 + $0xdf0] sm:$0xff] }
 0x2ed   :  { %4466 = vmatprep.subr.bf16.mxu1 %v5683_v53  ;;  %v5737_v61 = vcombine.high %v1179_v21, %v1183_v51  ;;  %v1219_v42 = vld [vmem:[#allocation8 + $0xf10] sm:$0xff] }
 0x2ee   :  { %4294 = vmatmul.mubr.bf16.vlgmr.msra.gmra.mrb[12].mxu0 %v6475_v36  ;;  %v1223_v43 = vld [vmem:[#allocation8 + $0xf30] sm:$0xff] }
 0x2ef   :  { %4458 = vmatmul.mubr.bf16.vlgmr.msra.gmra.mrb[12].mxu1 %v6475_v36  ;;  %4303 = vmatpush1.bf16.msra.mxu0 %v5680_v56  ;;  %v5698_v36 = vcombine.low %v1140_v1, %v1144_v2  ;;  %v1187_v1 = vld [vmem:[#allocation8 + $0xe10] sm:$0xff] }
 0x2f0   :  { %4334 = vmatprep.mubr.bf16.mxu0 %v6479_v45  ;;  %4467 = vmatpush1.bf16.msra.mxu1 %v5682_v58  ;;  %v1191_v2 = vld [vmem:[#allocation8 + $0xe30] sm:$0xff] }
 0x2f1   :  { %4498 = vmatprep.mubr.bf16.mxu1 %v6479_v45  ;;  %4304 = vmatprep.subr.bf16.mxu0 %v5689_v59  ;;  %v5704_v45 = vcombine.low %v1147_v7, %v1151_v8  ;;  %v5745_v7 = vcombine.high %v1187_v1, %v1191_v2 }
 0x2f2   :  { %4468 = vmatprep.subr.bf16.mxu1 %v5691_v63  ;;  %v5739_v63 = vcombine.high %v1180_v55, %v1184_v44 }
 0x2f3   :  { %4305 = vmatpush1.bf16.msra.mxu0 %v5688_v3  ;;  %v1188_v3 = vld [vmem:[#allocation8 + $0xe18] sm:$0xff] }
 0x2f4   :  { %4469 = vmatpush1.bf16.msra.mxu1 %v5690_v4  ;;  %4306 = vmatprep.subr.bf16.mxu0 %v5697_v5  ;;  %v1192_v4 = vld [vmem:[#allocation8 + $0xe38] sm:$0xff]  ;;  %v5736_v5 = vcombine.low %v1179_v21, %v1183_v51  ;;  %v5777_v21 = vcombine.high %v1219_v42, %v1223_v43 }
 0x2f5   :  { %4470 = vmatprep.subr.bf16.mxu1 %v5699_v17  ;;  %v5738_v17 = vcombine.low %v1180_v55, %v1184_v44  ;;  %v5747_v8 = vcombine.high %v1188_v3, %v1192_v4  ;;  %v1227_v55 = vld [vmem:[#allocation8 + $0xf50] sm:$0xff] }
 0x2f6   :  { %v1231_v44 = vld [vmem:[#allocation8 + $0xf70] sm:$0xff] }
 0x2f7   :  { %4307 = vmatpush1.bf16.msra.mxu0 %v5696_v11  ;;  %v1196_v11 = vld [vmem:[#allocation8 + $0xe58] sm:$0xff] }
 0x2f8   :  { %4471 = vmatpush1.bf16.msra.mxu1 %v5698_v36  ;;  %4308 = vmatprep.subr.bf16.mxu0 %v5705_v41  ;;  %v1200_v36 = vld [vmem:[#allocation8 + $0xe78] sm:$0xff]  ;;  %v5744_v41 = vcombine.low %v1187_v1, %v1191_v2  ;;  %v1239_v1 = vld [vmem:[#allocation8 + $0xfb0] sm:$0xff] }
 0x2f9   :  { %4472 = vmatprep.subr.bf16.mxu1 %v5707_v20  ;;  %v5746_v20 = vcombine.low %v1188_v3, %v1192_v4  ;;  %v5755_v24 = vcombine.high %v1196_v11, %v1200_v36  ;;  %v1236_v2 = vld [vmem:[#allocation8 + $0xf98] sm:$0xff] }
 0x2fa   :  { %v1240_v3 = vld [vmem:[#allocation8 + $0xfb8] sm:$0xff] }
 0x2fb   :  { %4309 = vmatpush1.bf16.msra.mxu0 %v5704_v45  ;;  %v1204_v45 = vld [vmem:[#allocation8 + $0xe98] sm:$0xff] }
 0x2fc   :  { %4473 = vmatpush1.bf16.msra.mxu1 %v5706_v27  ;;  %4310 = vmatprep.subr.bf16.mxu0 %v5713_v62  ;;  %v1208_v27 = vld [vmem:[#allocation8 + $0xeb8] sm:$0xff]  ;;  %v5752_v62 = vcombine.low %v1195_v9, %v1199_v10  ;;  %v5795_v9 = vcombine.high %v1236_v2, %v1240_v3  ;;  %v1243_v10 = vld [vmem:[#allocation8 + $0xfd0] sm:$0xff] }
 0x2fd   :  { %4474 = vmatprep.subr.bf16.mxu1 %v5715_v28  ;;  %v5754_v28 = vcombine.low %v1196_v11, %v1200_v36  ;;  %v5763_v6 = vcombine.high %v1204_v45, %v1208_v27  ;;  %v1247_v11 = vld [vmem:[#allocation8 + $0xff0] sm:$0xff]  ;;  %v1244_v36 = vld [vmem:[#allocation8 + $0xfd8] sm:$0xff] }
 0x2ff   :  { %4311 = vmatpush1.bf16.msra.mxu0 %v5712_v31  ;;  %v1212_v31 = vld [vmem:[#allocation8 + $0xed8] sm:$0xff] }
 0x300   :  { %4475 = vmatpush1.bf16.msra.mxu1 %v5714_v34  ;;  %4312 = vmatprep.subr.bf16.mxu0 %v5721_v35  ;;  %v1216_v34 = vld [vmem:[#allocation8 + $0xef8] sm:$0xff]  ;;  %v5760_v35 = vcombine.low %v1203_v25, %v1207_v26  ;;  %v5801_v25 = vcombine.high %v1243_v10, %v1247_v11 }
 0x301   :  { %v6505_v47 = vpop.f32.mrb[8].mxu0  ;;  %v6507_v48 = vpop.f32.mrb[8].mxu1  ;;  %4476 = vmatprep.subr.bf16.mxu1 %v5723_v37  ;;  %v5762_v37 = vcombine.low %v1204_v45, %v1208_v27  ;;  %v5771_v40 = vcombine.high %v1212_v31, %v1216_v34  ;;  %v5800_v27 = vcombine.low %v1243_v10, %v1247_v11  ;;  %v6057_v11 = vld [vmem:[#allocation11 + $0x1c0] sm:$0xff]  }
 0x302   :  { %v6509_v50 = vpop.f32.mrb[9].mxu0  ;;  %v6511_v53 = vpop.f32.mrb[9].mxu1 }
 0x303   :  { %v4012_v56 = vpop.f32.mrb[10].mxu0  ;;  %v4176_v57 = vpop.f32.mrb[10].mxu1  ;;  %4313 = vmatpush1.bf16.msra.mxu0 %v5720_v0  ;;  %v1220_v0 = vld [vmem:[#allocation8 + $0xf18] sm:$0xff] }
 0x304   :  { %4477 = vmatpush1.bf16.msra.mxu1 %v5722_v12  ;;  %v4013_v58 = vpop.f32.mrb[11].mxu0  ;;  %v4177_v59 = vpop.f32.mrb[11].mxu1  ;;  %4314 = vmatprep.subr.bf16.mxu0 %v5729_v39  ;;  %v1224_v12 = vld [vmem:[#allocation8 + $0xf38] sm:$0xff]  ;;  %v5768_v39 = vcombine.low %v1211_v29, %v1215_v30  ;;  %v6027_v29 = vld [vmem:[#allocation11 + $0x80] sm:$0xff]  }
 0x305   :  { %4478 = vmatprep.subr.bf16.mxu1 %v5731_v49  ;;  %v5770_v49 = vcombine.low %v1212_v31, %v1216_v34  ;;  %v5779_v51 = vcombine.high %v1220_v0, %v1224_v12  ;;  %v1228_v56 = vld [vmem:[#allocation8 + $0xf58] sm:$0xff]  ;;  %v6513_v58 = vld [vmem:[#allocation9] sm:$0xff]  ;;  %v5778_v59 = vcombine.low %v1220_v0, %v1224_v12  ;;  %v6028_v31 = vld [vmem:[#allocation11 + $0x48] sm:$0xff]  }
 0x306   :  { %v1232_v57 = vld [vmem:[#allocation8 + $0xf78] sm:$0xff]  ;;  %v1258_v4 = vrot.slane %v6513_v58, %v186_v16 }
 0x307   :  { %4315 = vmatpush1.bf16.msra.mxu0 %v5728_v60  ;;  %v5776_v60 = vcombine.low %v1219_v42, %v1223_v43  ;;  %v6032_v42 = vld [vmem:[#allocation11 + $0x50] sm:$0xff]  }
 0x308   :  { %4479 = vmatpush1.bf16.msra.mxu1 %v5730_v54  ;;  %4316 = vmatprep.subr.bf16.mxu0 %v5737_v61  ;;  %v5785_v54 = vcombine.high %v1227_v55, %v1231_v44  ;;  %v5787_v61 = vcombine.high %v1228_v56, %v1232_v57  ;;  %v6033_v43 = vld [vmem:[#allocation11 + $0xd0] sm:$0xff]  }
 0x309   :  { %4480 = vmatprep.subr.bf16.mxu1 %v5739_v63  ;;  %v1235_v63 = vld [vmem:[#allocation8 + $0xf90] sm:$0xff]  ;;  %v6034_v0 = vld [vmem:[#allocation11 + $0x10] sm:$0xff]  }
 0x30a   :  { %v5792_v16 = vcombine.low %v1235_v63, %v1239_v1  ;;  %v6035_v12 = vld [vmem:[#allocation11 + $0x90] sm:$0xff]  }
 0x30b   :  { %4317 = vmatpush1.bf16.msra.mxu0 %v5736_v5  ;;  %v5784_v5 = vcombine.low %v1227_v55, %v1231_v44  ;;  %v6041_v55 = vld [vmem:[#allocation11 + $0xe0] sm:$0xff]  }
 0x30c   :  { %4481 = vmatpush1.bf16.msra.mxu1 %v5738_v17  ;;  %4318 = vmatprep.subr.bf16.mxu0 %v5745_v7  ;;  %v1266_v17 = vrot.slane %v6513_v58, %v194_v22  ;;  %v5786_v7 = vcombine.low %v1228_v56, %v1232_v57  ;;  %v6042_v44 = vld [vmem:[#allocation11 + $0x20] sm:$0xff]   ;;  %v6044_v57 = vld [vmem:[#allocation11 + $0x68] sm:$0xff]  }
 0x30d   :  { %4482 = vmatprep.subr.bf16.mxu1 %v5747_v8  ;;  %v5793_v8 = vcombine.high %v1235_v63, %v1239_v1  ;;  %v6043_v56 = vld [vmem:[#allocation11 + $0xa0] sm:$0xff]   ;;  %v6047_v63 = vld [vmem:[#allocation11 + $0xa8] sm:$0xff]   ;;  %v6048_v1 = vld [vmem:[#allocation11 + $0x70] sm:$0xff]  }
 0x30e   :  { %v5960_v22 = vadd.f32 %v6511_v53, %v1266_v17  ;;  %v6025_v53 = vld [vmem:[#allocation11 + $0xc0] sm:$0xff]   ;;  %v6052_v17 = vld [vmem:[#allocation11 + $0x78] sm:$0xff]  }
 0x30f   :  { %4319 = vmatpush1.bf16.msra.mxu0 %v5744_v41  ;;  %v1248_v41 = vld [vmem:[#allocation8 + $0xff8] sm:$0xff] }
 0x310   :  { %4483 = vmatpush1.bf16.msra.mxu1 %v5746_v20  ;;  %4320 = vmatprep.subr.bf16.mxu0 %v5753_v23  ;;  %v5958_v20 = vadd.f32 %v6509_v50, %v1258_v4  ;;  %v6525_v23 = vstv %s6567_s6  ;;  %v5803_v26 = vcombine.high %v1244_v36, %v1248_v41  ;;  %vm4510_vm9 = vcmp.gt.f32.partialorder %v5960_v22, 0.0 }
 0x311   :  { %4484 = vmatprep.subr.bf16.mxu1 %v5755_v24  ;;  %v5794_v24 = vcombine.low %v1236_v2, %v1240_v3  ;;  %v4519_v50 = vmul.f32 %v5960_v22, %v6525_v23  ;;  %v6049_v3 = vld [vmem:[#allocation11 + $0xf0] sm:$0xff]  }
 0x312   :  { %v4517_v45 = vmul.f32 %v5958_v20, %v6525_v23  ;;  %vm4508_vm8 = vcmp.gt.f32.partialorder %v5958_v20, 0.0 }
 0x313   :  { %4321 = vmatpush1.bf16.msra.mxu0 %v5752_v62  ;;  %v5802_v62 = vcombine.low %v1244_v36, %v1248_v41  ;;  %v4527_v30 = vsel %vm4510_vm9, %v5960_v22, %v4519_v50  ;;  %v6058_v41 = vld [vmem:[#allocation11 + $0x100] sm:$0xff]   ;;  %v6060_v22 = vld [vmem:[#allocation11 + $0x148] sm:$0xff]   ;;  %v6065_v50 = vld [vmem:[#allocation11 + $0x1d0] sm:$0xff]  }
 0x314   :  { %4485 = vmatpush1.bf16.msra.mxu1 %v5754_v28  ;;  %4322 = vmatprep.subr.bf16.mxu0 %v5761_v15  ;;  %v6024_v28 = vld [vmem:[#allocation11 + $0x40] sm:$0xff]  }
 0x315   :  { %4486 = vmatprep.subr.bf16.mxu1 %v5763_v6  ;;  %v6026_v15 = vld [vmem:[#allocation11] sm:$0xff]   ;;  %v4525_v6 = vsel %vm4508_vm8, %v5958_v20, %v4517_v45  ;;  %v6063_v45 = vld [vmem:[#allocation11 + $0x188] sm:$0xff]  }
 0x316   :  { %v4533_v34 = vpack.c.bf16 %v4525_v6, %v4525_v6  ;;  %v6070_v6 = vld [vmem:[#allocation11 + $0x118] sm:$0xff]  }
 0x317   :  { %4323 = vmatpush1.bf16.msra.mxu0 %v5760_v35  ;;  %v6029_v35 = vld [vmem:[#allocation11 + $0xc8] sm:$0xff]  }
 0x318   :  { %4487 = vmatpush1.bf16.msra.mxu1 %v5762_v37  ;;  %4324 = vmatprep.subr.bf16.mxu0 %v5769_v38  ;;  %v4535_v37 = vpack.c.bf16 %v4527_v30, %v4527_v30  ;;  %v6030_v38 = vld [vmem:[#allocation11 + $0x8] sm:$0xff]   ;;  %v6072_v30 = vld [vmem:[#allocation11 + $0x160] sm:$0xff]  }
 0x319   :  { %4488 = vmatprep.subr.bf16.mxu1 %v5771_v40  ;;  %v6031_v40 = vld [vmem:[#allocation11 + $0x88] sm:$0xff]  }
 0x31b   :  { %4325 = vmatpush1.bf16.msra.mxu0 %v5768_v39  ;;  %v6036_v39 = vld [vmem:[#allocation11 + $0x58] sm:$0xff]  }
 0x31c   :  { %4489 = vmatpush1.bf16.msra.mxu1 %v5770_v49  ;;  %4326 = vmatprep.subr.bf16.mxu0 %v5777_v21  ;;  %v6037_v49 = vld [vmem:[#allocation11 + $0xd8] sm:$0xff]  }
 0x31d   :  { %4490 = vmatprep.subr.bf16.mxu1 %v5779_v51  ;;  %v6039_v21 = vld [vmem:[#allocation11 + $0x98] sm:$0xff]   ;;  %v6040_v51 = vld [vmem:[#allocation11 + $0x60] sm:$0xff]  }
 0x31f   :  { %4327 = vmatpush1.bf16.msra.mxu0 %v5776_v60  ;;  %v1254_v60 = vrot.slane %v6513_v58, %v182_v14  ;;  %v6050_v14 = vld [vmem:[#allocation11 + $0x30] sm:$0xff]  }
 0x320   :  { %4491 = vmatpush1.bf16.msra.mxu1 %v5778_v59  ;;  %4328 = vmatprep.subr.bf16.mxu0 %v5785_v54  ;;  %v6045_v59 = vld [vmem:[#allocation11 + $0xe8] sm:$0xff]   ;;  %v1262_v54 = vrot.slane %v6513_v58, %v190_v19 }
 0x321   :  { %4492 = vmatprep.subr.bf16.mxu1 %v5787_v61  ;;  %v6046_v61 = vld [vmem:[#allocation11 + $0x28] sm:$0xff]   ;;  %v5957_v2 = vadd.f32 %v6505_v47, %v1254_v60  ;;  %v6054_v47 = vld [vmem:[#allocation11 + $0x38] sm:$0xff]  }
 0x322   :  { %v5959_v4 = vadd.f32 %v6507_v48, %v1262_v54  ;;  %v6056_v48 = vld [vmem:[#allocation11 + $0x140] sm:$0xff]  }
 0x323   :  { %4329 = vmatpush1.bf16.msra.mxu0 %v5784_v5  ;;  %v6051_v5 = vld [vmem:[#allocation11 + $0xb0] sm:$0xff]   ;;  %v4516_v19 = vmul.f32 %v5957_v2, %v6525_v23  ;;  %vm4507_vm10 = vcmp.gt.f32.partialorder %v5957_v2, 0.0 }
 0x324   :  { %4493 = vmatpush1.bf16.msra.mxu1 %v5786_v7  ;;  %4330 = vmatprep.subr.bf16.mxu0 %v5793_v8  ;;  %v6053_v7 = vld [vmem:[#allocation11 + $0xf8] sm:$0xff]   ;;  %v4518_v8 = vmul.f32 %v5959_v4, %v6525_v23  ;;  %vm4509_vm11 = vcmp.gt.f32.partialorder %v5959_v4, 0.0 }
 0x325   :  { %4494 = vmatprep.subr.bf16.mxu1 %v5795_v9  ;;  %v6055_v9 = vld [vmem:[#allocation11 + $0xb8] sm:$0xff]   ;;  %v4524_v10 = vsel %vm4507_vm10, %v5957_v2, %v4516_v19 }
 0x326   :  { %v4526_v36 = vsel %vm4509_vm11, %v5959_v4, %v4518_v8  ;;  %v4532_v20 = vpack.c.bf16 %v4524_v10, %v4524_v10 }
 0x327   :  { %4331 = vmatpush1.bf16.msra.mxu0 %v5792_v16  ;;  %v6059_v16 = vld [vmem:[#allocation11 + $0x180] sm:$0xff]  }
 0x328   :  { %4495 = vmatpush1.bf16.msra.mxu1 %v5794_v24  ;;  %4332 = vmatprep.subr.bf16.mxu0 %v5801_v25  ;;  %v4534_v24 = vpack.c.bf16 %v4526_v36, %v4526_v36  ;;  %v6061_v25 = vld [vmem:[#allocation11 + $0x1c8] sm:$0xff]   ;;  %v5804_v36 = vld [vmem:[#allocation12] ss:$0 sm:$0xff] }
 0x329   :  { %4496 = vmatprep.subr.bf16.mxu1 %v5803_v26  ;;  %v6062_v26 = vld [vmem:[#allocation11 + $0x108] sm:$0xff]  }
 0x32b   :  { %4333 = vmatpush1.bf16.msra.mxu0 %v5800_v27  ;;  %v6064_v27 = vld [vmem:[#allocation11 + $0x150] sm:$0xff]  }
 0x32c   :  { %4497 = vmatpush1.bf16.msra.mxu1 %v5802_v62  ;;  %5869 = vmatprep.subr.bf16.mxu0 %v6024_v28  ;;  %v6066_v62 = vld [vmem:[#allocation11 + $0x110] sm:$0xff]  }
 0x32d   :  { %5891 = vmatprep.subr.bf16.mxu1 %v6025_v53  ;;  %v6067_v28 = vld [vmem:[#allocation11 + $0x190] sm:$0xff]   ;;  %v6068_v53 = vld [vmem:[#allocation11 + $0x158] sm:$0xff]  }
 0x32e   :  { %4335 = vmatmul.mubr.bf16.vlgmr.msra.gmra.mrb[12].mxu0 %v6487_v18 }
 0x32f   :  { %4499 = vmatmul.mubr.bf16.vlgmr.msra.gmra.mrb[12].mxu1 %v6487_v18  ;;  %5870 = vmatpush3.bf16.msra.mxu0 %v6026_v15  ;;  %v6038_v18 = vld [vmem:[#allocation11 + $0x18] sm:$0xff]  }
 0x330   :  { %5091 = vmatprep.mubr.bf16.mxu0 %v4533_v34  ;;  %5892 = vmatpush3.bf16.msra.mxu1 %v6027_v29  ;;  %v6069_v15 = vld [vmem:[#allocation11 + $0x1d8] sm:$0xff]   ;;  %v6074_v34 = vld [vmem:[#allocation11 + $0x120] sm:$0xff]  }
 0x331   :  { %5131 = vmatprep.mubr.bf16.mxu1 %v4535_v37  ;;  %5871 = vmatprep.subr.bf16.mxu0 %v6028_v31  ;;  %v6071_v29 = vld [vmem:[#allocation11 + $0x198] sm:$0xff]   ;;  %v6073_v31 = vld [vmem:[#allocation11 + $0x1e0] sm:$0xff]   ;;  %v6076_v37 = vld [vmem:[#allocation11 + $0x168] sm:$0xff]  }
 0x332   :  { %5893 = vmatprep.subr.bf16.mxu1 %v6029_v35  ;;  %v6075_v35 = vld [vmem:[#allocation11 + $0x1a0] sm:$0xff]  }
 0x333   :  { %5872 = vmatpush3.bf16.msra.mxu0 %v6030_v38  ;;  %v6077_v38 = vld [vmem:[#allocation11 + $0x1e8] sm:$0xff]  }
 0x334   :  { %5894 = vmatpush3.bf16.msra.mxu1 %v6031_v40  ;;  %5873 = vmatprep.subr.bf16.mxu0 %v6032_v42  ;;  %v6078_v40 = vld [vmem:[#allocation11 + $0x128] sm:$0xff]  }
 0x335   :  { %5895 = vmatprep.subr.bf16.mxu1 %v6033_v43  ;;  %v6079_v42 = vld [vmem:[#allocation11 + $0x1a8] sm:$0xff]   ;;  %v6080_v43 = vld [vmem:[#allocation11 + $0x170] sm:$0xff]  }
 0x337   :  { %5874 = vmatpush3.bf16.msra.mxu0 %v6034_v0  ;;  %v6081_v0 = vld [vmem:[#allocation11 + $0x1f0] sm:$0xff]  }
 0x338   :  { %5896 = vmatpush3.bf16.msra.mxu1 %v6035_v12  ;;  %5875 = vmatprep.subr.bf16.mxu0 %v6036_v39  ;;  %v6082_v12 = vld [vmem:[#allocation11 + $0x130] sm:$0xff]  }
 0x339   :  { %5897 = vmatprep.subr.bf16.mxu1 %v6037_v49  ;;  %v6083_v39 = vld [vmem:[#allocation11 + $0x1b0] sm:$0xff]   ;;  %v6084_v49 = vld [vmem:[#allocation11 + $0x178] sm:$0xff]  }
 0x33b   :  { %5876 = vmatpush3.bf16.msra.mxu0 %v6038_v18  ;;  %v6085_v18 = vld [vmem:[#allocation11 + $0x1f8] sm:$0xff]  }
 0x33c   :  { %5898 = vmatpush3.bf16.msra.mxu1 %v6039_v21  ;;  %5877 = vmatprep.subr.bf16.mxu0 %v6040_v51  ;;  %v6086_v21 = vld [vmem:[#allocation11 + $0x138] sm:$0xff]  }
 0x33d   :  { %5899 = vmatprep.subr.bf16.mxu1 %v6041_v55  ;;  %v6087_v51 = vld [vmem:[#allocation11 + $0x1b8] sm:$0xff]   ;;  %v1270_v55 = vrot.slane %v6513_v58, %v198_v32 }
 0x33f   :  { %5878 = vmatpush3.bf16.msra.mxu0 %v6042_v44  ;;  %v1278_v44 = vrot.slane %v6513_v58, %v206_v46 }
 0x340   :  { %5900 = vmatpush3.bf16.msra.mxu1 %v6043_v56  ;;  %5879 = vmatprep.subr.bf16.mxu0 %v6044_v57  ;;  %v1274_v56 = vrot.slane %v6513_v58, %v202_v33  ;;  %v1282_v57 = vrot.slane %v6513_v58, %v210_v52 }
 0x341   :  { %5901 = vmatprep.subr.bf16.mxu1 %v6045_v59 }
 0x343   :  { %5880 = vmatpush3.bf16.msra.mxu0 %v6046_v61 }
 0x344   :  { %5902 = vmatpush3.bf16.msra.mxu1 %v6047_v63  ;;  %5881 = vmatprep.subr.bf16.mxu0 %v6048_v1 }
 0x345   :  { %5903 = vmatprep.subr.bf16.mxu1 %v6049_v3 }
 0x347   :  { %5882 = vmatpush3.bf16.msra.mxu0 %v6050_v14 }
 0x348   :  { %5904 = vmatpush3.bf16.msra.mxu1 %v6051_v5  ;;  %5883 = vmatprep.subr.bf16.mxu0 %v6052_v17 }
 0x349   :  { %5905 = vmatprep.subr.bf16.mxu1 %v6053_v7 }
 0x34b   :  { %5884 = vmatpush3.bf16.msra.mxu0 %v6054_v47 }
 0x34c   :  { %5906 = vmatpush3.bf16.msra.mxu1 %v6055_v9  ;;  %5913 = vmatprep.subr.bf16.mxu0 %v6056_v48 }
 0x34d   :  { %5935 = vmatprep.subr.bf16.mxu1 %v6057_v11 }
 0x34e   :  { %5092 = vmatmul.mubr.bf16.vlgmr.msra.gmra.mrb[16].mxu0 %v4532_v20 }
 0x34f   :  { %5132 = vmatmul.mubr.bf16.vlgmr.msra.gmra.mrb[16].mxu1 %v4534_v24  ;;  %5914 = vmatpush3.bf16.msra.mxu0 %v6058_v41 }
 0x350   :  { %5936 = vmatpush3.bf16.msra.mxu1 %v6059_v16  ;;  %5915 = vmatprep.subr.bf16.mxu0 %v6060_v22 }
 0x351   :  { %5937 = vmatprep.subr.bf16.mxu1 %v6061_v25 }
 0x353   :  { %5916 = vmatpush3.bf16.msra.mxu0 %v6062_v26 }
 0x354   :  { %5938 = vmatpush3.bf16.msra.mxu1 %v6063_v45  ;;  %5917 = vmatprep.subr.bf16.mxu0 %v6064_v27 }
 0x355   :  { %5939 = vmatprep.subr.bf16.mxu1 %v6065_v50 }
 0x357   :  { %5918 = vmatpush3.bf16.msra.mxu0 %v6066_v62 }
 0x358   :  { %5940 = vmatpush3.bf16.msra.mxu1 %v6067_v28  ;;  %5919 = vmatprep.subr.bf16.mxu0 %v6068_v53 }
 0x359   :  { %5941 = vmatprep.subr.bf16.mxu1 %v6069_v15 }
 0x35b   :  { %5920 = vmatpush3.bf16.msra.mxu0 %v6070_v6 }
 0x35c   :  { %5942 = vmatpush3.bf16.msra.mxu1 %v6071_v29  ;;  %5921 = vmatprep.subr.bf16.mxu0 %v6072_v30 }
 0x35d   :  { %5943 = vmatprep.subr.bf16.mxu1 %v6073_v31 }
 0x35f   :  { %5922 = vmatpush3.bf16.msra.mxu0 %v6074_v34 }
 0x360   :  { %5944 = vmatpush3.bf16.msra.mxu1 %v6075_v35  ;;  %5923 = vmatprep.subr.bf16.mxu0 %v6076_v37 }
 0x361   :  { %5945 = vmatprep.subr.bf16.mxu1 %v6077_v38 }
 0x363   :  { %5924 = vmatpush3.bf16.msra.mxu0 %v6078_v40 }
 0x364   :  { %5946 = vmatpush3.bf16.msra.mxu1 %v6079_v42  ;;  %5925 = vmatprep.subr.bf16.mxu0 %v6080_v43 }
 0x365   :  { %5947 = vmatprep.subr.bf16.mxu1 %v6081_v0 }
 0x367   :  { %5926 = vmatpush3.bf16.msra.mxu0 %v6082_v12 }
 0x368   :  { %5948 = vmatpush3.bf16.msra.mxu1 %v6083_v39  ;;  %5927 = vmatprep.subr.bf16.mxu0 %v6084_v49 }
 0x369   :  { %5949 = vmatprep.subr.bf16.mxu1 %v6085_v18 }
 0x36b   :  { %5928 = vmatpush3.bf16.msra.mxu0 %v6086_v21 }
 0x36c   :  { %5950 = vmatpush3.bf16.msra.mxu1 %v6087_v51 }
 0x401   :  { %v4336_v60 = vpop.f32.mrb[12].mxu0 }
 0x402   :  { %v5961_v59 = vadd.f32 %v4336_v60, %v1270_v55  ;;  %v4500_v54 = vpop.f32.mrb[12].mxu1  ;;  %v4338_v61 = vpop.f32.mrb[13].mxu0 }
 0x403   :  { %v5963_v63 = vadd.f32 %v4500_v54, %v1278_v44  ;;  %v5962_v1 = vadd.f32 %v4338_v61, %v1274_v56  ;;  %v4502_v2 = vpop.f32.mrb[13].mxu1  ;;  %v4340_v32 = vpop.f32.mrb[14].mxu0 }
 0x404   :  { %vm4511_vm12 = vcmp.gt.f32.partialorder %v5961_v59, 0.0  ;;  %v4520_v3 = vmul.f32 %v5961_v59, %v6525_v23  ;;  %v5964_v46 = vadd.f32 %v4502_v2, %v1282_v57  ;;  %v4504_v4 = vpop.f32.mrb[14].mxu1  ;;  %v4341_v14 = vpop.f32.mrb[15].mxu0 }
 0x405   :  { %vm4513_vm13 = vcmp.gt.f32.partialorder %v5963_v63, 0.0  ;;  %v4522_v33 = vmul.f32 %v5963_v63, %v6525_v23  ;;  %vm4512_vm14 = vcmp.gt.f32.partialorder %v5962_v1, 0.0  ;;  %v4521_v13 = vmul.f32 %v5962_v1, %v6525_v23  ;;  %v4505_v52 = vpop.f32.mrb[15].mxu1 }
 0x406   :  { %v4528_v58 = vsel %vm4511_vm12, %v5961_v59, %v4520_v3  ;;  %vm4514_vm15 = vcmp.gt.f32.partialorder %v5964_v46, 0.0  ;;  %v4523_v5 = vmul.f32 %v5964_v46, %v6525_v23 }
 0x407   :  { %v4530_v17 = vsel %vm4513_vm13, %v5963_v63, %v4522_v33  ;;  %v4529_v19 = vsel %vm4512_vm14, %v5962_v1, %v4521_v13  ;;  %v4536_v47 = vpack.c.bf16 %v4528_v58, %v4528_v58 }
 0x408   :  { %v4537_v7 = vpack.c.bf16 %v4529_v19, %v4529_v19  ;;  %v4531_v8 = vsel %vm4514_vm15, %v5964_v46, %v4523_v5  ;;  %v4538_v48 = vpack.c.bf16 %v4530_v17, %v4530_v17 }
 0x409   :  { %v4539_v9 = vpack.c.bf16 %v4531_v8, %v4531_v8 }
 0x40a   :  { %5171 = vmatprep.mubr.bf16.mxu0 %v4537_v7 }
 0x40b   :  { %5211 = vmatprep.mubr.bf16.mxu1 %v4539_v9  ;;  %5172 = vmatmul.mubr.bf16.vlgmr.msra.gmra.mrb[20].mxu0 %v4536_v47 }
 0x40c   :  { %5212 = vmatmul.mubr.bf16.vlgmr.msra.gmra.mrb[20].mxu1 %v4538_v48 }
 0x421   :  { %v5885_v10 = vpop.f32.mrb[16].mxu0 }
 0x422   :  { %v5907_v11 = vpop.f32.mrb[16].mxu1  ;;  %v5886_v41 = vpop.f32.mrb[17].mxu0 }
 0x423   :  { %v5887_v20 = vadd.f32 %v5886_v41, %v5885_v10  ;;  %v5908_v16 = vpop.f32.mrb[17].mxu1  ;;  %v5888_v22 = vpop.f32.mrb[18].mxu0 }
 0x424   :  { %v5909_v24 = vadd.f32 %v5908_v16, %v5907_v11  ;;  %v5910_v23 = vpop.f32.mrb[18].mxu1  ;;  %v5889_v25 = vpop.f32.mrb[19].mxu0 }
 0x425   :  { %v5094_v26 = vadd.f32 %v5887_v20, %v5804_v36  ;;  %v5911_v45 = vpop.f32.mrb[19].mxu1 }
 0x427   :  { %v5134_v27 = vadd.f32 %v5909_v24, %v5094_v26 }
 0x4de   :  { %v5929_v50 = vpop.f32.mrb[20].mxu0 }
 0x4df   :  { %v5951_v62 = vpop.f32.mrb[20].mxu1  ;;  %v5930_v28 = vpop.f32.mrb[21].mxu0 }
 0x4e0   :  { %v5931_v53 = vadd.f32 %v5930_v28, %v5929_v50  ;;  %v5952_v15 = vpop.f32.mrb[21].mxu1  ;;  %v5932_v6 = vpop.f32.mrb[22].mxu0 }
 0x4e1   :  { %v5953_v29 = vadd.f32 %v5952_v15, %v5951_v62  ;;  %v5954_v30 = vpop.f32.mrb[22].mxu1  ;;  %v5933_v31 = vpop.f32.mrb[23].mxu0 }
 0x4e2   :  { %v5174_v34 = vadd.f32 %v5931_v53, %v5134_v27  ;;  %v5955_v35 = vpop.f32.mrb[23].mxu1 }
 0x4e4   :  { %v5214_v37 = vadd.f32 %v5953_v29, %v5174_v34 }
 0x4e6   :  { %5219 = vst [vmem:[%s6570_s9] sm:$0xff] %v5214_v37 }
 0x4e7   :  { %5224 = vsyncpa [#allocation5], 1 }
 0x4e8   :  { %5225 = vsyncpa [#allocation7], 1 }
 0x4e9   :  { %5226 = vsyncpa [#allocation10], 1 }
 0x4ea   :  { %5227 = vsyncpa [#allocation13], 1 }

</bundles_post_ra>
